<compile_context>
chip_gen: v5e
topology: v5e:2x2
jax: 0.10.0
libtpu: 0.0.40
codegen_flags: <defaults>
</compile_context>

<pallas_src>
import functools
import math

import jax
import jax.numpy as jnp
from jax.experimental import pallas as pl
from jax.experimental.pallas import tpu as pltpu

EPS = 1e-5


# ---------------------------------------------------------------------------
# In-kernel math helpers.
# ---------------------------------------------------------------------------
def _erf(x):
    # Abramowitz & Stegun 7.1.26 rational approximation (|err| < 1.5e-7);
    # used because an exact-erf lowering on Mosaic is not guaranteed.
    a1, a2, a3, a4, a5 = (0.254829592, -0.284496736, 1.421413741,
                          -1.453152027, 1.061405429)
    p = 0.3275911
    sgn = jnp.where(x >= 0.0, 1.0, -1.0)
    ax = jnp.abs(x)
    t = 1.0 / (1.0 + p * ax)
    poly = ((((a5 * t + a4) * t + a3) * t + a2) * t + a1) * t
    return sgn * (1.0 - poly * jnp.exp(-ax * ax))


def _gelu_exact(x):
    # nn.GELU() default: 0.5 * x * (1 + erf(x / sqrt(2)))
    return 0.5 * x * (1.0 + _erf(x * 0.7071067811865476))


def _layernorm(x, w, b, eps):
    mu = jnp.mean(x, axis=-1, keepdims=True)
    var = jnp.mean((x - mu) * (x - mu), axis=-1, keepdims=True)
    return (x - mu) * jax.lax.rsqrt(var + eps) * w + b


# ---------------------------------------------------------------------------
# Fused whole-model kernel: grid = (batch_blocks, layer).
#   x_ref      : (bb*S, H)   hidden state block (only read at layer 0)
#   cs_ref     : (2, S, hd)  [cos, sin] RoPE tables
#   ln_ref     : (1, 4, H)   [ln1_w, ln1_b, ln2_w, ln2_b] for this layer
#   wqkv_ref   : (1, H, 3H)  fused QKV weight (bf16)
#   wo_ref     : (1, H, H)   output projection (bf16)
#   wgu_ref    : (1, H, 2I)  fused gate|up weight (bf16)
#   wdown_ref  : (1, I, H)   down projection (bf16)
#   fn_ref     : (2, H)      [final_norm_w, final_norm_b]
#   o_ref      : (bb*S, H)   output block (written on last layer only)
#   x_carry    : (bb*S, H)   VMEM residual-stream carry
# ---------------------------------------------------------------------------
def lunar_stack_kernel(x_ref, cs_ref, ln_ref,
                       wqkv_ref, wo_ref, wgu_ref, wdown_ref,
                       fn_ref, o_ref, x_carry,
                       *, bb, seq, num_heads, head_dim, inter, eps, w_dtype):
    layer = pl.program_id(1)
    num_layers = pl.num_programs(1)
    nh, hd, S = num_heads, head_dim, seq
    H = nh * hd
    BS = bb * S

    # Load the residual stream into VMEM at the first layer; it stays resident
    # for the whole layer sweep of this batch block.
    @pl.when(layer == 0)
    def _():
        x_carry[...] = x_ref[...]

    x = x_carry[...]                                         # (BS, H) f32

    lnp = ln_ref[0]                                          # (4, H)
    ln1w, ln1b, ln2w, ln2b = lnp[0], lnp[1], lnp[2], lnp[3]

    # ---------------- attention ----------------
    h1 = _layernorm(x, ln1w, ln1b, eps)
    qkv = jnp.dot(h1.astype(w_dtype), wqkv_ref[0],
                  preferred_element_type=jnp.float32)        # (BS, 3H)

    cos = cs_ref[0]                                          # (S, hd)
    sin = cs_ref[1]                                          # (S, hd)
    scale = 1.0 / math.sqrt(hd)

    row = jax.lax.broadcasted_iota(jnp.int32, (S, S), 0)
    col = jax.lax.broadcasted_iota(jnp.int32, (S, S), 1)
    causal = (row >= col)[None, :, :]                        # (1, S, S)

    def rope(xh):                                            # xh: (bb, S, hd)
        # rotate_half(x) = concat(-x[..., hd/2:], x[..., :hd/2])
        rot = jnp.concatenate([-xh[..., hd // 2:], xh[..., :hd // 2]], axis=-1)
        return xh * cos[None] + rot * sin[None]

    attn2d = jnp.zeros((BS, H), jnp.float32)
    for h in range(nh):
        # Head slices of the fused QKV are exact 128-lane groups (hd == 128);
        # the (BS, hd) -> (bb, S, hd) reshape is a pure sublane split.
        qh = qkv[:, h * hd:(h + 1) * hd].reshape(bb, S, hd)
        kh = qkv[:, H + h * hd:H + (h + 1) * hd].reshape(bb, S, hd)
        vh = qkv[:, 2 * H + h * hd:2 * H + (h + 1) * hd].reshape(bb, S, hd)

        qh = rope(qh) * scale            # fold softmax scale into q (O(S*H))
        kh = rope(kh)

        s = jnp.einsum('bqd,bkd->bqk', qh, kh,
                       preferred_element_type=jnp.float32)   # (bb, S, S)
        s = jnp.where(causal, s, -1e30)
        s = s - jnp.max(s, axis=-1, keepdims=True)
        p = jnp.exp(s)
        p = p / jnp.sum(p, axis=-1, keepdims=True)
        oh = jnp.einsum('bqk,bkd->bqd', p, vh,
                        preferred_element_type=jnp.float32)  # (bb, S, hd)

        # Per-head accumulation into W_o (avoids concatenating heads).
        attn2d = attn2d + jnp.dot(
            oh.reshape(BS, hd).astype(w_dtype),
            wo_ref[0, h * hd:(h + 1) * hd, :],
            preferred_element_type=jnp.float32)

    x1 = x + attn2d                                          # residual #1

    # ---------------- gated-GELU MLP ----------------
    h2 = _layernorm(x1, ln2w, ln2b, eps)
    gu = jnp.dot(h2.astype(w_dtype), wgu_ref[0],
                 preferred_element_type=jnp.float32)         # (BS, 2I)
    mid = _gelu_exact(gu[:, :inter]) * gu[:, inter:]
    y = x1 + jnp.dot(mid.astype(w_dtype), wdown_ref[0],
                     preferred_element_type=jnp.float32)     # residual #2

    x_carry[...] = y

    # Final LayerNorm folded into the last layer iteration; the output block
    # index is constant across layers so it is written back to HBM once.
    @pl.when(layer == num_layers - 1)
    def _():
        fn = fn_ref[...]                                     # (2, H)
        o_ref[...] = _layernorm(x_carry[...], fn[0], fn[1], eps)


# ---------------------------------------------------------------------------
# Wrapper.
# ---------------------------------------------------------------------------
def rope_tables(seq_len, head_dim):
    inv_freq = 1.0 / (10000.0 ** (jnp.arange(0, head_dim, 2, dtype=jnp.float32)
                                  / head_dim))
    t = jnp.arange(seq_len, dtype=jnp.float32)
    freqs = jnp.outer(t, inv_freq)                        # (S, hd/2)
    emb = jnp.concatenate([freqs, freqs], axis=-1)        # (S, hd)
    return jnp.cos(emb), jnp.sin(emb)


def lunar_model(input_ids, params, *, num_heads, batch_blocks=1):
    # Embedding lookup (gather) stays as plain-JAX glue.
    # TODO(synk): could be fused into the kernel with scalar-prefetch +
    # pl.Element row-gather BlockSpecs if the table must stay in HBM.
    x = jnp.take(params["embed"], input_ids, axis=0).astype(jnp.float32)  # (B,S,H)
    B, S, H = x.shape
    hd = H // num_heads
    L = params["w_qkv"].shape[0]
    I = params["w_gu"].shape[2] // 2
    assert B % batch_blocks == 0
    bb = B // batch_blocks                 # batch rows per grid block

    cos, sin = rope_tables(S, hd)
    cs = jnp.stack([cos, sin], axis=0)                                  # (2,S,hd)
    ln = jnp.stack([params["ln1_w"], params["ln1_b"],
                    params["ln2_w"], params["ln2_b"]], axis=1)          # (L,4,H)
    fn = jnp.stack([params["norm_w"], params["norm_b"]], axis=0)        # (2,H)

    # bf16 weights, f32 activations + f32 MXU accumulation.
    w_dtype = jnp.bfloat16
    wqkv = params["w_qkv"].astype(w_dtype)
    wo = params["w_o"].astype(w_dtype)
    wgu = params["w_gu"].astype(w_dtype)
    wdown = params["w_down"].astype(w_dtype)

    x2d = x.reshape(B * S, H)

    kernel = functools.partial(lunar_stack_kernel, bb=bb, seq=S,
                               num_heads=num_heads, head_dim=hd,
                               inter=I, eps=EPS, w_dtype=w_dtype)

    out2d = pl.pallas_call(
        kernel,
        out_shape=jax.ShapeDtypeStruct((B * S, H), jnp.float32),
        grid=(batch_blocks, L),
        in_specs=[
            pl.BlockSpec((bb * S, H), lambda b, l: (b, 0)),        # hidden state
            pl.BlockSpec((2, S, hd), lambda b, l: (0, 0, 0)),      # cos/sin
            pl.BlockSpec((1, 4, H), lambda b, l: (l, 0, 0)),       # LN params
            pl.BlockSpec((1, H, 3 * H), lambda b, l: (l, 0, 0)),   # fused W_qkv
            pl.BlockSpec((1, H, H), lambda b, l: (l, 0, 0)),       # W_o
            pl.BlockSpec((1, H, 2 * I), lambda b, l: (l, 0, 0)),   # fused W_gate|up
            pl.BlockSpec((1, I, H), lambda b, l: (l, 0, 0)),       # W_down
            pl.BlockSpec((2, H), lambda b, l: (0, 0)),             # final norm
        ],
        out_specs=pl.BlockSpec((bb * S, H), lambda b, l: (b, 0)),
        scratch_shapes=[pltpu.VMEM((bb * S, H), jnp.float32)],     # residual carry
        compiler_params=pltpu.CompilerParams(
            dimension_semantics=("parallel", "arbitrary")),
    )(x2d, cs, ln, wqkv, wo, wgu, wdown, fn)

    return out2d.reshape(B, S, H)


# ---------------------------------------------------------------------------
# Deterministic parameter initialization (mirrors LunarModel._init_weights:
# linear/embedding weights ~ N(0, 0.02), LayerNorm weight=1, bias=0, no bias
# on the Linear layers).  Linear weights are stored pre-transposed (in, out);
# QKV and gate/up are pre-fused (column-concatenated), and all per-layer
# weights are stacked on a leading layer axis for the single pallas_call.
# ---------------------------------------------------------------------------
def init_params(key, *, vocab, hidden, intermediate, num_layers, std=0.02):
    H, I, L = hidden, intermediate, num_layers
    ks = jax.random.split(key, 5)
    nrm = lambda k, shape: (std * jax.random.normal(k, shape)).astype(jnp.float32)
    return {
        "embed": nrm(ks[0], (vocab, H)),
        "w_qkv": nrm(ks[1], (L, H, 3 * H)),
        "w_o": nrm(ks[2], (L, H, H)),
        "w_gu": nrm(ks[3], (L, H, 2 * I)),
        "w_down": nrm(ks[4], (L, I, H)),
        "ln1_w": jnp.ones((L, H), jnp.float32),
        "ln1_b": jnp.zeros((L, H), jnp.float32),
        "ln2_w": jnp.ones((L, H), jnp.float32),
        "ln2_b": jnp.zeros((L, H), jnp.float32),
        "norm_w": jnp.ones((H,), jnp.float32),
        "norm_b": jnp.zeros((H,), jnp.float32),
    }


if __name__ == "__main__":
    # Small configuration consistent with LunarConfig's structure, chosen so
    # every lane dimension is a multiple of 128 (hidden, intermediate) and
    # head_dim == 128 (lane-group aligned heads).
    VOCAB = 256
    HIDDEN = 256
    NUM_HEADS = 2          # head_dim = 128
    INTERMEDIATE = 512
    NUM_LAYERS = 2
    BATCH = 2
    SEQ = 16

    key = jax.random.PRNGKey(0)
    k_param, k_ids = jax.random.split(key)
    params = init_params(k_param, vocab=VOCAB, hidden=HIDDEN,
                         intermediate=INTERMEDIATE, num_layers=NUM_LAYERS)
    input_ids = jax.random.randint(k_ids, (BATCH, SEQ), 0, VOCAB, dtype=jnp.int32)

    # batch_blocks=1: weights streamed once per layer (best for v5e/v6e).
    # On v7x, batch_blocks=2 would shard the batch axis across both TCs.
    out = lunar_model(input_ids, params, num_heads=NUM_HEADS, batch_blocks=1)
    out = jax.block_until_ready(out)
    assert out.shape == (BATCH, SEQ, HIDDEN)
    assert bool(jnp.all(jnp.isfinite(out)))
    print("KERNEL_OK")
</pallas_src>

<mosaic_0001>
module attributes {stable_mosaic.version = 11 : i64} {
  func.func @lunar_stack_kernel(%arg0: i32, %arg1: i32, %arg2: memref<32x256xf32, #tpu.memory_space<vmem>>, %arg3: memref<2x16x128xf32, #tpu.memory_space<vmem>>, %arg4: memref<1x4x256xf32, #tpu.memory_space<vmem>>, %arg5: memref<1x256x768xbf16, #tpu.memory_space<vmem>>, %arg6: memref<1x256x256xbf16, #tpu.memory_space<vmem>>, %arg7: memref<1x256x1024xbf16, #tpu.memory_space<vmem>>, %arg8: memref<1x512x256xbf16, #tpu.memory_space<vmem>>, %arg9: memref<2x256xf32, #tpu.memory_space<vmem>>, %arg10: memref<32x256xf32, #tpu.memory_space<vmem>>, %arg11: memref<32x256xf32, #tpu.memory_space<vmem>>) attributes {dimension_semantics = [#tpu.dimension_semantics<parallel>, #tpu.dimension_semantics<arbitrary>], iteration_bounds = array<i64: 1, 2>, scalar_prefetch = 0 : i64, scratch_operands = 1 : i64, tpu.core_type = #tpu.core_type<tc>, window_params = [{transform_indices = @transform_0, window_bounds = array<i64: 32, 256>}, {pipeline_mode = #tpu.pipeline_mode<synchronous>, transform_indices = @transform_1, window_bounds = array<i64: 2, 16, 128>}, {transform_indices = @transform_2, window_bounds = array<i64: 1, 4, 256>}, {transform_indices = @transform_3, window_bounds = array<i64: 1, 256, 768>}, {transform_indices = @transform_4, window_bounds = array<i64: 1, 256, 256>}, {transform_indices = @transform_5, window_bounds = array<i64: 1, 256, 1024>}, {transform_indices = @transform_6, window_bounds = array<i64: 1, 512, 256>}, {pipeline_mode = #tpu.pipeline_mode<synchronous>, transform_indices = @transform_7, window_bounds = array<i64: 2, 256>}, {transform_indices = @transform_8, window_bounds = array<i64: 32, 256>}]} {
    %c0_i32 = arith.constant 0 : i32
    %0 = arith.cmpi eq, %arg1, %c0_i32 : i32
    %1 = arith.extui %0 : i1 to i32
    %c0_i32_0 = arith.constant 0 : i32
    %2 = arith.cmpi ne, %1, %c0_i32_0 : i32
    scf.if %2 {
      %c0_74 = arith.constant 0 : index
      %c0_75 = arith.constant 0 : index
      %243 = vector.load %arg2[%c0_74, %c0_75] : memref<32x256xf32, #tpu.memory_space<vmem>>, vector<32x256xf32>
      %c0_76 = arith.constant 0 : index
      %c0_77 = arith.constant 0 : index
      %244 = vector.load %arg11[%c0_76, %c0_77] : memref<32x256xf32, #tpu.memory_space<vmem>>, vector<32x256xf32>
      tpu.vector_store %arg11[%c0_76, %c0_77], %243 {strides = array<i32>} : memref<32x256xf32, #tpu.memory_space<vmem>>, vector<32x256xf32>,
    } else {
    }
    %c0 = arith.constant 0 : index
    %c0_1 = arith.constant 0 : index
    %3 = vector.load %arg11[%c0, %c0_1] : memref<32x256xf32, #tpu.memory_space<vmem>>, vector<32x256xf32>
    %c0_2 = arith.constant 0 : index
    %c0_3 = arith.constant 0 : index
    %c0_4 = arith.constant 0 : index
    %4 = vector.load %arg4[%c0_2, %c0_3, %c0_4] : memref<1x4x256xf32, #tpu.memory_space<vmem>>, vector<1x4x256xf32>
    %5 = vector.shape_cast %4 : vector<1x4x256xf32> to vector<4x256xf32>
    %6 = vector.extract_strided_slice %5 {offsets = [0, 0], sizes = [1, 256], strides = [1, 1]} : vector<4x256xf32> to vector<1x256xf32>
    %7 = vector.shape_cast %6 : vector<1x256xf32> to vector<256xf32>
    %8 = vector.extract_strided_slice %5 {offsets = [1, 0], sizes = [1, 256], strides = [1, 1]} : vector<4x256xf32> to vector<1x256xf32>
    %9 = vector.shape_cast %8 : vector<1x256xf32> to vector<256xf32>
    %10 = vector.extract_strided_slice %5 {offsets = [2, 0], sizes = [1, 256], strides = [1, 1]} : vector<4x256xf32> to vector<1x256xf32>
    %11 = vector.shape_cast %10 : vector<1x256xf32> to vector<256xf32>
    %12 = vector.extract_strided_slice %5 {offsets = [3, 0], sizes = [1, 256], strides = [1, 1]} : vector<4x256xf32> to vector<1x256xf32>
    %13 = vector.shape_cast %12 : vector<1x256xf32> to vector<256xf32>
    %cst = arith.constant dense<0.000000e+00> : vector<32xf32>
    %14 = vector.multi_reduction <add>, %3, %cst [1] : vector<32x256xf32> to vector<32xf32>
    %15 = vector.shape_cast %14 : vector<32xf32> to vector<32x1xf32>
    %cst_5 = arith.constant 2.560000e+02 : f32
    %16 = vector.broadcast %cst_5 : f32 to vector<32x1xf32>
    %17 = arith.divf %15, %16 : vector<32x1xf32>
    %18 = vector.broadcast %17 : vector<32x1xf32> to vector<32x256xf32>
    %19 = arith.subf %3, %18 : vector<32x256xf32>
    %20 = vector.broadcast %17 : vector<32x1xf32> to vector<32x256xf32>
    %21 = arith.subf %3, %20 : vector<32x256xf32>
    %22 = arith.mulf %19, %21 : vector<32x256xf32>
    %cst_6 = arith.constant dense<0.000000e+00> : vector<32xf32>
    %23 = vector.multi_reduction <add>, %22, %cst_6 [1] : vector<32x256xf32> to vector<32xf32>
    %24 = vector.shape_cast %23 : vector<32xf32> to vector<32x1xf32>
    %cst_7 = arith.constant 2.560000e+02 : f32
    %25 = vector.broadcast %cst_7 : f32 to vector<32x1xf32>
    %26 = arith.divf %24, %25 : vector<32x1xf32>
    %27 = vector.broadcast %17 : vector<32x1xf32> to vector<32x256xf32>
    %28 = arith.subf %3, %27 : vector<32x256xf32>
    %cst_8 = arith.constant 9.99999974E-6 : f32
    %29 = vector.broadcast %cst_8 : f32 to vector<32x1xf32>
    %30 = arith.addf %26, %29 : vector<32x1xf32>
    %31 = math.rsqrt %30 : vector<32x1xf32>
    %32 = vector.broadcast %31 : vector<32x1xf32> to vector<32x256xf32>
    %33 = arith.mulf %28, %32 : vector<32x256xf32>
    %34 = vector.shape_cast %7 : vector<256xf32> to vector<1x256xf32>
    %35 = vector.broadcast %34 : vector<1x256xf32> to vector<32x256xf32>
    %36 = arith.mulf %33, %35 : vector<32x256xf32>
    %37 = vector.shape_cast %9 : vector<256xf32> to vector<1x256xf32>
    %38 = vector.broadcast %37 : vector<1x256xf32> to vector<32x256xf32>
    %39 = arith.addf %36, %38 : vector<32x256xf32>
    %40 = arith.truncf %39 : vector<32x256xf32> to vector<32x256xbf16>
    %c0_9 = arith.constant 0 : index
    %c0_10 = arith.constant 0 : index
    %c0_11 = arith.constant 0 : index
    %41 = vector.load %arg5[%c0_9, %c0_10, %c0_11] : memref<1x256x768xbf16, #tpu.memory_space<vmem>>, vector<1x256x768xbf16>
    %42 = vector.shape_cast %41 : vector<1x256x768xbf16> to vector<256x768xbf16>
    %cst_12 = arith.constant dense<0.000000e+00> : vector<32x768xf32>
    %43 = tpu.matmul %40, %42, %cst_12 {dimension_numbers = #tpu.dot_dimension_numbers<[1], [0], [0], [1], [0, 0, 1, 1], [], []>} : vector<32x256xbf16>, vector<256x768xbf16>, vector<32x768xf32> -> vector<32x768xf32>
    %c0_13 = arith.constant 0 : index
    %c0_14 = arith.constant 0 : index
    %c0_15 = arith.constant 0 : index
    %44 = vector.load %arg3[%c0_13, %c0_14, %c0_15] : memref<2x16x128xf32, #tpu.memory_space<vmem>>, vector<1x16x128xf32>
    %45 = vector.shape_cast %44 : vector<1x16x128xf32> to vector<16x128xf32>
    %c1 = arith.constant 1 : index
    %c0_16 = arith.constant 0 : index
    %c0_17 = arith.constant 0 : index
    %46 = vector.load %arg3[%c1, %c0_16, %c0_17] : memref<2x16x128xf32, #tpu.memory_space<vmem>>, vector<1x16x128xf32>
    %47 = vector.shape_cast %46 : vector<1x16x128xf32> to vector<16x128xf32>
    %48 = tpu.iota {dimensions = array<i32: 0>} : vector<16x16xi32>
    %49 = tpu.iota {dimensions = array<i32: 1>} : vector<16x16xi32>
    %50 = arith.cmpi sge, %48, %49 : vector<16x16xi32>
    %51 = vector.shape_cast %50 : vector<16x16xi1> to vector<1x16x16xi1>
    %cst_18 = arith.constant 0.000000e+00 : f32
    %52 = vector.broadcast %cst_18 : f32 to vector<32x256xf32>
    %53 = vector.extract_strided_slice %43 {offsets = [0, 0], sizes = [32, 128], strides = [1, 1]} : vector<32x768xf32> to vector<32x128xf32>
    %54 = vector.shape_cast %53 : vector<32x128xf32> to vector<2x16x128xf32>
    %55 = vector.extract_strided_slice %43 {offsets = [0, 256], sizes = [32, 128], strides = [1, 1]} : vector<32x768xf32> to vector<32x128xf32>
    %56 = vector.shape_cast %55 : vector<32x128xf32> to vector<2x16x128xf32>
    %57 = vector.extract_strided_slice %43 {offsets = [0, 512], sizes = [32, 128], strides = [1, 1]} : vector<32x768xf32> to vector<32x128xf32>
    %58 = vector.shape_cast %57 : vector<32x128xf32> to vector<2x16x128xf32>
    %59 = vector.extract_strided_slice %54 {offsets = [0, 0, 64], sizes = [2, 16, 64], strides = [1, 1, 1]} : vector<2x16x128xf32> to vector<2x16x64xf32>
    %cst_19 = arith.constant 0.000000e+00 : f32
    %60 = vector.broadcast %cst_19 : f32 to vector<2x16x64xf32>
    %61 = arith.subf %60, %59 : vector<2x16x64xf32>
    %62 = vector.extract_strided_slice %54 {offsets = [0, 0, 0], sizes = [2, 16, 64], strides = [1, 1, 1]} : vector<2x16x128xf32> to vector<2x16x64xf32>
    %63 = tpu.concatenate %61, %62 in 2 : vector<2x16x64xf32>, vector<2x16x64xf32> -> vector<2x16x128xf32>
    %64 = vector.shape_cast %45 : vector<16x128xf32> to vector<1x16x128xf32>
    %65 = vector.broadcast %64 : vector<1x16x128xf32> to vector<2x16x128xf32>
    %66 = arith.mulf %54, %65 : vector<2x16x128xf32>
    %67 = vector.shape_cast %47 : vector<16x128xf32> to vector<1x16x128xf32>
    %68 = vector.broadcast %67 : vector<1x16x128xf32> to vector<2x16x128xf32>
    %69 = arith.mulf %63, %68 : vector<2x16x128xf32>
    %70 = arith.addf %66, %69 : vector<2x16x128xf32>
    %cst_20 = arith.constant 0.0883883461 : f32
    %71 = vector.broadcast %cst_20 : f32 to vector<2x16x128xf32>
    %72 = arith.mulf %70, %71 : vector<2x16x128xf32>
    %73 = vector.extract_strided_slice %56 {offsets = [0, 0, 64], sizes = [2, 16, 64], strides = [1, 1, 1]} : vector<2x16x128xf32> to vector<2x16x64xf32>
    %cst_21 = arith.constant 0.000000e+00 : f32
    %74 = vector.broadcast %cst_21 : f32 to vector<2x16x64xf32>
    %75 = arith.subf %74, %73 : vector<2x16x64xf32>
    %76 = vector.extract_strided_slice %56 {offsets = [0, 0, 0], sizes = [2, 16, 64], strides = [1, 1, 1]} : vector<2x16x128xf32> to vector<2x16x64xf32>
    %77 = tpu.concatenate %75, %76 in 2 : vector<2x16x64xf32>, vector<2x16x64xf32> -> vector<2x16x128xf32>
    %78 = vector.shape_cast %45 : vector<16x128xf32> to vector<1x16x128xf32>
    %79 = vector.broadcast %78 : vector<1x16x128xf32> to vector<2x16x128xf32>
    %80 = arith.mulf %56, %79 : vector<2x16x128xf32>
    %81 = vector.shape_cast %47 : vector<16x128xf32> to vector<1x16x128xf32>
    %82 = vector.broadcast %81 : vector<1x16x128xf32> to vector<2x16x128xf32>
    %83 = arith.mulf %77, %82 : vector<2x16x128xf32>
    %84 = arith.addf %80, %83 : vector<2x16x128xf32>
    "tpu.trace_start"() <{level = 10 : i32, message = "bqd,bkd->bqk"}> : () -> ()
    %cst_22 = arith.constant dense<0.000000e+00> : vector<2x16x16xf32>
    %85 = tpu.matmul %72, %84, %cst_22 {dimension_numbers = #tpu.dot_dimension_numbers<[2], [2], [1], [1], [0, 0, 0, 1, 1, 1], [0], [0]>} : vector<2x16x128xf32>, vector<2x16x128xf32>, vector<2x16x16xf32> -> vector<2x16x16xf32>
    %cst_23 = arith.constant -1.000000e+30 : f32
    "tpu.trace_stop"() : () -> ()
    %86 = vector.shape_cast %51 : vector<1x16x16xi1> to vector<1x16x16xi1>
    %87 = vector.broadcast %86 : vector<1x16x16xi1> to vector<2x16x16xi1>
    %88 = vector.broadcast %cst_23 : f32 to vector<2x16x16xf32>
    %89 = arith.select %87, %85, %88 : vector<2x16x16xi1>, vector<2x16x16xf32>
    %cst_24 = arith.constant dense<0xFF800000> : vector<2x16xf32>
    %90 = vector.multi_reduction <maximumf>, %89, %cst_24 [2] : vector<2x16x16xf32> to vector<2x16xf32>
    %91 = vector.shape_cast %90 : vector<2x16xf32> to vector<2x16x1xf32>
    %92 = vector.broadcast %91 : vector<2x16x1xf32> to vector<2x16x16xf32>
    %93 = arith.subf %89, %92 : vector<2x16x16xf32>
    %94 = math.exp %93 : vector<2x16x16xf32>
    %cst_25 = arith.constant dense<0.000000e+00> : vector<2x16xf32>
    %95 = vector.multi_reduction <add>, %94, %cst_25 [2] : vector<2x16x16xf32> to vector<2x16xf32>
    %96 = vector.shape_cast %95 : vector<2x16xf32> to vector<2x16x1xf32>
    %97 = vector.broadcast %96 : vector<2x16x1xf32> to vector<2x16x16xf32>
    %98 = arith.divf %94, %97 : vector<2x16x16xf32>
    "tpu.trace_start"() <{level = 10 : i32, message = "bqk,bkd->bqd"}> : () -> ()
    %cst_26 = arith.constant dense<0.000000e+00> : vector<2x16x128xf32>
    %99 = tpu.matmul %98, %58, %cst_26 {dimension_numbers = #tpu.dot_dimension_numbers<[2], [1], [1], [2], [0, 0, 0, 1, 1, 2], [0], [0]>} : vector<2x16x16xf32>, vector<2x16x128xf32>, vector<2x16x128xf32> -> vector<2x16x128xf32>
    "tpu.trace_stop"() : () -> ()
    %100 = vector.shape_cast %99 : vector<2x16x128xf32> to vector<32x128xf32>
    %101 = arith.truncf %100 : vector<32x128xf32> to vector<32x128xbf16>
    %c0_27 = arith.constant 0 : index
    %c0_28 = arith.constant 0 : index
    %c0_29 = arith.constant 0 : index
    %102 = vector.load %arg6[%c0_27, %c0_28, %c0_29] : memref<1x256x256xbf16, #tpu.memory_space<vmem>>, vector<1x128x256xbf16>
    %103 = vector.shape_cast %102 : vector<1x128x256xbf16> to vector<128x256xbf16>
    %cst_30 = arith.constant dense<0.000000e+00> : vector<32x256xf32>
    %104 = tpu.matmul %101, %103, %cst_30 {dimension_numbers = #tpu.dot_dimension_numbers<[1], [0], [0], [1], [0, 0, 1, 1], [], []>} : vector<32x128xbf16>, vector<128x256xbf16>, vector<32x256xf32> -> vector<32x256xf32>
    %105 = arith.addf %52, %104 : vector<32x256xf32>
    %106 = vector.extract_strided_slice %43 {offsets = [0, 128], sizes = [32, 128], strides = [1, 1]} : vector<32x768xf32> to vector<32x128xf32>
    %107 = vector.shape_cast %106 : vector<32x128xf32> to vector<2x16x128xf32>
    %108 = vector.extract_strided_slice %43 {offsets = [0, 384], sizes = [32, 128], strides = [1, 1]} : vector<32x768xf32> to vector<32x128xf32>
    %109 = vector.shape_cast %108 : vector<32x128xf32> to vector<2x16x128xf32>
    %110 = vector.extract_strided_slice %43 {offsets = [0, 640], sizes = [32, 128], strides = [1, 1]} : vector<32x768xf32> to vector<32x128xf32>
    %111 = vector.shape_cast %110 : vector<32x128xf32> to vector<2x16x128xf32>
    %112 = vector.extract_strided_slice %107 {offsets = [0, 0, 64], sizes = [2, 16, 64], strides = [1, 1, 1]} : vector<2x16x128xf32> to vector<2x16x64xf32>
    %cst_31 = arith.constant 0.000000e+00 : f32
    %113 = vector.broadcast %cst_31 : f32 to vector<2x16x64xf32>
    %114 = arith.subf %113, %112 : vector<2x16x64xf32>
    %115 = vector.extract_strided_slice %107 {offsets = [0, 0, 0], sizes = [2, 16, 64], strides = [1, 1, 1]} : vector<2x16x128xf32> to vector<2x16x64xf32>
    %116 = tpu.concatenate %114, %115 in 2 : vector<2x16x64xf32>, vector<2x16x64xf32> -> vector<2x16x128xf32>
    %117 = vector.shape_cast %45 : vector<16x128xf32> to vector<1x16x128xf32>
    %118 = vector.broadcast %117 : vector<1x16x128xf32> to vector<2x16x128xf32>
    %119 = arith.mulf %107, %118 : vector<2x16x128xf32>
    %120 = vector.shape_cast %47 : vector<16x128xf32> to vector<1x16x128xf32>
    %121 = vector.broadcast %120 : vector<1x16x128xf32> to vector<2x16x128xf32>
    %122 = arith.mulf %116, %121 : vector<2x16x128xf32>
    %123 = arith.addf %119, %122 : vector<2x16x128xf32>
    %cst_32 = arith.constant 0.0883883461 : f32
    %124 = vector.broadcast %cst_32 : f32 to vector<2x16x128xf32>
    %125 = arith.mulf %123, %124 : vector<2x16x128xf32>
    %126 = vector.extract_strided_slice %109 {offsets = [0, 0, 64], sizes = [2, 16, 64], strides = [1, 1, 1]} : vector<2x16x128xf32> to vector<2x16x64xf32>
    %cst_33 = arith.constant 0.000000e+00 : f32
    %127 = vector.broadcast %cst_33 : f32 to vector<2x16x64xf32>
    %128 = arith.subf %127, %126 : vector<2x16x64xf32>
    %129 = vector.extract_strided_slice %109 {offsets = [0, 0, 0], sizes = [2, 16, 64], strides = [1, 1, 1]} : vector<2x16x128xf32> to vector<2x16x64xf32>
    %130 = tpu.concatenate %128, %129 in 2 : vector<2x16x64xf32>, vector<2x16x64xf32> -> vector<2x16x128xf32>
    %131 = vector.shape_cast %45 : vector<16x128xf32> to vector<1x16x128xf32>
    %132 = vector.broadcast %131 : vector<1x16x128xf32> to vector<2x16x128xf32>
    %133 = arith.mulf %109, %132 : vector<2x16x128xf32>
    %134 = vector.shape_cast %47 : vector<16x128xf32> to vector<1x16x128xf32>
    %135 = vector.broadcast %134 : vector<1x16x128xf32> to vector<2x16x128xf32>
    %136 = arith.mulf %130, %135 : vector<2x16x128xf32>
    %137 = arith.addf %133, %136 : vector<2x16x128xf32>
    "tpu.trace_start"() <{level = 10 : i32, message = "bqd,bkd->bqk"}> : () -> ()
    %cst_34 = arith.constant dense<0.000000e+00> : vector<2x16x16xf32>
    %138 = tpu.matmul %125, %137, %cst_34 {dimension_numbers = #tpu.dot_dimension_numbers<[2], [2], [1], [1], [0, 0, 0, 1, 1, 1], [0], [0]>} : vector<2x16x128xf32>, vector<2x16x128xf32>, vector<2x16x16xf32> -> vector<2x16x16xf32>
    %cst_35 = arith.constant -1.000000e+30 : f32
    "tpu.trace_stop"() : () -> ()
    %139 = vector.shape_cast %51 : vector<1x16x16xi1> to vector<1x16x16xi1>
    %140 = vector.broadcast %139 : vector<1x16x16xi1> to vector<2x16x16xi1>
    %141 = vector.broadcast %cst_35 : f32 to vector<2x16x16xf32>
    %142 = arith.select %140, %138, %141 : vector<2x16x16xi1>, vector<2x16x16xf32>
    %cst_36 = arith.constant dense<0xFF800000> : vector<2x16xf32>
    %143 = vector.multi_reduction <maximumf>, %142, %cst_36 [2] : vector<2x16x16xf32> to vector<2x16xf32>
    %144 = vector.shape_cast %143 : vector<2x16xf32> to vector<2x16x1xf32>
    %145 = vector.broadcast %144 : vector<2x16x1xf32> to vector<2x16x16xf32>
    %146 = arith.subf %142, %145 : vector<2x16x16xf32>
    %147 = math.exp %146 : vector<2x16x16xf32>
    %cst_37 = arith.constant dense<0.000000e+00> : vector<2x16xf32>
    %148 = vector.multi_reduction <add>, %147, %cst_37 [2] : vector<2x16x16xf32> to vector<2x16xf32>
    %149 = vector.shape_cast %148 : vector<2x16xf32> to vector<2x16x1xf32>
    %150 = vector.broadcast %149 : vector<2x16x1xf32> to vector<2x16x16xf32>
    %151 = arith.divf %147, %150 : vector<2x16x16xf32>
    "tpu.trace_start"() <{level = 10 : i32, message = "bqk,bkd->bqd"}> : () -> ()
    %cst_38 = arith.constant dense<0.000000e+00> : vector<2x16x128xf32>
    %152 = tpu.matmul %151, %111, %cst_38 {dimension_numbers = #tpu.dot_dimension_numbers<[2], [1], [1], [2], [0, 0, 0, 1, 1, 2], [0], [0]>} : vector<2x16x16xf32>, vector<2x16x128xf32>, vector<2x16x128xf32> -> vector<2x16x128xf32>
    "tpu.trace_stop"() : () -> ()
    %153 = vector.shape_cast %152 : vector<2x16x128xf32> to vector<32x128xf32>
    %154 = arith.truncf %153 : vector<32x128xf32> to vector<32x128xbf16>
    %c0_39 = arith.constant 0 : index
    %c128 = arith.constant 128 : index
    %c0_40 = arith.constant 0 : index
    %155 = vector.load %arg6[%c0_39, %c128, %c0_40] : memref<1x256x256xbf16, #tpu.memory_space<vmem>>, vector<1x128x256xbf16>
    %156 = vector.shape_cast %155 : vector<1x128x256xbf16> to vector<128x256xbf16>
    %cst_41 = arith.constant dense<0.000000e+00> : vector<32x256xf32>
    %157 = tpu.matmul %154, %156, %cst_41 {dimension_numbers = #tpu.dot_dimension_numbers<[1], [0], [0], [1], [0, 0, 1, 1], [], []>} : vector<32x128xbf16>, vector<128x256xbf16>, vector<32x256xf32> -> vector<32x256xf32>
    %158 = arith.addf %105, %157 : vector<32x256xf32>
    %159 = arith.addf %3, %158 : vector<32x256xf32>
    %cst_42 = arith.constant dense<0.000000e+00> : vector<32xf32>
    %160 = vector.multi_reduction <add>, %159, %cst_42 [1] : vector<32x256xf32> to vector<32xf32>
    %161 = vector.shape_cast %160 : vector<32xf32> to vector<32x1xf32>
    %cst_43 = arith.constant 2.560000e+02 : f32
    %162 = vector.broadcast %cst_43 : f32 to vector<32x1xf32>
    %163 = arith.divf %161, %162 : vector<32x1xf32>
    %164 = vector.broadcast %163 : vector<32x1xf32> to vector<32x256xf32>
    %165 = arith.subf %159, %164 : vector<32x256xf32>
    %166 = vector.broadcast %163 : vector<32x1xf32> to vector<32x256xf32>
    %167 = arith.subf %159, %166 : vector<32x256xf32>
    %168 = arith.mulf %165, %167 : vector<32x256xf32>
    %cst_44 = arith.constant dense<0.000000e+00> : vector<32xf32>
    %169 = vector.multi_reduction <add>, %168, %cst_44 [1] : vector<32x256xf32> to vector<32xf32>
    %170 = vector.shape_cast %169 : vector<32xf32> to vector<32x1xf32>
    %cst_45 = arith.constant 2.560000e+02 : f32
    %171 = vector.broadcast %cst_45 : f32 to vector<32x1xf32>
    %172 = arith.divf %170, %171 : vector<32x1xf32>
    %173 = vector.broadcast %163 : vector<32x1xf32> to vector<32x256xf32>
    %174 = arith.subf %159, %173 : vector<32x256xf32>
    %cst_46 = arith.constant 9.99999974E-6 : f32
    %175 = vector.broadcast %cst_46 : f32 to vector<32x1xf32>
    %176 = arith.addf %172, %175 : vector<32x1xf32>
    %177 = math.rsqrt %176 : vector<32x1xf32>
    %178 = vector.broadcast %177 : vector<32x1xf32> to vector<32x256xf32>
    %179 = arith.mulf %174, %178 : vector<32x256xf32>
    %180 = vector.shape_cast %11 : vector<256xf32> to vector<1x256xf32>
    %181 = vector.broadcast %180 : vector<1x256xf32> to vector<32x256xf32>
    %182 = arith.mulf %179, %181 : vector<32x256xf32>
    %183 = vector.shape_cast %13 : vector<256xf32> to vector<1x256xf32>
    %184 = vector.broadcast %183 : vector<1x256xf32> to vector<32x256xf32>
    %185 = arith.addf %182, %184 : vector<32x256xf32>
    %186 = arith.truncf %185 : vector<32x256xf32> to vector<32x256xbf16>
    %c0_47 = arith.constant 0 : index
    %c0_48 = arith.constant 0 : index
    %c0_49 = arith.constant 0 : index
    %187 = vector.load %arg7[%c0_47, %c0_48, %c0_49] : memref<1x256x1024xbf16, #tpu.memory_space<vmem>>, vector<1x256x1024xbf16>
    %188 = vector.shape_cast %187 : vector<1x256x1024xbf16> to vector<256x1024xbf16>
    %cst_50 = arith.constant dense<0.000000e+00> : vector<32x1024xf32>
    %189 = tpu.matmul %186, %188, %cst_50 {dimension_numbers = #tpu.dot_dimension_numbers<[1], [0], [0], [1], [0, 0, 1, 1], [], []>} : vector<32x256xbf16>, vector<256x1024xbf16>, vector<32x1024xf32> -> vector<32x1024xf32>
    %190 = vector.extract_strided_slice %189 {offsets = [0, 0], sizes = [32, 512], strides = [1, 1]} : vector<32x1024xf32> to vector<32x512xf32>
    %cst_51 = arith.constant 5.000000e-01 : f32
    %191 = vector.broadcast %cst_51 : f32 to vector<32x512xf32>
    %192 = arith.mulf %191, %190 : vector<32x512xf32>
    %cst_52 = arith.constant 0.707106769 : f32
    %193 = vector.broadcast %cst_52 : f32 to vector<32x512xf32>
    %194 = arith.mulf %190, %193 : vector<32x512xf32>
    %cst_53 = arith.constant 0.000000e+00 : f32
    %195 = vector.broadcast %cst_53 : f32 to vector<32x512xf32>
    %196 = arith.cmpf oge, %194, %195 : vector<32x512xf32>
    %cst_54 = arith.constant 1.000000e+00 : f32
    %cst_55 = arith.constant -1.000000e+00 : f32
    %197 = vector.broadcast %cst_54 : f32 to vector<32x512xf32>
    %198 = vector.broadcast %cst_55 : f32 to vector<32x512xf32>
    %199 = arith.select %196, %197, %198 : vector<32x512xi1>, vector<32x512xf32>
    %200 = math.absf %194 : vector<32x512xf32>
    %cst_56 = arith.constant 0.327591091 : f32
    %201 = vector.broadcast %cst_56 : f32 to vector<32x512xf32>
    %202 = arith.mulf %201, %200 : vector<32x512xf32>
    %cst_57 = arith.constant 1.000000e+00 : f32
    %203 = vector.broadcast %cst_57 : f32 to vector<32x512xf32>
    %204 = arith.addf %203, %202 : vector<32x512xf32>
    %cst_58 = arith.constant 1.000000e+00 : f32
    %205 = vector.broadcast %cst_58 : f32 to vector<32x512xf32>
    %206 = arith.divf %205, %204 : vector<32x512xf32>
    %cst_59 = arith.constant 1.06140542 : f32
    %207 = vector.broadcast %cst_59 : f32 to vector<32x512xf32>
    %208 = arith.mulf %207, %206 : vector<32x512xf32>
    %cst_60 = arith.constant -1.45315206 : f32
    %209 = vector.broadcast %cst_60 : f32 to vector<32x512xf32>
    %210 = arith.addf %208, %209 : vector<32x512xf32>
    %211 = arith.mulf %210, %206 : vector<32x512xf32>
    %cst_61 = arith.constant 1.42141378 : f32
    %212 = vector.broadcast %cst_61 : f32 to vector<32x512xf32>
    %213 = arith.addf %211, %212 : vector<32x512xf32>
    %214 = arith.mulf %213, %206 : vector<32x512xf32>
    %cst_62 = arith.constant -0.284496725 : f32
    %215 = vector.broadcast %cst_62 : f32 to vector<32x512xf32>
    %216 = arith.addf %214, %215 : vector<32x512xf32>
    %217 = arith.mulf %216, %206 : vector<32x512xf32>
    %cst_63 = arith.constant 0.254829586 : f32
    %218 = vector.broadcast %cst_63 : f32 to vector<32x512xf32>
    %219 = arith.addf %217, %218 : vector<32x512xf32>
    %220 = arith.mulf %219, %206 : vector<32x512xf32>
    %cst_64 = arith.constant 0.000000e+00 : f32
    %221 = vector.broadcast %cst_64 : f32 to vector<32x512xf32>
    %222 = arith.subf %221, %200 : vector<32x512xf32>
    %223 = arith.mulf %222, %200 : vector<32x512xf32>
    %224 = math.exp %223 : vector<32x512xf32>
    %225 = arith.mulf %220, %224 : vector<32x512xf32>
    %cst_65 = arith.constant 1.000000e+00 : f32
    %226 = vector.broadcast %cst_65 : f32 to vector<32x512xf32>
    %227 = arith.subf %226, %225 : vector<32x512xf32>
    %228 = arith.mulf %199, %227 : vector<32x512xf32>
    %cst_66 = arith.constant 1.000000e+00 : f32
    %229 = vector.broadcast %cst_66 : f32 to vector<32x512xf32>
    %230 = arith.addf %229, %228 : vector<32x512xf32>
    %231 = arith.mulf %192, %230 : vector<32x512xf32>
    %232 = vector.extract_strided_slice %189 {offsets = [0, 512], sizes = [32, 512], strides = [1, 1]} : vector<32x1024xf32> to vector<32x512xf32>
    %233 = arith.mulf %231, %232 : vector<32x512xf32>
    %234 = arith.truncf %233 : vector<32x512xf32> to vector<32x512xbf16>
    %c0_67 = arith.constant 0 : index
    %c0_68 = arith.constant 0 : index
    %c0_69 = arith.constant 0 : index
    %235 = vector.load %arg8[%c0_67, %c0_68, %c0_69] : memref<1x512x256xbf16, #tpu.memory_space<vmem>>, vector<1x512x256xbf16>
    %236 = vector.shape_cast %235 : vector<1x512x256xbf16> to vector<512x256xbf16>
    %cst_70 = arith.constant dense<0.000000e+00> : vector<32x256xf32>
    %237 = tpu.matmul %234, %236, %cst_70 {dimension_numbers = #tpu.dot_dimension_numbers<[1], [0], [0], [1], [0, 0, 1, 1], [], []>} : vector<32x512xbf16>, vector<512x256xbf16>, vector<32x256xf32> -> vector<32x256xf32>
    %238 = arith.addf %159, %237 : vector<32x256xf32>
    %c0_71 = arith.constant 0 : index
    %c0_72 = arith.constant 0 : index
    %239 = vector.load %arg11[%c0_71, %c0_72] : memref<32x256xf32, #tpu.memory_space<vmem>>, vector<32x256xf32>
    tpu.vector_store %arg11[%c0_71, %c0_72], %238 {strides = array<i32>} : memref<32x256xf32, #tpu.memory_space<vmem>>, vector<32x256xf32>,
    %c1_i32 = arith.constant 1 : i32
    %240 = arith.cmpi eq, %arg1, %c1_i32 : i32
    %241 = arith.extui %240 : i1 to i32
    %c0_i32_73 = arith.constant 0 : i32
    %242 = arith.cmpi ne, %241, %c0_i32_73 : i32
    scf.if %242 {
      %c0_74 = arith.constant 0 : index
      %c0_75 = arith.constant 0 : index
      %243 = vector.load %arg9[%c0_74, %c0_75] : memref<2x256xf32, #tpu.memory_space<vmem>>, vector<2x256xf32>
      %c0_76 = arith.constant 0 : index
      %c0_77 = arith.constant 0 : index
      %244 = vector.load %arg11[%c0_76, %c0_77] : memref<32x256xf32, #tpu.memory_space<vmem>>, vector<32x256xf32>
      %245 = vector.extract_strided_slice %243 {offsets = [0, 0], sizes = [1, 256], strides = [1, 1]} : vector<2x256xf32> to vector<1x256xf32>
      %246 = vector.shape_cast %245 : vector<1x256xf32> to vector<256xf32>
      %247 = vector.extract_strided_slice %243 {offsets = [1, 0], sizes = [1, 256], strides = [1, 1]} : vector<2x256xf32> to vector<1x256xf32>
      %248 = vector.shape_cast %247 : vector<1x256xf32> to vector<256xf32>
      %cst_78 = arith.constant dense<0.000000e+00> : vector<32xf32>
      %249 = vector.multi_reduction <add>, %244, %cst_78 [1] : vector<32x256xf32> to vector<32xf32>
      %250 = vector.shape_cast %249 : vector<32xf32> to vector<32x1xf32>
      %cst_79 = arith.constant 2.560000e+02 : f32
      %251 = vector.broadcast %cst_79 : f32 to vector<32x1xf32>
      %252 = arith.divf %250, %251 : vector<32x1xf32>
      %253 = vector.broadcast %252 : vector<32x1xf32> to vector<32x256xf32>
      %254 = arith.subf %244, %253 : vector<32x256xf32>
      %255 = vector.broadcast %252 : vector<32x1xf32> to vector<32x256xf32>
      %256 = arith.subf %244, %255 : vector<32x256xf32>
      %257 = arith.mulf %254, %256 : vector<32x256xf32>
      %cst_80 = arith.constant dense<0.000000e+00> : vector<32xf32>
      %258 = vector.multi_reduction <add>, %257, %cst_80 [1] : vector<32x256xf32> to vector<32xf32>
      %259 = vector.shape_cast %258 : vector<32xf32> to vector<32x1xf32>
      %cst_81 = arith.constant 2.560000e+02 : f32
      %260 = vector.broadcast %cst_81 : f32 to vector<32x1xf32>
      %261 = arith.divf %259, %260 : vector<32x1xf32>
      %262 = vector.broadcast %252 : vector<32x1xf32> to vector<32x256xf32>
      %263 = arith.subf %244, %262 : vector<32x256xf32>
      %cst_82 = arith.constant 9.99999974E-6 : f32
      %264 = vector.broadcast %cst_82 : f32 to vector<32x1xf32>
      %265 = arith.addf %261, %264 : vector<32x1xf32>
      %266 = math.rsqrt %265 : vector<32x1xf32>
      %267 = vector.broadcast %266 : vector<32x1xf32> to vector<32x256xf32>
      %268 = arith.mulf %263, %267 : vector<32x256xf32>
      %269 = vector.shape_cast %246 : vector<256xf32> to vector<1x256xf32>
      %270 = vector.broadcast %269 : vector<1x256xf32> to vector<32x256xf32>
      %271 = arith.mulf %268, %270 : vector<32x256xf32>
      %272 = vector.shape_cast %248 : vector<256xf32> to vector<1x256xf32>
      %273 = vector.broadcast %272 : vector<1x256xf32> to vector<32x256xf32>
      %274 = arith.addf %271, %273 : vector<32x256xf32>
      %c0_83 = arith.constant 0 : index
      %c0_84 = arith.constant 0 : index
      %275 = vector.load %arg10[%c0_83, %c0_84] : memref<32x256xf32, #tpu.memory_space<vmem>>, vector<32x256xf32>
      tpu.vector_store %arg10[%c0_83, %c0_84], %274 {strides = array<i32>} : memref<32x256xf32, #tpu.memory_space<vmem>>, vector<32x256xf32>,
    } else {
    }
    return
  }
  func.func @transform_0(%arg0: i32, %arg1: i32) -> (i32, i32) {
    %c0_i32 = arith.constant 0 : i32
    %c0_i32_0 = arith.constant 0 : i32
    return %arg0, %c0_i32 : i32, i32
  }
  func.func @transform_1(%arg0: i32, %arg1: i32) -> (i32, i32, i32) {
    %c0_i32 = arith.constant 0 : i32
    %c0_i32_0 = arith.constant 0 : i32
    %c0_i32_1 = arith.constant 0 : i32
    %c0_i32_2 = arith.constant 0 : i32
    return %c0_i32, %c0_i32_0, %c0_i32_1 : i32, i32, i32
  }
  func.func @transform_2(%arg0: i32, %arg1: i32) -> (i32, i32, i32) {
    %c0_i32 = arith.constant 0 : i32
    %c0_i32_0 = arith.constant 0 : i32
    %c0_i32_1 = arith.constant 0 : i32
    return %arg1, %c0_i32, %c0_i32_0 : i32, i32, i32
  }
  func.func @transform_3(%arg0: i32, %arg1: i32) -> (i32, i32, i32) {
    %c0_i32 = arith.constant 0 : i32
    %c0_i32_0 = arith.constant 0 : i32
    %c0_i32_1 = arith.constant 0 : i32
    return %arg1, %c0_i32, %c0_i32_0 : i32, i32, i32
  }
  func.func @transform_4(%arg0: i32, %arg1: i32) -> (i32, i32, i32) {
    %c0_i32 = arith.constant 0 : i32
    %c0_i32_0 = arith.constant 0 : i32
    %c0_i32_1 = arith.constant 0 : i32
    return %arg1, %c0_i32, %c0_i32_0 : i32, i32, i32
  }
  func.func @transform_5(%arg0: i32, %arg1: i32) -> (i32, i32, i32) {
    %c0_i32 = arith.constant 0 : i32
    %c0_i32_0 = arith.constant 0 : i32
    %c0_i32_1 = arith.constant 0 : i32
    return %arg1, %c0_i32, %c0_i32_0 : i32, i32, i32
  }
  func.func @transform_6(%arg0: i32, %arg1: i32) -> (i32, i32, i32) {
    %c0_i32 = arith.constant 0 : i32
    %c0_i32_0 = arith.constant 0 : i32
    %c0_i32_1 = arith.constant 0 : i32
    return %arg1, %c0_i32, %c0_i32_0 : i32, i32, i32
  }
  func.func @transform_7(%arg0: i32, %arg1: i32) -> (i32, i32) {
    %c0_i32 = arith.constant 0 : i32
    %c0_i32_0 = arith.constant 0 : i32
    %c0_i32_1 = arith.constant 0 : i32
    return %c0_i32, %c0_i32_0 : i32, i32
  }
  func.func @transform_8(%arg0: i32, %arg1: i32) -> (i32, i32) {
    %c0_i32 = arith.constant 0 : i32
    %c0_i32_0 = arith.constant 0 : i32
    return %arg0, %c0_i32 : i32, i32
  }
}

</mosaic_0001>

<bundles_post_ra>
// kernel: tpu_custom_call.1
= control target key start
LH: loop header
LB: loop body
LE: loop exit
PB: predicated region body
PF: predicated region fallthrough
CT: control target
= control target key end

     0   :  { %s9809_s0 = inlined_call_operand.hbm [shape: f32[32,256], index: 0, kind: input, shape index: {}]   ;;  %s9810_s1 = inlined_call_operand.hbm [shape: f32[2,16,128], index: 1, kind: input, shape index: {}]   ;;  %s9811_s2 = inlined_call_operand.hbm [shape: f32[2,4,256], index: 2, kind: input, shape index: {}]   ;;  %s9812_s3 = inlined_call_operand.hbm [shape: bf16[2,256,768], index: 3, kind: input, shape index: {}]   ;;  %s9813_s4 = inlined_call_operand.hbm [shape: bf16[2,256,256], index: 4, kind: input, shape index: {}]   ;;  %s9814_s5 = inlined_call_operand.hbm [shape: bf16[2,256,1024], index: 5, kind: input, shape index: {}]   ;;  %s9815_s6 = inlined_call_operand.hbm [shape: bf16[2,512,256], index: 6, kind: input, shape index: {}]   ;;  %s9816_s7 = inlined_call_operand.vmem [shape: f32[2,256], index: 7, kind: input, shape index: {}]   ;;  %s9817_s8 = inlined_call_operand.hbm [shape: f32[32,256], index: 8, kind: output, shape index: {}]  }
   0x1   :  { %9847 = sst [smem:[#allocation46_spill]] %s9809_s0 }
   0x2   :  { %9848 = sst [smem:[#allocation47_spill]] %s9810_s1 }
   0x3   :  { %9849 = sst [smem:[#allocation48_spill]] %s9811_s2 }
   0x4   :  { %9850 = sst [smem:[#allocation49_spill]] %s9812_s3 }
   0x5   :  { %9851 = sst [smem:[#allocation50_spill]] %s9813_s4 }
   0x6   :  { %9852 = sst [smem:[#allocation51_spill]] %s9817_s8 }
   0x7   :  { %13 = vsyncpa [#allocation4], 0 }
   0x8   :  { %14 = vsyncpa [#allocation7], 0 }
   0x9   :  { %15 = vsyncpa [#allocation5], 0  ;;  %s7425_s27 = smov 0   ;;  %s7427_s28 = smov 0  }
   0xa   :  { %s7429_s29 = smov 0   ;;  %s7431_s30 = smov 0  }
   0xb   :  { %s7433_s9 = smov 0   ;;  %s7435_s10 = smov 0  }
   0xc LB: > { %9853 = sst [smem:[#allocation18_spill]] %s7350_s29  ;;  %s7454_s11 = sadd.s32 4294967295, %s7362_s10   ;;  %s7362_s10 = sphi %s7435_s10, %s21_s10   ;;  %s7358_s9 = sphi %s7433_s9, %s9947_s9   ;;  %s7354_s30 = sphi %s7431_s30, %s9946_s30   ;;  %s7350_s29 = sphi %s7429_s29, %s9942_s29   ;;  %s7346_s28 = sphi %s7427_s28, %s9945_s28   ;;  %s7342_s27 = sphi %s7425_s27, %s9944_s27  }
   0xd   : > { %p100_p0 = scmp.ne.s32.totalorder %s7346_s28, %s7342_s27  ;;  %p101_p1 = scmp.eq.s32.totalorder %s7454_s11, 0 }
   0xe   : > { %p5170_p2 = scmp.ge.s32.totalorder %s7362_s10, 1  ;;  %p262_p3 = scmp.lt.s32.totalorder %s7362_s10, 3 }
   0xf   : > { %p7462_p4 = por %p101_p1, %p100_p0  ;;  %s9855_s0 = sld [smem:[#allocation46_spill]] }
  0x10   : > { %p7469_p5 = pnand %p5170_p2, %p262_p3  ;;  %s7364_s17 = smov [#allocation3]  }
  0x11   : > { %s279_s18 = sshll.u32 %s7364_s17, 4  ;;  %s7365_s20 = smov 256   ;;  %s280_s18 = int_to_ptr.vmem [resolvable:$true] %s279_s18 }
  0x12   : > { %p6837_p6 = pneg %p7469_p5  ;;  %s7366_s21 = smov 16  }
  0x13   : > { %s30_s22 = sadd.s32 1, %s7358_s9  ;;  %s87_s23 = sadd.s32 1, %s7350_s29 }
  0x14   : > { %p7477_p7 = pnand %p6837_p6, %p101_p1  ;;  %p31_p8 = scmp.ge.s32.totalorder %s30_s22, 2 }
  0x15   : > { %s277_s15 = sshll.u32 %s9855_s0, 4  ;;  %p94_p9 = scmp.ne.s32.totalorder %s7350_s29, %s7346_s28  ;;  %s278_s15 = int_to_ptr.hbm [resolvable:$true] %s277_s15 }
  0x16   : > { %6840 = dma.hbm_to_vmem [thread:$0]  (!%p7477_p7), %s278_s15, 1024, %s280_s18, [#allocation4], %s7365_s20, %s7365_s20, %s7366_s21  }
  0x17   : > { %p95_p10 = scmp.eq.s32.totalorder %s7362_s10, 0  ;;  %s9949_s22 = smov (%p31_p8, %s30_s22), 0 }
  0x18   : > { %9858 = sst [smem:[#allocation19_spill]] %s9949_s22  ;;  %p6862_p12 = scmp.lt.s32.totalorder %s7362_s10, 2 }
  0x19   : > { %p7490_p11 = por %p95_p10, %p94_p9  ;;  %s84_s25 = ssub.s32 %s7358_s9, %s9949_s22 }
  0x1a   : > { %s310_s26 = sand.u32 1, %s7362_s10   ;;  %p85_p13 = scmp.eq.s32.totalorder %s84_s25, 0 }
  0x1b   : > { %s7499_s27 = sand.u32 1, %s7350_s29   ;;  %s6488_s13 = sshll.u32 %s7358_s9, 3 }
  0x1c   : > { %s7503_s14 = scalar_select %p85_p13, %s7350_s29, %s87_s23  }
  0x1d   : > { %s5174_s15 = sshll.u32 %s7499_s27, 3  ;;  %s9861_s2 = sld [smem:[#allocation48_spill]] }
  0x1e   : > { %9860 = sst [smem:[#allocation20_spill]] %s7503_s14  ;;  %s314_s0 = scalar_lea.vmem [#allocation8], %s5174_s15 }
  0x1f   : > { %s323_s8 = sshll.u32 %s314_s0, 4  ;;  %p7513_p0 = pnand %p6862_p12, %p7490_p11  ;;  %s324_s8 = int_to_ptr.vmem [resolvable:$true] %s323_s8 }
  0x20   : > { %s6812_s23 = smul.u32 768, %s7499_s27  ;;  %s7519_s14 = scalar_lea.sflag [#allocation4], %s310_s26 }
  0x21   : > { %s6813_s22 = smul.u32 768, %s7358_s9  ;;  %s9863_s3 = sld [smem:[#allocation49_spill]] }
  0x22   : > { %s334_s17 = scalar_lea.vmem [#allocation9], %s6812_s23  ;;  %s7368_s26 = smov 24  }
  0x23   : > { %s319_s20 = scalar_lea.hbm %s9861_s2, %s6488_s13  ;;  %s342_s18 = sshll.u32 %s334_s17, 4  ;;  %s343_s18 = int_to_ptr.vmem [resolvable:$true] %s342_s18 }
  0x24   : > { %s321_s21 = sshll.u32 %s319_s20, 4  ;;  %s7367_s20 = smov 384   ;;  %s322_s21 = int_to_ptr.hbm [resolvable:$true] %s321_s21 }
  0x25   : > { %6847 = dma.hbm_to_vmem [thread:$0]  (!%p7513_p0), %s322_s21, 128, %s324_s8, %s7519_s14  }
  0x26   : > { %s5178_s2 = sshll.u32 %s7499_s27, 8  ;;  %s6489_s29 = sshll.u32 %s7358_s9, 8 }
  0x27   : > { %s339_s24 = scalar_lea.hbm %s9863_s3, %s6813_s22  ;;  %s9864_s4 = sld [smem:[#allocation50_spill]] }
  0x28   : > { %s340_s15 = sshll.u32 %s339_s24, 4  ;;  %s356_s22 = scalar_lea.vmem [#allocation10], %s5178_s2  ;;  %s341_s15 = int_to_ptr.hbm [resolvable:$true] %s340_s15 }
  0x29   : > { %6850 = dma.hbm_to_vmem [thread:$0]  (!%p7513_p0), %s341_s15, 12288, %s343_s18, %s7519_s14, %s7367_s20, %s7367_s20, %s7368_s26  }
  0x2a   : > { %s364_s13 = sshll.u32 %s356_s22, 4  ;;  %s5181_s23 = sshll.u32 %s7499_s27, 10  ;;  %s365_s13 = int_to_ptr.vmem [resolvable:$true] %s364_s13 }
  0x2b   : > { %s7369_s17 = smov 128   ;;  %s7370_s3 = smov 8  }
  0x2c   : > { %s6490_s15 = sshll.u32 %s7358_s9, 10  ;;  %s9865_s1 = sld [smem:[#allocation47_spill]] }
  0x2d   : > { %s361_s0 = scalar_lea.hbm %s9864_s4, %s6489_s29  ;;  %s383_s2 = scalar_lea.hbm %s9814_s5, %s6490_s15 }
  0x2e   : > { %s362_s24 = sshll.u32 %s361_s0, 4  ;;  %s378_s29 = scalar_lea.vmem [#allocation11], %s5181_s23  ;;  %s363_s24 = int_to_ptr.hbm [resolvable:$true] %s362_s24 }
  0x2f   : > { %6853 = dma.hbm_to_vmem [thread:$0]  (!%p7513_p0), %s363_s24, 4096, %s365_s13, %s7519_s14, %s7369_s17, %s7369_s17, %s7370_s3  }
  0x30   : > { %s386_s26 = sshll.u32 %s378_s29, 4  ;;  %s384_s8 = sshll.u32 %s383_s2, 4  ;;  %s387_s26 = int_to_ptr.vmem [resolvable:$true] %s386_s26  ;;  %s385_s8 = int_to_ptr.hbm [resolvable:$true] %s384_s8 }
  0x31   : > { %s7371_s4 = smov 512   ;;  %s7372_s13 = smov 32  }
  0x32   : > { %s291_s22 = sshll.u32 %s9865_s1, 4  ;;  %s7373_s24 = smov [#allocation6]   ;;  %s292_s22 = int_to_ptr.hbm [resolvable:$true] %s291_s22 }
  0x33   : > { %6856 = dma.hbm_to_vmem [thread:$0]  (!%p7513_p0), %s385_s8, 16384, %s387_s26, %s7519_s14, %s7371_s4, %s7371_s4, %s7372_s13  }
  0x34   : > { %s293_s18 = sshll.u32 %s7373_s24, 4  ;;  %s5184_s15 = sshll.u32 %s7499_s27, 9  ;;  %s294_s18 = int_to_ptr.vmem [resolvable:$true] %s293_s18 }
  0x35   : > { %6843 = dma.hbm_to_vmem [thread:$0]  (!%p7477_p7), %s292_s22, 512, %s294_s18, [#allocation7], %s7369_s17, %s7369_s17, %s7370_s3  }
  0x36   : > { %s6491_s23 = sshll.u32 %s7358_s9, 9  ;;  %s400_s20 = scalar_lea.vmem [#allocation12], %s5184_s15 }
  0x37   : > { %s408_s2 = sshll.u32 %s400_s20, 4  ;;  %s405_s0 = scalar_lea.hbm %s9815_s6, %s6491_s23  ;;  %s409_s2 = int_to_ptr.vmem [resolvable:$true] %s408_s2 }
  0x38   : > { %s406_s1 = sshll.u32 %s405_s0, 4  ;;  %420 = sbr.rel (%p7469_p5) target bundleno = 2431 (0x97f), region = 52  ;;  %s407_s1 = int_to_ptr.hbm [resolvable:$true] %s406_s1 }
  0x39   : > { %6859 = dma.hbm_to_vmem [thread:$0]  (!%p7513_p0), %s407_s1, 8192, %s409_s2, %s7519_s14, %s7369_s17, %s7369_s17, %s7370_s3  }
  0x3d   : > { %7325 = dma.done.wait (%p101_p1), [#allocation4], 1024  }
  0x3e   : > { %7327 = vsyncadd (%p101_p1), [#allocation4], 4294966272 }
  0x3f   : > { %7329 = dma.done.wait (%p101_p1), [#allocation7], 512  }
  0x40   : > { %7331 = vsyncadd (%p101_p1), [#allocation7], 4294966784  ;;  %s432_s4 = sand.u32 1, %s7454_s11   ;;  %s434_s1 = sand.u32 1, %s7346_s28  }
  0x41   : > { %s5190_s3 = sshll.u32 %s434_s1, 3  ;;  %s433_s16 = scalar_lea.sflag [#allocation4], %s432_s4 }
  0x42   : > { %s7580_s19 = scalar_lea.vmem [#allocation8], %s5190_s3 }
  0x43   : > { %7333 = dma.done.wait (%p7462_p4), %s433_s16, 41088  }
  0x44   : > { %7335 = vsyncadd (%p7462_p4), %s433_s16, 4294926208  ;;  %s6814_s27 = smul.u32 768, %s434_s1  ;;  %s5191_s14 = sshll.u32 %s434_s1, 8 }
  0x45   : > { %s5192_s25 = sshll.u32 %s434_s1, 10  ;;  %s5193_s17 = sshll.u32 %s434_s1, 9 }
  0x46   : > { %s7586_s26 = scalar_lea.vmem [#allocation9], %s6814_s27  ;;  %s7588_s8 = scalar_lea.vmem [#allocation10], %s5191_s14 }
  0x47   : > { %s7590_s22 = scalar_lea.vmem [#allocation11], %s5192_s25  ;;  %s7592_s13 = scalar_lea.vmem [#allocation12], %s5193_s17 }
  0x48   : > { %p5194_p1 = scmp.ne.s32.totalorder %s7354_s30, 0 }
  0x4a   : > { %530 = sbr.rel (%p5194_p1) target bundleno = 88 (0x58), region = 84 }
  0x4f   : > { %v531_v0 = vld [vmem:[#allocation3] sm:$0xff]  ;;  %v532_v1 = vld [vmem:[#allocation3 + $0x8] sm:$0xff]  ;;  %v533_v2 = vld [vmem:[#allocation3 + $0x10] sm:$0xff] }
  0x50   : > { %539 = vst [vmem:[#allocation2 + $0x30] sm:$0xff] %v531_v0  ;;  %v534_v3 = vld [vmem:[#allocation3 + $0x18] sm:$0xff]  ;;  %v535_v4 = vld [vmem:[#allocation3 + $0x20] sm:$0xff]  ;;  %v536_v5 = vld [vmem:[#allocation3 + $0x28] sm:$0xff] }
  0x51   : > { %540 = vst [vmem:[#allocation2] sm:$0xff] %v532_v1  ;;  %v537_v6 = vld [vmem:[#allocation3 + $0x30] sm:$0xff]  ;;  %v538_v7 = vld [vmem:[#allocation3 + $0x38] sm:$0xff] }
  0x52   : > { %541 = vst [vmem:[#allocation2 + $0x18] sm:$0xff] %v533_v2 }
  0x53   : > { %542 = vst [vmem:[#allocation2 + $0x10] sm:$0xff] %v534_v3 }
  0x54   : > { %543 = vst [vmem:[#allocation2 + $0x8] sm:$0xff] %v535_v4 }
  0x55   : > { %544 = vst [vmem:[#allocation2 + $0x20] sm:$0xff] %v536_v5 }
  0x56   : > { %545 = vst [vmem:[#allocation2 + $0x28] sm:$0xff] %v537_v6 }
  0x57   : > { %546 = vst [vmem:[#allocation2 + $0x38] sm:$0xff] %v538_v7 }
  0x58 PF: > { %v547_v10 = vld [vmem:[#allocation2 + $0x30] sm:$0xff]  ;;  %v548_v12 = vld [vmem:[#allocation2] sm:$0xff]  ;;  %v7374_v20 = vmov 256.0   ;;  %v6537_v56 = vld [vmem:[%s7586_s26 + $0x164] sm:$0xf0]  ;;  %s7375_s12 = smov 64  }
  0x59   : > { %v556_v13 = vadd.f32 %v548_v12, %v547_v10  ;;  %v549_v16 = vld [vmem:[#allocation2 + $0x18] sm:$0xff]  ;;  %6931 = vrcp.f32 %v7374_v20  ;;  %v5365_v55 = vld [vmem:[%s7586_s26 + $0x150] sm:$0xf]  ;;  %v6534_v60 = vld [vmem:[%s7586_s26 + $0x154] sm:$0xf]  ;;  %vm1548_vm13 = vcmask 523264  }
  0x5a   : > { %v550_v17 = vld [vmem:[#allocation2 + $0x10] sm:$0xff]  ;;  %v5557_v57 = vld [vmem:[%s7586_s26 + $0x2d0] sm:$0xf]  ;;  %v5366_v58 = vor.u32 %v6537_v56, %v5365_v55  ;;  %v6585_v59 = vld [vmem:[%s7586_s26 + $0x2e4] sm:$0xf0]  ;;  %vm1675_vm15 = vcmask 130048  }
  0x5b   : > { %v551_v8 = vld [vmem:[#allocation2 + $0x8] sm:$0xff]  ;;  %557 = vadd.xlane.f32.xlu0 %v556_v13  ;;  %v559_v19 = vadd.f32 %v550_v17, %v549_v16  ;;  %v5367_v61 = vld [vmem:[%s7586_s26 + $0x168] sm:$0xf0]  ;;  %v5558_v62 = vor.u32 %v6585_v59, %v5557_v57  ;;  %v6582_v0 = vld [vmem:[%s7586_s26 + $0x2d4] sm:$0xf]  ;;  %p6483_p2 = scmp.ne.s32.totalorder %s7354_s30, 1 }
  0x5c   : > { %v552_v9 = vld [vmem:[#allocation2 + $0x20] sm:$0xff]  ;;  %v5370_v63 = vor.u32 %v6534_v60, %v5367_v61  ;;  %v5559_v1 = vld [vmem:[%s7586_s26 + $0x2e8] sm:$0xf0]  ;;  %1272 = vmatpush.bf16.msra.mxu0 %v5366_v58  ;;  %v5341_v3 = vld [vmem:[%s7586_s26 + $0x120] sm:$0xf] }
  0x5d   : > { %v562_v11 = vadd.f32 %v552_v9, %v551_v8  ;;  %v553_v14 = vld [vmem:[#allocation2 + $0x28] sm:$0xff]  ;;  %v5562_v2 = vor.u32 %v6582_v0, %v5559_v1  ;;  %1291 = vmatpush.bf16.msra.mxu1 %v5558_v62  ;;  %v5533_v5 = vld [vmem:[%s7586_s26 + $0x2a0] sm:$0xf]  ;;  %v6522_v20 = vld [vmem:[%s7586_s26 + $0xf4] sm:$0xf] }
  0x5e   : > { %v554_v15 = vld [vmem:[#allocation2 + $0x38] sm:$0xff]  ;;  %1310 = vmatpush.bf16.msra.mxu2 %v5370_v63  ;;  %v6531_v4 = vld [vmem:[%s7586_s26 + $0x134] sm:$0xf0]  ;;  %v5535_v13 = vld [vmem:[%s7586_s26 + $0x2b8] sm:$0xf0] }
  0x5f   : > { %563 = vadd.xlane.f32.xlu1 %v562_v11  ;;  %v565_v18 = vadd.f32 %v554_v15, %v553_v14  ;;  %v6932_v21 = vpop.eup %6931  ;;  %1329 = vmatpush.bf16.msra.mxu3 %v5562_v2  ;;  %v5342_v6 = vor.u32 %v6531_v4, %v5341_v3  ;;  %v6579_v7 = vld [vmem:[%s7586_s26 + $0x2b4] sm:$0xf0]  ;;  %v6558_v57 = vld [vmem:[%s7586_s26 + $0x214] sm:$0xf]  ;;  %v5463_v58 = vld [vmem:[%s7586_s26 + $0x228] sm:$0xf0] }
  0x60   : > { %v569_v22 = vmul.f32 256.0, %v6932_v21  ;;  %vm573_vm0 = vweird.f32 %v6932_v21  ;;  %v5466_v59 = vor.u32 %v6558_v57, %v5463_v58  ;;  %v5245_v60 = vld [vmem:[%s7586_s26 + $0x60] sm:$0xf]  ;;  %v6507_v61 = vld [vmem:[%s7586_s26 + $0x74] sm:$0xf0] }
  0x61   : > { %1273 = vmatpush.bf16.msra.mxu0 %v5342_v6  ;;  %v5437_v62 = vld [vmem:[%s7586_s26 + $0x1e0] sm:$0xf]  ;;  %v5246_v63 = vor.u32 %v6507_v61, %v5245_v60  ;;  %v6555_v0 = vld [vmem:[%s7586_s26 + $0x1f4] sm:$0xf0]  ;;  %v6504_v1 = vld [vmem:[%s7586_s26 + $0x64] sm:$0xf] }
  0x62   : > { %v570_v23 = vsub.f32 1.0, %v569_v22  ;;  %v5247_v2 = vld [vmem:[%s7586_s26 + $0x78] sm:$0xf0]  ;;  %v5438_v3 = vor.u32 %v6555_v0, %v5437_v62  ;;  %v5567_v60 = vld [vmem:[%s7586_s26 + $0x2f0] sm:$0xf0] }
  0x63   : > { %560 = vadd.xlane.f32.xlu0 %v559_v19  ;;  %v6573_v19 = vld [vmem:[%s7586_s26 + $0x284] sm:$0xf0]  ;;  %v5250_v4 = vor.u32 %v6504_v1, %v5247_v2  ;;  %v5439_v6 = vld [vmem:[%s7586_s26 + $0x1f8] sm:$0xf0]  ;;  %v6532_v0 = vld [vmem:[%s7586_s26 + $0x13c] sm:$0xf0] }
  0x64   : > { %v571_v24 = vmul.f32 %v6932_v21, %v570_v23  ;;  %v5349_v61 = vld [vmem:[%s7586_s26 + $0x128] sm:$0xf]  ;;  %v6580_v2 = vld [vmem:[%s7586_s26 + $0x2bc] sm:$0xf0] }
  0x65   : > { %v5541_v1 = vld [vmem:[%s7586_s26 + $0x2a8] sm:$0xf] }
  0x66   : > { %v572_v25 = vadd.f32 %v6932_v21, %v571_v24  ;;  %v6570_v24 = vld [vmem:[%s7586_s26 + $0x274] sm:$0xf] }
  0x67   : > { %566 = vadd.xlane.f32.xlu1 %v565_v18 }
  0x68   : > { %v7595_v26 = vsel %vm573_vm0, %v6932_v21, %v572_v25  ;;  %v5319_v21 = vld [vmem:[%s7586_s26 + $0x108] sm:$0xf0] }
  0x69   : > { %9866 = vst [vmem:[#allocation21_spill] sm:$0xff] %v7595_v26  ;;  %v5322_v23 = vor.u32 %v6522_v20, %v5319_v21  ;;  %v5511_v25 = vld [vmem:[%s7586_s26 + $0x288] sm:$0xf0] }
  0xce   : > { %v558_v29 = vpop.xlane.xlu0 %557 }
  0xcf   : > { %v575_v30 = vmul.f32 %v7595_v26, %v558_v29  ;;  %v6519_v29 = vld [vmem:[%s7586_s26 + $0xd4] sm:$0xf0] }
  0xd1   : > { %v7603_v33 = vsub.f32 %v547_v10, %v575_v30  ;;  %v7605_v34 = vsub.f32 %v548_v12, %v575_v30  ;;  %v5534_v10 = vor.u32 %v6579_v7, %v5533_v5  ;;  %v6576_v12 = vld [vmem:[%s7586_s26 + $0x2a4] sm:$0xf]  ;;  %v5485_v30 = vld [vmem:[%s7586_s26 + $0x240] sm:$0xf] }
  0xd2   : > { %v564_v27 = vpop.xlane.xlu1 %563  ;;  %v6552_v5 = vld [vmem:[%s7586_s26 + $0x1e4] sm:$0xf] }
  0xd3   : > { %v577_v28 = vmul.f32 %v7595_v26, %v564_v27  ;;  %v587_v37 = vmul.f32 %v7603_v33, %v7603_v33  ;;  %v588_v38 = vmul.f32 %v7605_v34, %v7605_v34  ;;  %1292 = vmatpush.bf16.msra.mxu1 %v5534_v10  ;;  %v5514_v27 = vor.u32 %v6570_v24, %v5511_v25  ;;  %v5413_v10 = vld [vmem:[%s7586_s26 + $0x1b0] sm:$0xf]  ;;  %v5197_v24 = vld [vmem:[%s7586_s26] sm:$0xf]  ;;  %v6495_v25 = vld [vmem:[%s7586_s26 + $0x14] sm:$0xf0] }
  0xd4   : > { %v5442_v7 = vor.u32 %v6552_v5, %v5439_v6  ;;  %v5350_v5 = vor.u32 %v6532_v0, %v5349_v61  ;;  %v5542_v6 = vor.u32 %v6580_v2, %v5541_v1 }
  0xd5   : > { %v7599_v31 = vsub.f32 %v551_v8, %v577_v28  ;;  %v7601_v32 = vsub.f32 %v552_v9, %v577_v28  ;;  %v595_v41 = vadd.f32 %v588_v38, %v587_v37  ;;  %v6528_v8 = vld [vmem:[%s7586_s26 + $0x124] sm:$0xf]  ;;  %v5343_v9 = vld [vmem:[%s7586_s26 + $0x138] sm:$0xf0]  ;;  %v5293_v28 = vld [vmem:[%s7586_s26 + $0xc0] sm:$0xf] }
  0xd6   : > { %v561_v43 = vpop.xlane.xlu0 %560  ;;  %v5346_v11 = vor.u32 %v6528_v8, %v5343_v9  ;;  %v6516_v37 = vld [vmem:[%s7586_s26 + $0xc4] sm:$0xf]  ;;  %v5295_v38 = vld [vmem:[%s7586_s26 + $0xd8] sm:$0xf0]  ;;  %v5221_v8 = vld [vmem:[%s7586_s26 + $0x30] sm:$0xf] }
  0xd7   : > { %v591_v35 = vmul.f32 %v7599_v31, %v7599_v31  ;;  %v592_v36 = vmul.f32 %v7601_v32, %v7601_v32  ;;  %v576_v44 = vmul.f32 %v7595_v26, %v561_v43  ;;  %596 = vadd.xlane.f32.xlu2 %v595_v41  ;;  %v6564_v41 = vld [vmem:[%s7586_s26 + $0x244] sm:$0xf]  ;;  %v6501_v9 = vld [vmem:[%s7586_s26 + $0x44] sm:$0xf0] }
  0xd8   : > { %1311 = vmatpush.bf16.msra.mxu2 %v5346_v11  ;;  %v5222_v11 = vor.u32 %v6501_v9, %v5221_v8  ;;  %v5351_v8 = vld [vmem:[%s7586_s26 + $0x140] sm:$0xf0] }
  0xd9   : > { %v601_v39 = vadd.f32 %v592_v36, %v591_v35  ;;  %v7621_v47 = vsub.f32 %v549_v16, %v576_v44  ;;  %v7623_v48 = vsub.f32 %v550_v17, %v576_v44  ;;  %v6525_v16 = vld [vmem:[%s7586_s26 + $0x104] sm:$0xf0]  ;;  %v5509_v17 = vld [vmem:[%s7586_s26 + $0x270] sm:$0xf]  ;;  %v5294_v35 = vor.u32 %v6519_v29, %v5293_v28  ;;  %v6567_v36 = vld [vmem:[%s7586_s26 + $0x254] sm:$0xf0] }
  0xda   : > { %v567_v40 = vpop.xlane.xlu1 %566  ;;  %v5510_v22 = vor.u32 %v6573_v19, %v5509_v17  ;;  %v5269_v44 = vld [vmem:[%s7586_s26 + $0x90] sm:$0xf]  ;;  %v5415_v19 = vld [vmem:[%s7586_s26 + $0x1c8] sm:$0xf0]  ;;  %v5198_v29 = vor.u32 %v6495_v25, %v5197_v24  ;;  %v6523_v25 = vld [vmem:[%s7586_s26 + $0xfc] sm:$0xf] }
  0xdb   : > { %v578_v42 = vmul.f32 %v7595_v26, %v567_v40  ;;  %602 = vadd.xlane.f32.xlu0 %v601_v39  ;;  %v589_v51 = vmul.f32 %v7621_v47, %v7621_v47  ;;  %v590_v52 = vmul.f32 %v7623_v48, %v7623_v48  ;;  %v5486_v39 = vor.u32 %v6567_v36, %v5485_v30  ;;  %v6543_v30 = vld [vmem:[%s7586_s26 + $0x194] sm:$0xf0] }
  0xdc   : > { %1293 = vmatpush.bf16.msra.mxu1 %v5510_v22  ;;  %1312 = vmatpush.bf16.msra.mxu2 %v5322_v23  ;;  %v5298_v40 = vor.u32 %v6516_v37, %v5295_v38  ;;  %v5199_v38 = vld [vmem:[%s7586_s26 + $0x18] sm:$0xf0] }
  0xdd   : > { %v7617_v45 = vsub.f32 %v553_v14, %v578_v42  ;;  %v7619_v46 = vsub.f32 %v554_v15, %v578_v42  ;;  %v598_v54 = vadd.f32 %v590_v52, %v589_v51  ;;  %v5538_v14 = vor.u32 %v6576_v12, %v5535_v13  ;;  %v5317_v15 = vld [vmem:[%s7586_s26 + $0xf0] sm:$0xf]  ;;  %v5487_v42 = vld [vmem:[%s7586_s26 + $0x258] sm:$0xf0]  ;;  %v6561_v52 = vld [vmem:[%s7586_s26 + $0x224] sm:$0xf0] }
  0xde   : > { %v5318_v18 = vor.u32 %v6525_v16, %v5317_v15  ;;  %v5490_v43 = vor.u32 %v6564_v41, %v5487_v42  ;;  %v6549_v12 = vld [vmem:[%s7586_s26 + $0x1c4] sm:$0xf0]  ;;  %v6498_v13 = vld [vmem:[%s7586_s26 + $0x34] sm:$0xf]  ;;  %v5391_v41 = vld [vmem:[%s7586_s26 + $0x198] sm:$0xf0] }
  0xdf   : > { %v593_v49 = vmul.f32 %v7617_v45, %v7617_v45  ;;  %v594_v50 = vmul.f32 %v7619_v46, %v7619_v46  ;;  %599 = vadd.xlane.f32.xlu2 %v598_v54  ;;  %1330 = vmatpush.bf16.msra.mxu3 %v5538_v14  ;;  %v5271_v54 = vld [vmem:[%s7586_s26 + $0xa8] sm:$0xf0]  ;;  %v5414_v16 = vor.u32 %v6549_v12, %v5413_v10 }
  0xe0   : > { %1274 = vmatpush.bf16.msra.mxu0 %v5318_v18  ;;  %1294 = vmatpush.bf16.msra.mxu1 %v5486_v39  ;;  %v5223_v14 = vld [vmem:[%s7586_s26 + $0x48] sm:$0xf0]  ;;  %v6546_v18 = vld [vmem:[%s7586_s26 + $0x1b4] sm:$0xf]  ;;  %v6540_v39 = vld [vmem:[%s7586_s26 + $0x184] sm:$0xf] }
  0xe1   : > { %v604_v53 = vadd.f32 %v594_v50, %v593_v49  ;;  %1313 = vmatpush.bf16.msra.mxu2 %v5298_v40  ;;  %v6513_v49 = vld [vmem:[%s7586_s26 + $0xa4] sm:$0xf0]  ;;  %v5461_v50 = vld [vmem:[%s7586_s26 + $0x210] sm:$0xf]  ;;  %v5226_v17 = vor.u32 %v6498_v13, %v5223_v14  ;;  %v5418_v22 = vor.u32 %v6546_v18, %v5415_v19  ;;  %v5394_v42 = vor.u32 %v6540_v39, %v5391_v41  ;;  %v6577_v12 = vld [vmem:[%s7586_s26 + $0x2ac] sm:$0xf] }
  0xe2   : > { %v5270_v51 = vor.u32 %v6513_v49, %v5269_v44  ;;  %v5462_v55 = vor.u32 %v6561_v52, %v5461_v50  ;;  %v6538_v44 = vld [vmem:[%s7586_s26 + $0x16c] sm:$0xf0]  ;;  %v5565_v49 = vld [vmem:[%s7586_s26 + $0x2d8] sm:$0xf]  ;;  %v5543_v13 = vld [vmem:[%s7586_s26 + $0x2c0] sm:$0xf0] }
  0xe3   : > { %605 = vadd.xlane.f32.xlu1 %v604_v53  ;;  %1331 = vmatpush.bf16.msra.mxu3 %v5514_v27  ;;  %v6510_v53 = vld [vmem:[%s7586_s26 + $0x94] sm:$0xf]  ;;  %v5389_v27 = vld [vmem:[%s7586_s26 + $0x180] sm:$0xf]  ;;  %v6586_v52 = vld [vmem:[%s7586_s26 + $0x2ec] sm:$0xf0]  ;;  %v5546_v19 = vor.u32 %v6577_v12, %v5543_v13 }
  0xe4   : > { %1275 = vmatpush.bf16.msra.mxu0 %v5294_v35  ;;  %v5274_v56 = vor.u32 %v6510_v53, %v5271_v54  ;;  %1295 = vmatpush.bf16.msra.mxu1 %v5462_v55  ;;  %v6492_v35 = vld [vmem:[%s7586_s26 + $0x4] sm:$0xf]  ;;  %v5390_v37 = vor.u32 %v6543_v30, %v5389_v27  ;;  %v6535_v53 = vld [vmem:[%s7586_s26 + $0x15c] sm:$0xf]  ;;  %v5375_v54 = vld [vmem:[%s7586_s26 + $0x170] sm:$0xf0]  ;;  %v5566_v57 = vor.u32 %v6586_v52, %v5565_v49 }
  0xe5   : > { %v5202_v40 = vor.u32 %v6492_v35, %v5199_v38  ;;  %v5378_v58 = vor.u32 %v6535_v53, %v5375_v54  ;;  %v5327_v27 = vld [vmem:[%s7586_s26 + $0x110] sm:$0xf0]  ;;  %v5493_v41 = vld [vmem:[%s7586_s26 + $0x248] sm:$0xf]  ;;  %v6514_v12 = vld [vmem:[%s7586_s26 + $0xac] sm:$0xf0] }
  0xe6   : > { %1314 = vmatpush.bf16.msra.mxu2 %v5274_v56  ;;  %v5330_v30 = vor.u32 %v6523_v25, %v5327_v27  ;;  %v5519_v35 = vld [vmem:[%s7586_s26 + $0x290] sm:$0xf0]  ;;  %v5469_v13 = vld [vmem:[%s7586_s26 + $0x218] sm:$0xf] }
  0xe7   : > { %1332 = vmatpush.bf16.msra.mxu3 %v5490_v43  ;;  %v5373_v43 = vld [vmem:[%s7586_s26 + $0x158] sm:$0xf]  ;;  %v5471_v27 = vld [vmem:[%s7586_s26 + $0x230] sm:$0xf0] }
  0xe8   : > { %1276 = vmatpush.bf16.msra.mxu0 %v5270_v51  ;;  %1296 = vmatpush.bf16.msra.mxu1 %v5438_v3  ;;  %v5374_v51 = vor.u32 %v6538_v44, %v5373_v43 }
  0xea   : > { %1315 = vmatpush.bf16.msra.mxu2 %v5250_v4 }
  0xeb   : > { %1333 = vmatpush.bf16.msra.mxu3 %v5466_v59  ;;  %v6583_v59 = vld [vmem:[%s7586_s26 + $0x2dc] sm:$0xf] }
  0xec   : > { %1277 = vmatpush.bf16.msra.mxu0 %v5246_v63  ;;  %1297 = vmatpush.bf16.msra.mxu1 %v5414_v16  ;;  %v5570_v63 = vor.u32 %v6583_v59, %v5567_v60  ;;  %v6526_v16 = vld [vmem:[%s7586_s26 + $0x10c] sm:$0xf0] }
  0xee   : > { %1316 = vmatpush.bf16.msra.mxu2 %v5226_v17  ;;  %v7737_v17 = vld [vmem:[%s7580_s19] sm:$0xff] }
  0xef   : > { %1334 = vmatpush.bf16.msra.mxu3 %v5442_v7  ;;  %v6529_v7 = vld [vmem:[%s7586_s26 + $0x12c] sm:$0xf]  ;;  %v665_v43 = vperm.slane %v7737_v17, 4  ;;  %v679_v59 = vperm.slane %v7737_v17, 5 }
  0xf0   : > { %1278 = vmatpush.bf16.msra.mxu0 %v5222_v11  ;;  %1298 = vmatpush.bf16.msra.mxu1 %v5390_v37  ;;  %v5354_v11 = vor.u32 %v6529_v7, %v5351_v8  ;;  %v5301_v37 = vld [vmem:[%s7586_s26 + $0xc8] sm:$0xf] }
  0xf2   : > { %1317 = vmatpush.bf16.msra.mxu2 %v5202_v40  ;;  %v6520_v40 = vld [vmem:[%s7586_s26 + $0xdc] sm:$0xf0] }
  0xf3   : > { %1335 = vmatpush.bf16.msra.mxu3 %v5418_v22  ;;  %v5302_v49 = vor.u32 %v6520_v40, %v5301_v37  ;;  %v6556_v40 = vld [vmem:[%s7586_s26 + $0x1fc] sm:$0xf0] }
  0xf4   : > { %1279 = vmatpush.bf16.msra.mxu0 %v5198_v29  ;;  %1367 = vmatpush.bf16.msrb.mxu1 %v5566_v57  ;;  %v6571_v29 = vld [vmem:[%s7586_s26 + $0x27c] sm:$0xf] }
  0xf5   : > { %v5522_v39 = vor.u32 %v6571_v29, %v5519_v35  ;;  %v5253_v29 = vld [vmem:[%s7586_s26 + $0x68] sm:$0xf] }
  0xf6   : > { %1386 = vmatpush.bf16.msrb.mxu2 %v5378_v58  ;;  %v678_v58 = vperm.slane %v7737_v17, 1 }
  0xf7   : > { %1336 = vmatpush.bf16.msra.mxu3 %v5394_v42  ;;  %v664_v42 = vperm.slane %v7737_v17, 0  ;;  %v6511_v17 = vld [vmem:[%s7586_s26 + $0x9c] sm:$0xf] }
  0xf8   : > { %1348 = vmatpush.bf16.msrb.mxu0 %v5374_v51  ;;  %1368 = vmatpush.bf16.msrb.mxu1 %v5542_v6  ;;  %v6517_v51 = vld [vmem:[%s7586_s26 + $0xcc] sm:$0xf] }
  0xf9   : > { %v7773_v2 = vperm.slane %v664_v42, 0  ;;  %v5255_v42 = vld [vmem:[%s7586_s26 + $0x80] sm:$0xf0] }
  0xfa   : > { %1387 = vmatpush.bf16.msrb.mxu2 %v5354_v11  ;;  %v5277_v11 = vld [vmem:[%s7586_s26 + $0x98] sm:$0xf] }
  0xfb   : > { %1405 = vmatpush.bf16.msrb.mxu3 %v5570_v63 }
  0xfc   : > { %1349 = vmatpush.bf16.msrb.mxu0 %v5350_v5  ;;  %v7775_v5 = vperm.slane %v665_v43, 0 }
  0xfe   : > { %1388 = vmatpush.bf16.msrb.mxu2 %v5330_v30 }
  0xff   : > { %1406 = vmatpush.bf16.msrb.mxu3 %v5546_v19 }
 0x103   : > { %1407 = vmatpush.bf16.msrb.mxu3 %v5522_v39  ;;  %v5445_v39 = vld [vmem:[%s7586_s26 + $0x1e8] sm:$0xf] }
 0x14a   : > { %v597_v20 = vpop.xlane.xlu2 %596 }
 0x14b   : > { %v607_v23 = vmul.f32 %v597_v20, %v7595_v26  ;;  %v5517_v20 = vld [vmem:[%s7586_s26 + $0x278] sm:$0xf] }
 0x14d   : > { %v7698_v36 = vadd.f32 1e-05, %v607_v23 }
 0x14e   : > { %v603_v15 = vpop.xlane.xlu0 %602 }
 0x14f   : > { %v609_v21 = vmul.f32 %v603_v15, %v7595_v26  ;;  %v5325_v15 = vld [vmem:[%s7586_s26 + $0xf8] sm:$0xf]  ;;  %vm621_vm2 = vweird.f32 %v7698_v36 }
 0x150   : > { %v5326_v23 = vor.u32 %v6526_v16, %v5325_v15  ;;  %v5278_v16 = vor.u32 %v6514_v12, %v5277_v11  ;;  %v5423_v11 = vld [vmem:[%s7586_s26 + $0x1d0] sm:$0xf0]  ;;  %v5205_v12 = vld [vmem:[%s7586_s26 + $0x8] sm:$0xf] }
 0x151   : > { %v7694_v28 = vadd.f32 1e-05, %v609_v21  ;;  %v6574_v21 = vld [vmem:[%s7586_s26 + $0x28c] sm:$0xf0] }
 0x152   : > { %v600_v56 = vpop.xlane.xlu2 %599  ;;  %v5518_v24 = vor.u32 %v6574_v21, %v5517_v20  ;;  %1350 = vmatpush.bf16.msrb.mxu0 %v5326_v23  ;;  %v5279_v21 = vld [vmem:[%s7586_s26 + $0xb0] sm:$0xf0] }
 0x153   : > { %6933 = vrsqrt.f32 %v7694_v28  ;;  %v608_v62 = vmul.f32 %v600_v56, %v7595_v26  ;;  %v6565_v56 = vld [vmem:[%s7586_s26 + $0x24c] sm:$0xf]  ;;  %v5282_v25 = vor.u32 %v6511_v17, %v5279_v21  ;;  %vm641_vm7 = vweird.f32 %v7694_v28 }
 0x154   : > { %6935 = vrsqrt.f32 %v7698_v36  ;;  %1369 = vmatpush.bf16.msrb.mxu1 %v5518_v24  ;;  %v6493_v17 = vld [vmem:[%s7586_s26 + $0xc] sm:$0xf] }
 0x155   : > { %v7727_v10 = vadd.f32 1e-05, %v608_v62  ;;  %v5495_v62 = vld [vmem:[%s7586_s26 + $0x260] sm:$0xf0] }
 0x156   : > { %v606_v50 = vpop.xlane.xlu1 %605  ;;  %v5498_v1 = vor.u32 %v6565_v56, %v5495_v62  ;;  %1351 = vmatpush.bf16.msrb.mxu0 %v5302_v49  ;;  %v5421_v56 = vld [vmem:[%s7586_s26 + $0x1b8] sm:$0xf] }
 0x157   : > { %v610_v55 = vmul.f32 %v606_v50, %v7595_v26  ;;  %v6568_v50 = vld [vmem:[%s7586_s26 + $0x25c] sm:$0xf0]  ;;  %vm631_vm5 = vweird.f32 %v7727_v10 }
 0x158   : > { %v5494_v54 = vor.u32 %v6568_v50, %v5493_v41  ;;  %1408 = vmatpush.bf16.msrb.mxu3 %v5498_v1  ;;  %v6505_v41 = vld [vmem:[%s7586_s26 + $0x6c] sm:$0xf]  ;;  %v6547_v1 = vld [vmem:[%s7586_s26 + $0x1bc] sm:$0xf] }
 0x159   : > { %v7719_v3 = vpop.eup %6933  ;;  %v7721_v4 = vadd.f32 1e-05, %v610_v55  ;;  %v5303_v55 = vld [vmem:[%s7586_s26 + $0xe0] sm:$0xf0]  ;;  %v5258_v49 = vor.u32 %v6505_v41, %v5255_v42  ;;  %v6553_v50 = vld [vmem:[%s7586_s26 + $0x1ec] sm:$0xf] }
 0x15a   : > { %v7725_v9 = vpop.eup %6935  ;;  %v636_v18 = vmul.f32 %v7719_v3, %v7694_v28  ;;  %v5306_v61 = vor.u32 %v6517_v51, %v5303_v55  ;;  %1370 = vmatpush.bf16.msrb.mxu1 %v5494_v54  ;;  %1352 = vmatpush.bf16.msrb.mxu0 %v5278_v16  ;;  %v5447_v51 = vld [vmem:[%s7586_s26 + $0x200] sm:$0xf0]  ;;  %v6502_v55 = vld [vmem:[%s7586_s26 + $0x4c] sm:$0xf0]  ;;  %vm642_vm10 = vweird.f32 %v7719_v3  ;;  %v6539_v28 = vld [vmem:[%s7586_s26 + $0x174] sm:$0xf0] }
 0x15b   : > { %v616_v14 = vmul.f32 %v7725_v9, %v7698_v36  ;;  %6937 = vrsqrt.f32 %v7721_v4  ;;  %vm622_vm1 = vweird.f32 %v7725_v9  ;;  %v5450_v54 = vor.u32 %v6553_v50, %v5447_v51  ;;  %vm643_vm12 = vmor %vm641_vm7, %vm642_vm10  ;;  %v6587_v41 = vld [vmem:[%s7586_s26 + $0x2f4] sm:$0xf0]  ;;  %v6536_v42 = vld [vmem:[%s7586_s26 + $0x164] sm:$0xf] }
 0x15c   : > { %6939 = vrsqrt.f32 %v7727_v10  ;;  %v637_v44 = vmul.f32 %v7719_v3, %v636_v18  ;;  %vm623_vm3 = vmor %vm621_vm2, %vm622_vm1  ;;  %1389 = vmatpush.bf16.msrb.mxu2 %v5306_v61  ;;  %v7794_v18 = vperm.slane %v679_v59, 1  ;;  %vm651_vm8 = vweird.f32 %v7721_v4  ;;  %v5357_v50 = vld [vmem:[%s7586_s26 + $0x130] sm:$0xf] }
 0x15d   : > { %v617_v22 = vmul.f32 %v7725_v9, %v616_v14  ;;  %v7787_v14 = vperm.slane %v678_v58, 1  ;;  %v6550_v58 = vld [vmem:[%s7586_s26 + $0x1cc] sm:$0xf0] }
 0x15e   : > { %v7779_v6 = vmul.f32 0.5, %v637_v44  ;;  %v5446_v44 = vor.u32 %v6556_v40, %v5445_v39  ;;  %v5573_v39 = vld [vmem:[%s7586_s26 + $0x2e0] sm:$0xf] }
 0x15f   : > { %v618_v38 = vmul.f32 0.5, %v617_v22  ;;  %v6559_v22 = vld [vmem:[%s7586_s26 + $0x21c] sm:$0xf] }
 0x160   : > { %v639_v24 = vsub.f32 1.5, %v7779_v6  ;;  %1390 = vmatpush.bf16.msrb.mxu2 %v5282_v25  ;;  %v5399_v25 = vld [vmem:[%s7586_s26 + $0x1a0] sm:$0xf0] }
 0x161   : > { %v7757_v52 = vpop.eup %6937  ;;  %v619_v53 = vsub.f32 1.5, %v618_v38  ;;  %v6508_v38 = vld [vmem:[%s7586_s26 + $0x7c] sm:$0xf0] }
 0x162   : > { %v7762_v57 = vpop.eup %6939  ;;  %v646_v60 = vmul.f32 %v7757_v52, %v7721_v4  ;;  %vm652_vm9 = vweird.f32 %v7757_v52 }
 0x163   : > { %v620_v63 = vmul.f32 %v7725_v9, %v619_v53  ;;  %v626_v0 = vmul.f32 %v7762_v57, %v7727_v10  ;;  %vm632_vm4 = vweird.f32 %v7762_v57  ;;  %v5474_v10 = vor.u32 %v6559_v22, %v5471_v27  ;;  %v5229_v53 = vld [vmem:[%s7586_s26 + $0x38] sm:$0xf]  ;;  %v5207_v22 = vld [vmem:[%s7586_s26 + $0x20] sm:$0xf0]  ;;  %vm653_vm11 = vmor %vm651_vm8, %vm652_vm9 }
 0x164   : > { %v647_v7 = vmul.f32 %v7757_v52, %v646_v60  ;;  %vm7807_vm6 = vmor %vm631_vm5, %vm632_vm4  ;;  %v5230_v62 = vor.u32 %v6502_v55, %v5229_v53  ;;  %1391 = vmatpush.bf16.msrb.mxu2 %v5258_v49  ;;  %v5210_v4 = vor.u32 %v6493_v17, %v5207_v22  ;;  %v6584_v49 = vld [vmem:[%s7586_s26 + $0x2e4] sm:$0xf]  ;;  %v6533_v55 = vld [vmem:[%s7586_s26 + $0x144] sm:$0xf0] }
 0x165   : > { %v624_v36 = vsel %vm623_vm3, %v7725_v9, %v620_v63  ;;  %v627_v8 = vmul.f32 %v7762_v57, %v626_v0  ;;  %v6562_v9 = vld [vmem:[%s7586_s26 + $0x22c] sm:$0xf0]  ;;  %1409 = vmatpush.bf16.msrb.mxu3 %v5474_v10  ;;  %v6499_v63 = vld [vmem:[%s7586_s26 + $0x3c] sm:$0xf]  ;;  %v5231_v0 = vld [vmem:[%s7586_s26 + $0x50] sm:$0xf0] }
 0x166   : > { %v7789_v15 = vmul.f32 0.5, %v647_v7  ;;  %v5470_v20 = vor.u32 %v6562_v9, %v5469_v13  ;;  %v655_v23 = vmul.f32 %v624_v36, %v7603_v33  ;;  %v656_v30 = vmul.f32 %v624_v36, %v7605_v34  ;;  %v6496_v13 = vld [vmem:[%s7586_s26 + $0x1c] sm:$0xf0]  ;;  %v5501_v22 = vld [vmem:[%s7586_s26 + $0x250] sm:$0xf] }
 0x167   : > { %v628_v19 = vmul.f32 0.5, %v627_v8  ;;  %v5254_v34 = vor.u32 %v6508_v38, %v5253_v29  ;;  %v5422_v36 = vor.u32 %v6550_v58, %v5421_v56  ;;  %v5234_v8 = vor.u32 %v6499_v63, %v5231_v0  ;;  %v5381_v38 = vld [vmem:[%s7586_s26 + $0x160] sm:$0xf]  ;;  %v5549_v56 = vld [vmem:[%s7586_s26 + $0x2b0] sm:$0xf] }
 0x168   : > { %v649_v35 = vsub.f32 1.5, %v7789_v15  ;;  %1371 = vmatpush.bf16.msrb.mxu1 %v5470_v20  ;;  %v670_v59 = vmul.f32 %v7773_v2, %v655_v23  ;;  %v671_v60 = vmul.f32 %v7775_v5, %v656_v30  ;;  %v5206_v9 = vor.u32 %v6496_v13, %v5205_v12  ;;  %v6541_v23 = vld [vmem:[%s7586_s26 + $0x18c] sm:$0xf]  ;;  %v6581_v58 = vld [vmem:[%s7586_s26 + $0x2c4] sm:$0xf0] }
 0x169   : > { %v629_v37 = vsub.f32 1.5, %v628_v19  ;;  %1353 = vmatpush.bf16.msrb.mxu0 %v5254_v34  ;;  %1410 = vmatpush.bf16.msrb.mxu3 %v5450_v54  ;;  %v640_v19 = vmul.f32 %v7719_v3, %v639_v24  ;;  %v5402_v33 = vor.u32 %v6541_v23, %v5399_v25  ;;  %v5382_v40 = vor.u32 %v6539_v28, %v5381_v38  ;;  %v6569_v23 = vld [vmem:[%s7586_s26 + $0x264] sm:$0xf0] }
 0x16a   : > { %v650_v20 = vmul.f32 %v7757_v52, %v649_v35  ;;  %v684_v27 = vadd.f32 %v7787_v14, %v670_v59  ;;  %v685_v29 = vadd.f32 %v7794_v18, %v671_v60  ;;  %1392 = vmatpush.bf16.msrb.mxu2 %v5234_v8  ;;  %v5358_v60 = vor.u32 %v6533_v55, %v5357_v50  ;;  %v6575_v8 = vld [vmem:[%s7586_s26 + $0x294] sm:$0xf0]  ;;  %v5261_v50 = vld [vmem:[%s7586_s26 + $0x70] sm:$0xf] }
 0x16b   : > { %v630_v43 = vmul.f32 %v7762_v57, %v629_v37  ;;  %v644_v34 = vsel %vm643_vm12, %v7719_v3, %v640_v19  ;;  %v5575_v3 = vld [vmem:[%s7586_s26 + $0x2f8] sm:$0xf0]  ;;  %v5453_v55 = vld [vmem:[%s7586_s26 + $0x1f0] sm:$0xf] }
 0x16c   : > { %1372 = vmatpush.bf16.msrb.mxu1 %v5446_v44  ;;  %v654_v10 = vsel %vm653_vm11, %v7757_v52, %v650_v20  ;;  %v5383_v52 = vld [vmem:[%s7586_s26 + $0x178] sm:$0xf0]  ;;  %v5578_v54 = vor.u32 %v6584_v49, %v5575_v3  ;;  %v659_v59 = vmul.f32 %v644_v34, %v7599_v31  ;;  %v660_v63 = vmul.f32 %v644_v34, %v7601_v32  ;;  %v5333_v31 = vld [vmem:[%s7586_s26 + $0x100] sm:$0xf]  ;;  %v6572_v32 = vld [vmem:[%s7586_s26 + $0x284] sm:$0xf] }
 0x16d   : > { %v634_v61 = vsel %vm7807_vm6, %v7762_v57, %v630_v43  ;;  %v5397_v57 = vld [vmem:[%s7586_s26 + $0x188] sm:$0xf]  ;;  %1354 = vmatpush.bf16.msrb.mxu0 %v5230_v62  ;;  %v5574_v43 = vor.u32 %v6587_v41, %v5573_v39  ;;  %v5386_v44 = vor.u32 %v6536_v42, %v5383_v52  ;;  %v661_v51 = vmul.f32 %v654_v10, %v7617_v45  ;;  %v6578_v62 = vld [vmem:[%s7586_s26 + $0x2b4] sm:$0xf]  ;;  %v5477_v41 = vld [vmem:[%s7586_s26 + $0x220] sm:$0xf] }
 0x16e   : > { %v657_v6 = vmul.f32 %v634_v61, %v7621_v47  ;;  %v658_v7 = vmul.f32 %v634_v61, %v7623_v48  ;;  %v5426_v47 = vor.u32 %v6547_v1, %v5423_v11  ;;  %v6544_v48 = vld [vmem:[%s7586_s26 + $0x19c] sm:$0xf0]  ;;  %v662_v53 = vmul.f32 %v654_v10, %v7619_v46  ;;  %1393 = vmatpush.bf16.msrb.mxu2 %v5210_v4  ;;  %v6530_v61 = vld [vmem:[%s7586_s26 + $0x134] sm:$0xf]  ;;  %v5359_v46 = vld [vmem:[%s7586_s26 + $0x148] sm:$0xf0] }
 0x16f   : > { %v5398_v21 = vor.u32 %v6544_v48, %v5397_v57  ;;  %v5550_v45 = vor.u32 %v6581_v58, %v5549_v56  ;;  %v5362_v0 = vor.u32 %v6530_v61, %v5359_v46  ;;  %v5551_v1 = vld [vmem:[%s7586_s26 + $0x2c8] sm:$0xf0]  ;;  %v6524_v11 = vld [vmem:[%s7586_s26 + $0x104] sm:$0xf]  ;;  %v676_v12 = vmul.f32 %v7773_v2, %v661_v51  ;;  %v5527_v57 = vld [vmem:[%s7586_s26 + $0x298] sm:$0xf0] }
 0x170   : > { %v672_v15 = vmul.f32 %v7773_v2, %v657_v6  ;;  %v673_v16 = vmul.f32 %v7775_v5, %v658_v7  ;;  %1373 = vmatpush.bf16.msrb.mxu1 %v5422_v36  ;;  %1411 = vmatpush.bf16.msrb.mxu3 %v5426_v47  ;;  %v6527_v6 = vld [vmem:[%s7586_s26 + $0x114] sm:$0xf0]  ;;  %v5554_v7 = vor.u32 %v6578_v62, %v5551_v1  ;;  %v5525_v36 = vld [vmem:[%s7586_s26 + $0x280] sm:$0xf]  ;;  %v5335_v47 = vld [vmem:[%s7586_s26 + $0x118] sm:$0xf0] }
 0x171   : > { %1355 = vmatpush.bf16.msrb.mxu0 %v5206_v9  ;;  %v677_v13 = vmul.f32 %v7775_v5, %v662_v53  ;;  %v674_v48 = vmul.f32 %v7773_v2, %v659_v59  ;;  %v5309_v9 = vld [vmem:[%s7586_s26 + $0xd0] sm:$0xf]  ;;  %v675_v17 = vmul.f32 %v7775_v5, %v660_v63  ;;  %v5338_v19 = vor.u32 %v6524_v11, %v5335_v47  ;;  %v5503_v4 = vld [vmem:[%s7586_s26 + $0x268] sm:$0xf0]  ;;  %v6563_v42 = vld [vmem:[%s7586_s26 + $0x234] sm:$0xf0] }
 0x172   : > { %v686_v24 = vadd.f32 %v7787_v14, %v672_v15  ;;  %v687_v30 = vadd.f32 %v7794_v18, %v673_v16  ;;  %v5334_v15 = vor.u32 %v6527_v6, %v5333_v31  ;;  %v5526_v16 = vor.u32 %v6575_v8, %v5525_v36  ;;  %v6512_v52 = vld [vmem:[%s7586_s26 + $0xa4] sm:$0xf]  ;;  %v5479_v3 = vld [vmem:[%s7586_s26 + $0x238] sm:$0xf0]  ;;  %v6557_v56 = vld [vmem:[%s7586_s26 + $0x204] sm:$0xf0] }
 0x173   : > { %v5530_v20 = vor.u32 %v6572_v32, %v5527_v57  ;;  %v690_v2 = vadd.f32 %v7787_v14, %v676_v12  ;;  %v691_v25 = vadd.f32 %v7794_v18, %v677_v13  ;;  %v5502_v5 = vor.u32 %v6569_v23, %v5501_v22  ;;  %v6560_v49 = vld [vmem:[%s7586_s26 + $0x224] sm:$0xf]  ;;  %v6554_v61 = vld [vmem:[%s7586_s26 + $0x1f4] sm:$0xf]  ;;  %v5455_v46 = vld [vmem:[%s7586_s26 + $0x208] sm:$0xf0] }
 0x174   : > { %v7862_v35 = vpack.c.bf16 %v686_v24, %v684_v27  ;;  %v7864_v37 = vpack.c.bf16 %v687_v30, %v685_v29  ;;  %1374 = vmatpush.bf16.msrb.mxu1 %v5398_v21  ;;  %1412 = vmatpush.bf16.msrb.mxu3 %v5402_v33  ;;  %v6521_v21 = vld [vmem:[%s7586_s26 + $0xe4] sm:$0xf0]  ;;  %v6518_v27 = vld [vmem:[%s7586_s26 + $0xd4] sm:$0xf]  ;;  %v5311_v24 = vld [vmem:[%s7586_s26 + $0xe8] sm:$0xf0]  ;;  %v688_v33 = vadd.f32 %v7787_v14, %v674_v48 }
 0x175   : > { %v5310_v29 = vor.u32 %v6521_v21, %v5309_v9  ;;  %v6566_v30 = vld [vmem:[%s7586_s26 + $0x254] sm:$0xf]  ;;  %v689_v10 = vadd.f32 %v7794_v18, %v675_v17  ;;  %v5314_v39 = vor.u32 %v6518_v27, %v5311_v24  ;;  %v6515_v14 = vld [vmem:[%s7586_s26 + $0xb4] sm:$0xf0]  ;;  %v5482_v53 = vor.u32 %v6560_v49, %v5479_v3  ;;  %v5237_v62 = vld [vmem:[%s7586_s26 + $0x40] sm:$0xf] }
 0x176   : > { %1280 = vmatmul.bf16.vlgmr.msra.gmra.mxu0 %v7862_v35  ;;  %1299 = vmatmul.bf16.vlgmr.msra.gmra.mxu1 %v7864_v37  ;;  %v7916_v38 = vpack.c.bf16 %v690_v2, %v688_v33  ;;  %v5506_v34 = vor.u32 %v6566_v30, %v5503_v4  ;;  %v5454_v59 = vor.u32 %v6557_v56, %v5453_v55  ;;  %v6503_v63 = vld [vmem:[%s7586_s26 + $0x54] sm:$0xf0]  ;;  %v5239_v36 = vld [vmem:[%s7586_s26 + $0x58] sm:$0xf0]  ;;  %v6548_v12 = vld [vmem:[%s7586_s26 + $0x1c4] sm:$0xf] }
 0x177   : > { %1318 = vmatmul.bf16.vlgmr.msra.gmra.mxu2 %v7862_v35  ;;  %1337 = vmatmul.bf16.vlgmr.msra.gmra.mxu3 %v7864_v37  ;;  %v7918_v28 = vpack.c.bf16 %v691_v25, %v689_v10  ;;  %v6551_v1 = vld [vmem:[%s7586_s26 + $0x1d4] sm:$0xf0]  ;;  %v5458_v6 = vor.u32 %v6554_v61, %v5455_v46  ;;  %v5238_v8 = vor.u32 %v6503_v63, %v5237_v62  ;;  %v5431_v13 = vld [vmem:[%s7586_s26 + $0x1d8] sm:$0xf0]  ;;  %v5213_v47 = vld [vmem:[%s7586_s26 + $0x10] sm:$0xf] }
 0x178   : > { %1424 = vmatpush.bf16.msra.mxu0 %v5382_v40  ;;  %1443 = vmatpush.bf16.msra.mxu1 %v5574_v43  ;;  %v5285_v40 = vld [vmem:[%s7586_s26 + $0xa0] sm:$0xf]  ;;  %v5287_v43 = vld [vmem:[%s7586_s26 + $0xb8] sm:$0xf0]  ;;  %v6497_v32 = vld [vmem:[%s7586_s26 + $0x24] sm:$0xf0] }
 0x179   : > { %1462 = vmatpush.bf16.msra.mxu2 %v5386_v44  ;;  %1481 = vmatpush.bf16.msra.mxu3 %v5578_v54  ;;  %v5286_v18 = vor.u32 %v6515_v14, %v5285_v40  ;;  %v5478_v44 = vor.u32 %v6563_v42, %v5477_v41  ;;  %v5290_v51 = vor.u32 %v6512_v52, %v5287_v43  ;;  %v6509_v54 = vld [vmem:[%s7586_s26 + $0x84] sm:$0xf0]  ;;  %v5405_v57 = vld [vmem:[%s7586_s26 + $0x190] sm:$0xf]  ;;  %v6494_v9 = vld [vmem:[%s7586_s26 + $0x14] sm:$0xf] }
 0x17a   : > { %v5262_v58 = vor.u32 %v6509_v54, %v5261_v50  ;;  %v6545_v48 = vld [vmem:[%s7586_s26 + $0x1a4] sm:$0xf0]  ;;  %v5214_v17 = vor.u32 %v6497_v32, %v5213_v47  ;;  %v6542_v21 = vld [vmem:[%s7586_s26 + $0x194] sm:$0xf]  ;;  %v5407_v22 = vld [vmem:[%s7586_s26 + $0x1a8] sm:$0xf0] }
 0x17b   : > { %v5410_v2 = vor.u32 %v6542_v21, %v5407_v22 }
 0x17c   : > { %1425 = vmatpush.bf16.msra.mxu0 %v5358_v60  ;;  %1444 = vmatpush.bf16.msra.mxu1 %v5550_v45  ;;  %v6506_v60 = vld [vmem:[%s7586_s26 + $0x74] sm:$0xf]  ;;  %v5263_v45 = vld [vmem:[%s7586_s26 + $0x88] sm:$0xf0] }
 0x17d   : > { %1463 = vmatpush.bf16.msra.mxu2 %v5362_v0  ;;  %1482 = vmatpush.bf16.msra.mxu3 %v5554_v7  ;;  %v5429_v0 = vld [vmem:[%s7586_s26 + $0x1c0] sm:$0xf]  ;;  %v5266_v31 = vor.u32 %v6506_v60, %v5263_v45  ;;  %v6500_v7 = vld [vmem:[%s7586_s26 + $0x44] sm:$0xf] }
 0x17e   : > { %v5430_v11 = vor.u32 %v6551_v1, %v5429_v0 }
 0x180   : > { %1426 = vmatpush.bf16.msra.mxu0 %v5334_v15  ;;  %1445 = vmatpush.bf16.msra.mxu1 %v5526_v16  ;;  %v5242_v15 = vor.u32 %v6500_v7, %v5239_v36  ;;  %v5434_v16 = vor.u32 %v6548_v12, %v5431_v13 }
 0x181   : > { %1464 = vmatpush.bf16.msra.mxu2 %v5338_v19  ;;  %1483 = vmatpush.bf16.msra.mxu3 %v5530_v20  ;;  %v5406_v19 = vor.u32 %v6545_v48, %v5405_v57  ;;  %v5215_v20 = vld [vmem:[%s7586_s26 + $0x28] sm:$0xf0] }
 0x182   : > { %v5218_v23 = vor.u32 %v6494_v9, %v5215_v20 }
 0x184   : > { %1427 = vmatpush.bf16.msra.mxu0 %v5310_v29  ;;  %1446 = vmatpush.bf16.msra.mxu1 %v5502_v5 }
 0x185   : > { %1465 = vmatpush.bf16.msra.mxu2 %v5314_v39  ;;  %1484 = vmatpush.bf16.msra.mxu3 %v5506_v34 }
 0x186   : > { %1285 = vmatmul.bf16.gmra.mxu0 %v7916_v38  ;;  %1304 = vmatmul.bf16.gmra.mxu1 %v7918_v28 }
 0x187   : > { %1323 = vmatmul.bf16.gmra.mxu2 %v7916_v38  ;;  %1342 = vmatmul.bf16.gmra.mxu3 %v7918_v28 }
 0x188   : > { %1428 = vmatpush.bf16.msra.mxu0 %v5286_v18  ;;  %1447 = vmatpush.bf16.msra.mxu1 %v5478_v44 }
 0x189   : > { %1466 = vmatpush.bf16.msra.mxu2 %v5290_v51  ;;  %1485 = vmatpush.bf16.msra.mxu3 %v5482_v53 }
 0x18c   : > { %1429 = vmatpush.bf16.msra.mxu0 %v5262_v58  ;;  %1448 = vmatpush.bf16.msra.mxu1 %v5454_v59 }
 0x18d   : > { %1467 = vmatpush.bf16.msra.mxu2 %v5266_v31  ;;  %1486 = vmatpush.bf16.msra.mxu3 %v5458_v6 }
 0x190   : > { %1430 = vmatpush.bf16.msra.mxu0 %v5238_v8  ;;  %1449 = vmatpush.bf16.msra.mxu1 %v5430_v11 }
 0x191   : > { %1468 = vmatpush.bf16.msra.mxu2 %v5242_v15  ;;  %1487 = vmatpush.bf16.msra.mxu3 %v5434_v16 }
 0x194   : > { %1431 = vmatpush.bf16.msra.mxu0 %v5214_v17  ;;  %1450 = vmatpush.bf16.msra.mxu1 %v5406_v19 }
 0x195   : > { %1469 = vmatpush.bf16.msra.mxu2 %v5218_v23  ;;  %1488 = vmatpush.bf16.msra.mxu3 %v5410_v2 }
 0x196   : > { %1356 = vmatmul.bf16.vlgmr.msrb.gmra.mxu0 %v7862_v35  ;;  %1375 = vmatmul.bf16.vlgmr.msrb.gmra.mxu1 %v7864_v37 }
 0x197   : > { %1394 = vmatmul.bf16.vlgmr.msrb.gmra.mxu2 %v7862_v35  ;;  %1413 = vmatmul.bf16.vlgmr.msrb.gmra.mxu3 %v7864_v37 }
 0x1a6   : > { %1361 = vmatmul.bf16.gmra.mxu0 %v7916_v38  ;;  %1380 = vmatmul.bf16.gmra.mxu1 %v7918_v28 }
 0x1a7   : > { %1399 = vmatmul.bf16.gmra.mxu2 %v7916_v38  ;;  %1418 = vmatmul.bf16.gmra.mxu3 %v7918_v28 }
 0x1b6   : > { %1432 = vmatmul.bf16.vlgmr.msra.gmra.mxu0 %v7862_v35  ;;  %1451 = vmatmul.bf16.vlgmr.msra.gmra.mxu1 %v7864_v37 }
 0x1b7   : > { %1470 = vmatmul.bf16.vlgmr.msra.gmra.mxu2 %v7862_v35  ;;  %1489 = vmatmul.bf16.vlgmr.msra.gmra.mxu3 %v7864_v37 }
 0x1c6   : > { %1437 = vmatmul.bf16.gmra.mxu0 %v7916_v38  ;;  %1456 = vmatmul.bf16.gmra.mxu1 %v7918_v28 }
 0x1c7   : > { %1475 = vmatmul.bf16.gmra.mxu2 %v7916_v38  ;;  %1494 = vmatmul.bf16.gmra.mxu3 %v7918_v28 }
 0x1f3   : > { %v1281_v25 = vpop.f32.mrf.mxu0  ;;  %v1300_v27 = vpop.f32.mrf.mxu1 }
 0x1f4   : > { %v7972_v29 = vadd.f32 %v1300_v27, %v1281_v25 }
 0x1f6   : > { %1536 = vrot.lane.b32.xlu2 %v7972_v29, %s7375_s12  ;;  %v1512_v35 = vsub.f32 0.0, %v7972_v29 }
 0x1f8   : > { %1520 = vrot.lane.b32.xlu0 %v1512_v35, %s7375_s12 }
 0x1fa   : > { %v1319_v37 = vpop.f32.mrf.mxu2  ;;  %v1338_v5 = vpop.f32.mrf.mxu3 }
 0x1fb   : > { %v7978_v24 = vadd.f32 %v1338_v5, %v1319_v37  ;;  %v1283_v30 = vpop.f32.mrf.mxu0  ;;  %v1302_v4 = vpop.f32.mrf.mxu1 }
 0x1fc   : > { %v7984_v10 = vadd.f32 %v1302_v4, %v1283_v30 }
 0x1fd   : > { %v1848_v33 = vsub.f32 0.0, %v7978_v24 }
 0x1fe   : > { %v1513_v14 = vsub.f32 0.0, %v7984_v10 }
 0x1ff   : > { %1856 = vrot.lane.b32.xlu1 %v1848_v33, %s7375_s12 }
 0x200   : > { %1872 = vrot.lane.b32.xlu0 %v7978_v24, %s7375_s12 }
 0x202   : > { %v1321_v38 = vpop.f32.mrf.mxu2  ;;  %v1340_v28 = vpop.f32.mrf.mxu3 }
 0x203   : > { %v1286_v39 = vpop.f32.mrf.mxu0  ;;  %v1305_v34 = vpop.f32.mrf.mxu1  ;;  %v8042_v57 = vadd.f32 %v1340_v28, %v1321_v38 }
 0x204   : > { %v7986_v40 = vadd.f32 %v1305_v34, %v1286_v39 }
 0x205   : > { %v1849_v17 = vsub.f32 0.0, %v8042_v57 }
 0x206   : > { %1540 = vrot.lane.b32.xlu2 %v7986_v40, %s7375_s12  ;;  %v1514_v44 = vsub.f32 0.0, %v7986_v40 }
 0x207   : > { %1522 = vrot.lane.b32.xlu1 %v1513_v14, %s7375_s12 }
 0x208   : > { %1538 = vrot.lane.b32.xlu0 %v7984_v10, %s7375_s12 }
 0x20a   : > { %v7994_v41 = vpop.f32.mrf.mxu2  ;;  %v7996_v18 = vpop.f32.mrf.mxu3 }
 0x20b   : > { %v1288_v42 = vpop.f32.mrf.mxu0  ;;  %v1307_v52 = vpop.f32.mrf.mxu1  ;;  %v8058_v37 = vadd.f32 %v7996_v18, %v7994_v41 }
 0x20c   : > { %v7998_v43 = vadd.f32 %v1307_v52, %v1288_v42 }
 0x20d   : > { %v1850_v34 = vsub.f32 0.0, %v8058_v37 }
 0x20e   : > { %v1515_v49 = vsub.f32 0.0, %v7998_v43 }
 0x210   : > { %1524 = vrot.lane.b32.xlu0 %v1514_v44, %s7375_s12  ;;  %1526 = vrot.lane.b32.xlu2 %v1515_v49, %s7375_s12 }
 0x212   : > { %v8004_v3 = vpop.f32.mrf.mxu2  ;;  %v8006_v50 = vpop.f32.mrf.mxu3 }
 0x213   : > { %v1357_v51 = vpop.f32.mrf.mxu0  ;;  %v1376_v53 = vpop.f32.mrf.mxu1  ;;  %v8072_v41 = vadd.f32 %v8006_v50, %v8004_v3 }
 0x214   : > { %v8008_v54 = vadd.f32 %v1376_v53, %v1357_v51 }
 0x215   : > { %v1851_v53 = vsub.f32 0.0, %v8072_v41 }
 0x216   : > { %v1569_v55 = vsub.f32 0.0, %v8008_v54 }
 0x218   : > { %1577 = vrot.lane.b32.xlu1 %v1569_v55, %s7375_s12  ;;  %1593 = vrot.lane.b32.xlu2 %v8008_v54, %s7375_s12 }
 0x21a   : > { %v1395_v56 = vpop.f32.mrf.mxu2  ;;  %v1414_v58 = vpop.f32.mrf.mxu3 }
 0x21b   : > { %v8014_v59 = vadd.f32 %v1414_v58, %v1395_v56  ;;  %v1359_v60 = vpop.f32.mrf.mxu0  ;;  %v1378_v45 = vpop.f32.mrf.mxu1 }
 0x21c   : > { %v8016_v61 = vadd.f32 %v1378_v45, %v1359_v60 }
 0x21d   : > { %v1904_v46 = vsub.f32 0.0, %v8014_v59 }
 0x21e   : > { %1595 = vrot.lane.b32.xlu0 %v8016_v61, %s7375_s12  ;;  %v1570_v8 = vsub.f32 0.0, %v8016_v61 }
 0x220   : > { %1928 = vrot.lane.b32.xlu1 %v8014_v59, %s7375_s12  ;;  %1912 = vrot.lane.b32.xlu2 %v1904_v46, %s7375_s12 }
 0x222   : > { %v1397_v62 = vpop.f32.mrf.mxu2  ;;  %v1416_v63 = vpop.f32.mrf.mxu3 }
 0x223   : > { %v8024_v0 = vadd.f32 %v1416_v63, %v1397_v62  ;;  %v1362_v1 = vpop.f32.mrf.mxu0  ;;  %v1381_v31 = vpop.f32.mrf.mxu1 }
 0x224   : > { %v8026_v6 = vadd.f32 %v1381_v31, %v1362_v1 }
 0x225   : > { %v1905_v7 = vsub.f32 0.0, %v8024_v0 }
 0x226   : > { %v1571_v36 = vsub.f32 0.0, %v8026_v6 }
 0x227   : > { %1914 = vrot.lane.b32.xlu0 %v1905_v7, %s7375_s12 }
 0x228   : > { %1581 = vrot.lane.b32.xlu1 %v1571_v36, %s7375_s12  ;;  %1579 = vrot.lane.b32.xlu2 %v1570_v8, %s7375_s12 }
 0x22a   : > { %v1400_v11 = vpop.f32.mrf.mxu2  ;;  %v1419_v12 = vpop.f32.mrf.mxu3 }
 0x22b   : > { %v1364_v13 = vpop.f32.mrf.mxu0  ;;  %v1383_v47 = vpop.f32.mrf.mxu1  ;;  %v8062_v4 = vadd.f32 %v1419_v12, %v1400_v11 }
 0x22c   : > { %v8034_v32 = vadd.f32 %v1383_v47, %v1364_v13  ;;  %v8082_v13 = vld [vmem:[#allocation6 + $0x10] sm:$0xff] }
 0x22d   : > { %v1906_v14 = vsub.f32 0.0, %v8062_v4 }
 0x22e   : > { %v1572_v19 = vsub.f32 0.0, %v8034_v32 }
 0x22f   : > { %1597 = vrot.lane.b32.xlu0 %v8026_v6, %s7375_s12 }
 0x230   : > { %1599 = vrot.lane.b32.xlu1 %v8034_v32, %s7375_s12  ;;  %1930 = vrot.lane.b32.xlu2 %v8024_v0, %s7375_s12 }
 0x232   : > { %v1402_v48 = vpop.f32.mrf.mxu2  ;;  %v1421_v15 = vpop.f32.mrf.mxu3 }
 0x233   : > { %v1433_v16 = vpop.f32.mrf.mxu0  ;;  %v1452_v9 = vpop.f32.mrf.mxu1  ;;  %v8050_v20 = vadd.f32 %v1421_v15, %v1402_v48  ;;  %v8085_v15 = vld [vmem:[#allocation6 + $0x8] sm:$0xff] }
 0x234   : > { %v1453_v27 = vadd.f32 %v1452_v9, %v1433_v16  ;;  %v8087_v16 = vld [vmem:[#allocation6 + $0x18] sm:$0xff] }
 0x235   : > { %v1907_v35 = vsub.f32 0.0, %v8050_v20 }
 0x237   : > { %1858 = vrot.lane.b32.xlu0 %v1849_v17, %s7375_s12 }
 0x238   : > { %1542 = vrot.lane.b32.xlu1 %v7998_v43, %s7375_s12  ;;  %1583 = vrot.lane.b32.xlu2 %v1572_v19, %s7375_s12 }
 0x23a   : > { %v1471_v21 = vpop.f32.mrf.mxu2  ;;  %v1490_v22 = vpop.f32.mrf.mxu3 }
 0x23b   : > { %v1435_v23 = vpop.f32.mrf.mxu0  ;;  %v1454_v2 = vpop.f32.mrf.mxu1  ;;  %v1491_v39 = vadd.f32 %v1490_v22, %v1471_v21  ;;  %v8091_v21 = vld [vmem:[#allocation6] sm:$0xff]  ;;  %v1610_v22 = vmul.f32 %v8085_v15, %v8016_v61 }
 0x23c   : > { %v1455_v25 = vadd.f32 %v1454_v2, %v1435_v23 }
 0x23e   : > { %1792 = vmatpush.msrb.mxu2 %v1455_v25 }
 0x23f   : > { %1934 = vrot.lane.b32.xlu0 %v8050_v20, %s7375_s12 }
 0x240   : > { %1793 = vmatpush.msrb.mxu2 %v1453_v27  ;;  %1918 = vrot.lane.b32.xlu1 %v1907_v35, %s7375_s12 }
 0x241   : > { %1874 = vrot.lane.b32.xlu2 %v8042_v57, %s7375_s12 }
 0x242   : > { %v1473_v5 = vpop.f32.mrf.mxu2  ;;  %v1492_v30 = vpop.f32.mrf.mxu3 }
 0x243   : > { %v1493_v33 = vadd.f32 %v1492_v30, %v1473_v5  ;;  %v1438_v38 = vpop.f32.mrf.mxu0  ;;  %v1457_v28 = vpop.f32.mrf.mxu1  ;;  %v1553_v5 = vmul.f32 %v8091_v21, %v7972_v29  ;;  %v1609_v30 = vmul.f32 %v8091_v21, %v8008_v54 }
 0x244   : > { %v1458_v51 = vadd.f32 %v1457_v28, %v1438_v38 }
 0x245   : > { %2122 = vmatpush.msra.mxu2 %v1493_v33 }
 0x247   : > { %1860 = vrot.lane.b32.xlu0 %v1850_v34, %s7375_s12  ;;  %2123 = vmatpush.msra.mxu2 %v1491_v39 }
 0x248   : > { %1932 = vrot.lane.b32.xlu1 %v8062_v4, %s7375_s12 }
 0x249   : > { %1916 = vrot.lane.b32.xlu2 %v1906_v14, %s7375_s12 }
 0x24a   : > { %v1476_v18 = vpop.f32.mrf.mxu2  ;;  %v1495_v42 = vpop.f32.mrf.mxu3 }
 0x24b   : > { %v1440_v52 = vpop.f32.mrf.mxu0  ;;  %v1459_v44 = vpop.f32.mrf.mxu1  ;;  %v1496_v56 = vadd.f32 %v1495_v42, %v1476_v18  ;;  %v1945_v18 = vmul.f32 %v8085_v15, %v8024_v0 }
 0x24c   : > { %v1460_v49 = vadd.f32 %v1459_v44, %v1440_v52 }
 0x24e   : > { %1821 = vmatpush.msrb.mxu3 %v1460_v49 }
 0x24f   : > { %1878 = vrot.lane.b32.xlu0 %v8072_v41, %s7375_s12 }
 0x250   : > { %1822 = vmatpush.msrb.mxu3 %v1458_v51  ;;  %1862 = vrot.lane.b32.xlu1 %v1851_v53, %s7375_s12  ;;  %v1537_v58 = vpop.permute.xlu2 %1536  ;;  %v1554_v51 = vmul.f32 %v8085_v15, %v7984_v10  ;;  %v1944_v53 = vmul.f32 %v8091_v21, %v8014_v59  ;;  %v1612_v59 = vmul.f32 %v8085_v15, %v8034_v32 }
 0x251   : > { %1876 = vrot.lane.b32.xlu2 %v8058_v37, %s7375_s12 }
 0x252   : > { %v1478_v3 = vpop.f32.mrf.mxu2  ;;  %v1497_v50 = vpop.f32.mrf.mxu3 }
 0x253   : > { %v1498_v55 = vadd.f32 %v1497_v50, %v1478_v3 }
 0x255   : > { %2151 = vmatpush.msra.mxu3 %v1498_v55 }
 0x257   : > { %2152 = vmatpush.msra.mxu3 %v1496_v56 }
 0x260   : > { %v1541_v60 = vpop.permute.xlu2 %1540 }
 0x26a   : > { %v8080_v45 = vpop.permute.xlu2 %1526  ;;  %v1521_v46 = vpop.permute.xlu0 %1520 }
 0x26b   : > { %v1549_v47 = vsel %vm1548_vm13, %v1521_v46, %v1537_v58 }
 0x26c   : > { %v1557_v25 = vmul.f32 %v1549_v47, %v8082_v13  ;;  %v1611_v47 = vmul.f32 %v8091_v21, %v8026_v6  ;;  %v1889_v6 = vmul.f32 %v8085_v15, %v8042_v57 }
 0x26e   : > { %v1561_v33 = vadd.f32 %v1557_v25, %v1553_v5 }
 0x270   : > { %v1565_v42 = vmul.f32 0.088388346, %v1561_v33 }
 0x271   : > { %v1857_v1 = vpop.permute.xlu1 %1856 }
 0x272   : > { %v1594_v62 = vpop.permute.xlu2 %1593  ;;  %v1873_v63 = vpop.permute.xlu0 %1872 }
 0x273   : > { %v1884_v0 = vsel %vm1548_vm13, %v1857_v1, %v1873_v63  ;;  %v1888_v63 = vmul.f32 %v8091_v21, %v7978_v24 }
 0x274   : > { %v1892_v46 = vmul.f32 %v1884_v0, %v8082_v13 }
 0x279   : > { %v1523_v36 = vpop.permute.xlu1 %1522 }
 0x27a   : > { %v1913_v31 = vpop.permute.xlu2 %1912  ;;  %v1539_v7 = vpop.permute.xlu0 %1538 }
 0x27b   : > { %v1550_v38 = vsel %vm1548_vm13, %v1523_v36, %v1539_v7 }
 0x27c   : > { %v1558_v29 = vmul.f32 %v1550_v38, %v8087_v16 }
 0x27e   : > { %v1562_v3 = vadd.f32 %v1558_v29, %v1554_v51 }
 0x280   : > { %v1566_v10 = vmul.f32 0.088388346, %v1562_v3 }
 0x282   : > { %v1580_v8 = vpop.permute.xlu2 %1579  ;;  %v1525_v11 = vpop.permute.xlu0 %1524 }
 0x283   : > { %v1551_v56 = vsel %vm1548_vm13, %v1525_v11, %v1541_v60  ;;  %v1555_v11 = vmul.f32 %v8091_v21, %v7986_v40 }
 0x284   : > { %v1559_v1 = vmul.f32 %v1551_v56, %v8082_v13 }
 0x286   : > { %v1563_v32 = vadd.f32 %v1559_v1, %v1555_v11 }
 0x28a   : > { %v1578_v12 = vpop.permute.xlu1 %1577  ;;  %v1931_v17 = vpop.permute.xlu2 %1930 }
 0x28b   : > { %v1605_v9 = vsel %vm1548_vm13, %v1578_v12, %v1594_v62  ;;  %v1896_v12 = vadd.f32 %v1892_v46, %v1888_v63 }
 0x28c   : > { %v1613_v27 = vmul.f32 %v1605_v9, %v8082_v13 }
 0x28e   : > { %v1617_v28 = vadd.f32 %v1613_v27, %v1609_v30 }
 0x290   : > { %v1596_v48 = vpop.permute.xlu0 %1595 }
 0x291   : > { %v1606_v19 = vsel %vm1548_vm13, %v1580_v8, %v1596_v48 }
 0x292   : > { %v1614_v23 = vmul.f32 %v1606_v19, %v8087_v16  ;;  %v1929_v2 = vpop.permute.xlu1 %1928  ;;  %v1584_v52 = vpop.permute.xlu2 %1583  ;;  %v1900_v19 = vmul.f32 0.088388346, %v1896_v12 }
 0x293   : > { %v1940_v39 = vsel %vm1548_vm13, %v1913_v31, %v1929_v2  ;;  %v1567_v2 = vmul.f32 0.088388346, %v1563_v32 }
 0x294   : > { %v1618_v35 = vadd.f32 %v1614_v23, %v1610_v22  ;;  %v1948_v44 = vmul.f32 %v1940_v39, %v8082_v13 }
 0x296   : > { %1635 = vmatpush.xpose.msrb.mxu0 %v1618_v35  ;;  %v1952_v55 = vadd.f32 %v1948_v44, %v1944_v53  ;;  %v1556_v35 = vmul.f32 %v8085_v15, %v7998_v43 }
 0x299   : > { %v1915_v61 = vpop.permute.xlu0 %1914 }
 0x29a   : > { %v1941_v34 = vsel %vm1548_vm13, %v1915_v61, %v1931_v17  ;;  %v1582_v14 = vpop.permute.xlu1 %1581  ;;  %1636 = vmatpush.xpose.msrb.mxu0 %v1617_v28  ;;  %v1947_v28 = vmul.f32 %v8085_v15, %v8050_v20  ;;  %v1946_v20 = vmul.f32 %v8091_v21, %v8062_v4  ;;  %v1505_v4 = vlaneseq }
 0x29b   : > { %v1949_v54 = vmul.f32 %v1941_v34, %v8087_v16  ;;  %v1875_v60 = vpop.permute.xlu2 %1874 }
 0x29d   : > { %v1953_v49 = vadd.f32 %v1949_v54, %v1945_v18  ;;  %1637 = vmatmul.f32.vlgmr.msrb.gmra.mxu0 %v1565_v42  ;;  %v1890_v42 = vmul.f32 %v8091_v21, %v8058_v37  ;;  %v1506_v21 = vshrl.u32 %v1505_v4, 7 }
 0x29f   : > { %1970 = vmatpush.xpose.msra.mxu0 %v1953_v49 }
 0x2a1   : > { %v1598_v50 = vpop.permute.xlu0 %1597 }
 0x2a2   : > { %v1600_v58 = vpop.permute.xlu1 %1599  ;;  %v1607_v62 = vsel %vm1548_vm13, %v1582_v14, %v1598_v50  ;;  %v1891_v50 = vmul.f32 %v8085_v15, %v8072_v41 }
 0x2a3   : > { %v1608_v31 = vsel %vm1548_vm13, %v1584_v52, %v1600_v58  ;;  %1971 = vmatpush.xpose.msra.mxu0 %v1952_v55  ;;  %v1615_v36 = vmul.f32 %v1607_v62, %v8082_v13  ;;  %v1917_v25 = vpop.permute.xlu2 %1916 }
 0x2a4   : > { %v1616_v7 = vmul.f32 %v1608_v31, %v8087_v16  ;;  %v1507_v31 = vadd.s32 8, %v1506_v21 }
 0x2a5   : > { %1640 = vmatmul.f32.gmra.mxu0 %v1566_v10  ;;  %v1619_v17 = vadd.f32 %v1615_v36, %v1611_v47 }
 0x2a6   : > { %v1620_v8 = vadd.f32 %v1616_v7, %v1612_v59 }
 0x2a8   : > { %1658 = vmatpush.xpose.msrb.mxu1 %v1620_v8 }
 0x2a9   : > { %v1859_v48 = vpop.permute.xlu0 %1858 }
 0x2aa   : > { %v1885_v9 = vsel %vm1548_vm13, %v1859_v48, %v1875_v60  ;;  %v1543_v24 = vpop.permute.xlu1 %1542 }
 0x2ab   : > { %v1893_v22 = vmul.f32 %v1885_v9, %v8087_v16  ;;  %v1552_v23 = vsel %vm1548_vm13, %v8080_v45, %v1543_v24  ;;  %v1877_v34 = vpop.permute.xlu2 %1876 }
 0x2ac   : > { %1659 = vmatpush.xpose.msrb.mxu1 %v1619_v17  ;;  %v1560_v40 = vmul.f32 %v1552_v23, %v8087_v16 }
 0x2ad   : > { %1972 = vmatmul.f32.vlgmr.msra.gmra.mxu0 %v1900_v19  ;;  %v1897_v27 = vadd.f32 %v1893_v22, %v1889_v6 }
 0x2ae   : > { %v1564_v30 = vadd.f32 %v1560_v40, %v1556_v35 }
 0x2af   : > { %1660 = vmatmul.f32.vlgmr.msrb.gmra.mxu1 %v1567_v2  ;;  %v1901_v45 = vmul.f32 0.088388346, %v1897_v27 }
 0x2b0   : > { %v1568_v39 = vmul.f32 0.088388346, %v1564_v30 }
 0x2b1   : > { %v1935_v5 = vpop.permute.xlu0 %1934 }
 0x2b2   : > { %v1919_v33 = vpop.permute.xlu1 %1918 }
 0x2b3   : > { %v1943_v38 = vsel %vm1548_vm13, %v1919_v33, %v1935_v5 }
 0x2b4   : > { %v1951_v61 = vmul.f32 %v1943_v38, %v8087_v16 }
 0x2b5   : > { %1975 = vmatmul.f32.gmra.mxu0 %v1901_v45 }
 0x2b6   : > { %v1955_v57 = vadd.f32 %v1951_v61, %v1947_v28 }
 0x2b7   : > { %1663 = vmatmul.f32.gmra.mxu1 %v1568_v39 }
 0x2b8   : > { %1993 = vmatpush.xpose.msra.mxu1 %v1955_v57 }
 0x2b9   : > { %v1861_v14 = vpop.permute.xlu0 %1860 }
 0x2ba   : > { %v1886_v43 = vsel %vm1548_vm13, %v1861_v14, %v1877_v34  ;;  %v1933_v18 = vpop.permute.xlu1 %1932 }
 0x2bb   : > { %v1894_v29 = vmul.f32 %v1886_v43, %v8082_v13  ;;  %v1942_v52 = vsel %vm1548_vm13, %v1917_v25, %v1933_v18 }
 0x2bc   : > { %v1950_v54 = vmul.f32 %v1942_v52, %v8082_v13  ;;  %v1509_v13 = vand.u32 127, %v1505_v4 }
 0x2bd   : > { %v1898_v44 = vadd.f32 %v1894_v29, %v1890_v42 }
 0x2be   : > { %v1954_v49 = vadd.f32 %v1950_v54, %v1946_v20  ;;  %vm1510_vm14 = vcmp.ge.s32.totalorder %v1506_v21, %v1509_v13  ;;  %vm1511_vm0 = vcmp.ge.s32.totalorder %v1507_v31, %v1509_v13 }
 0x2bf   : > { %v1902_v51 = vmul.f32 0.088388346, %v1898_v44 }
 0x2c0   : > { %1994 = vmatpush.xpose.msra.mxu1 %v1954_v49 }
 0x2c1   : > { %v1879_v53 = vpop.permute.xlu0 %1878 }
 0x2c2   : > { %v1863_v3 = vpop.permute.xlu1 %1862 }
 0x2c3   : > { %v1887_v0 = vsel %vm1548_vm13, %v1863_v3, %v1879_v53  ;;  %1995 = vmatmul.f32.vlgmr.msra.gmra.mxu1 %v1902_v51 }
 0x2c4   : > { %v1895_v37 = vmul.f32 %v1887_v0, %v8087_v16 }
 0x2c6   : > { %v1899_v55 = vadd.f32 %v1895_v37, %v1891_v50 }
 0x2c8   : > { %v1903_v56 = vmul.f32 0.088388346, %v1899_v55 }
 0x2cb   : > { %1998 = vmatmul.f32.gmra.mxu1 %v1903_v56 }
 0x31a   : > { %v1638_v58 = vpop.f32.mrf.mxu0 }
 0x31b   : > { %v1671_v46 = vsel %vm1510_vm14, %v1638_v58, -1e+30 }
 0x31c   : > { %v1676_v62 = vsel %vm1675_vm15, %v1671_v46, -inf }
 0x31d   : > { %1677 = vmax.xlane.f32.xlu2 %v1676_v62 }
 0x322   : > { %v1641_v16 = vpop.f32.mrf.mxu0 }
 0x323   : > { %v1672_v10 = vsel %vm1511_vm0, %v1641_v16, -1e+30 }
 0x324   : > { %v1679_v41 = vsel %vm1675_vm15, %v1672_v10, -inf }
 0x325   : > { %1680 = vmax.xlane.f32.xlu1 %v1679_v41 }
 0x32a   : > { %v1973_v15 = vpop.f32.mrf.mxu0 }
 0x32b   : > { %v2002_v59 = vsel %vm1510_vm14, %v1973_v15, -1e+30 }
 0x32c   : > { %v1661_v7 = vpop.f32.mrf.mxu1  ;;  %v2006_v63 = vsel %vm1675_vm15, %v2002_v59, -inf }
 0x32d   : > { %v1673_v1 = vsel %vm1510_vm14, %v1661_v7, -1e+30  ;;  %2007 = vmax.xlane.f32.xlu2 %v2006_v63 }
 0x32e   : > { %v1682_v60 = vsel %vm1675_vm15, %v1673_v1, -inf }
 0x32f   : > { %1683 = vmax.xlane.f32.xlu0 %v1682_v60 }
 0x332   : > { %v1976_v36 = vpop.f32.mrf.mxu0 }
 0x333   : > { %v2003_v8 = vsel %vm1511_vm0, %v1976_v36, -1e+30 }
 0x334   : > { %v1664_v11 = vpop.f32.mrf.mxu1  ;;  %v2009_v32 = vsel %vm1675_vm15, %v2003_v8, -inf }
 0x335   : > { %v1674_v12 = vsel %vm1511_vm0, %v1664_v11, -1e+30 }
 0x336   : > { %v1685_v47 = vsel %vm1675_vm15, %v1674_v12, -inf }
 0x337   : > { %1686 = vmax.xlane.f32.xlu1 %v1685_v47  ;;  %2010 = vmax.xlane.f32.xlu0 %v2009_v32 }
 0x340   : > { %v1996_v48 = vpop.f32.mrf.mxu1 }
 0x341   : > { %v2004_v9 = vsel %vm1510_vm14, %v1996_v48, -1e+30 }
 0x342   : > { %v2012_v24 = vsel %vm1675_vm15, %v2004_v9, -inf }
 0x343   : > { %2013 = vmax.xlane.f32.xlu2 %v2012_v24 }
 0x348   : > { %v1999_v17 = vpop.f32.mrf.mxu1 }
 0x349   : > { %v2005_v19 = vsel %vm1511_vm0, %v1999_v17, -1e+30 }
 0x34a   : > { %v2015_v22 = vsel %vm1675_vm15, %v2005_v19, -inf }
 0x34b   : > { %2016 = vmax.xlane.f32.xlu1 %v2015_v22 }
 0x390   : > { %v1678_v23 = vpop.xlane.xlu2 %1677 }
 0x391   : > { %v1688_v2 = vsub.f32 %v1671_v46, %v1678_v23 }
 0x393   : > { %v1692_v40 = vmul.f32 1.442695, %v1688_v2 }
 0x395   : > { %6941 = vpow2.f32 %v1692_v40 }
 0x398   : > { %v1681_v6 = vpop.xlane.xlu1 %1680 }
 0x399   : > { %v1689_v25 = vsub.f32 %v1672_v10, %v1681_v6 }
 0x39b   : > { %v8171_v27 = vpop.eup %6941  ;;  %v1694_v35 = vmul.f32 1.442695, %v1689_v25 }
 0x39c   : > { %v1700_v5 = vsel %vm1675_vm15, %v8171_v27, 0.0 }
 0x39d   : > { %6943 = vpow2.f32 %v1694_v35  ;;  %1701 = vadd.xlane.f32.xlu0 %v1700_v5 }
 0x3a0   : > { %v2008_v30 = vpop.xlane.xlu2 %2007 }
 0x3a1   : > { %v2018_v33 = vsub.f32 %v2002_v59, %v2008_v30 }
 0x3a2   : > { %v1684_v38 = vpop.xlane.xlu0 %1683 }
 0x3a3   : > { %v8175_v45 = vpop.eup %6943  ;;  %v2022_v28 = vmul.f32 1.442695, %v2018_v33  ;;  %v1690_v61 = vsub.f32 %v1673_v1, %v1684_v38 }
 0x3a4   : > { %v1703_v39 = vsel %vm1675_vm15, %v8175_v45, 0.0 }
 0x3a5   : > { %6945 = vpow2.f32 %v2022_v28  ;;  %v1696_v57 = vmul.f32 1.442695, %v1690_v61  ;;  %1704 = vadd.xlane.f32.xlu2 %v1703_v39 }
 0x3a7   : > { %6947 = vpow2.f32 %v1696_v57 }
 0x3aa   : > { %v1687_v34 = vpop.xlane.xlu1 %1686  ;;  %v2011_v14 = vpop.xlane.xlu0 %2010 }
 0x3ab   : > { %v8179_v43 = vpop.eup %6945  ;;  %v1691_v18 = vsub.f32 %v1674_v12, %v1687_v34  ;;  %v2019_v42 = vsub.f32 %v2003_v8, %v2011_v14 }
 0x3ac   : > { %v2030_v29 = vsel %vm1675_vm15, %v8179_v43, 0.0 }
 0x3ad   : > { %v8183_v52 = vpop.eup %6947  ;;  %v1698_v20 = vmul.f32 1.442695, %v1691_v18  ;;  %v2024_v54 = vmul.f32 1.442695, %v2019_v42  ;;  %2031 = vadd.xlane.f32.xlu0 %v2030_v29 }
 0x3ae   : > { %v1706_v44 = vsel %vm1675_vm15, %v8183_v52, 0.0 }
 0x3af   : > { %6949 = vpow2.f32 %v1698_v20  ;;  %1707 = vadd.xlane.f32.xlu1 %v1706_v44 }
 0x3b0   : > { %6951 = vpow2.f32 %v2024_v54 }
 0x3b5   : > { %v8187_v49 = vpop.eup %6949 }
 0x3b6   : > { %v8189_v51 = vpop.eup %6951  ;;  %v2014_v53 = vpop.xlane.xlu2 %2013  ;;  %v1709_v3 = vsel %vm1675_vm15, %v8187_v49, 0.0 }
 0x3b7   : > { %v2020_v0 = vsub.f32 %v2004_v9, %v2014_v53  ;;  %1710 = vadd.xlane.f32.xlu2 %v1709_v3  ;;  %v2033_v37 = vsel %vm1675_vm15, %v8189_v51, 0.0 }
 0x3b8   : > { %2034 = vadd.xlane.f32.xlu1 %v2033_v37 }
 0x3b9   : > { %v2026_v50 = vmul.f32 1.442695, %v2020_v0 }
 0x3bb   : > { %6953 = vpow2.f32 %v2026_v50  ;;  %v5709_v50 = vld [vmem:[%s7588_s8 + $0x70] sm:$0xf] }
 0x3be   : > { %v2017_v55 = vpop.xlane.xlu1 %2016 }
 0x3bf   : > { %v2021_v56 = vsub.f32 %v2005_v19, %v2017_v55  ;;  %v6603_v55 = vld [vmem:[%s7588_s8 + $0x74] sm:$0xf0] }
 0x3c1   : > { %v8195_v4 = vpop.eup %6953  ;;  %v2028_v21 = vmul.f32 1.442695, %v2021_v56  ;;  %v6602_v56 = vld [vmem:[%s7588_s8 + $0x74] sm:$0xf] }
 0x3c2   : > { %v2036_v13 = vsel %vm1675_vm15, %v8195_v4, 0.0 }
 0x3c3   : > { %6955 = vpow2.f32 %v2028_v21  ;;  %2037 = vadd.xlane.f32.xlu0 %v2036_v13 }
 0x3c9   : > { %v8199_v58 = vpop.eup %6955 }
 0x3ca   : > { %v2039_v46 = vsel %vm1675_vm15, %v8199_v58, 0.0 }
 0x3cb   : > { %2040 = vadd.xlane.f32.xlu2 %v2039_v46  ;;  %v5710_v46 = vor.u32 %v6603_v55, %v5709_v50 }
 0x410   : > { %v1702_v62 = vpop.xlane.xlu0 %1701 }
 0x411   : > { %6957 = vrcp.f32 %v1702_v62  ;;  %v1723_v15 = vand.u32 2147483648, %v1702_v62  ;;  %v1721_v7 = vand.u32 2147483647, %v1702_v62  ;;  %vm1717_vm2 = vweird.f32 %v1702_v62 }
 0x413   : > { %v1724_v60 = vor.u32 1.1754944e-38, %v1723_v15  ;;  %vm1722_vm4 = vcmp.eq.f32.partialorder %v1721_v7, 8.507059e+37  ;;  %v6601_v15 = vld [vmem:[%s7588_s8 + $0x64] sm:$0xf0] }
 0x417   : > { %v6958_v31 = vpop.eup %6957 }
 0x418   : > { %v1713_v16 = vmul.f32 %v6958_v31, %v1702_v62  ;;  %v1705_v10 = vpop.xlane.xlu2 %1704  ;;  %vm1718_vm1 = vweird.f32 %v6958_v31  ;;  %v5711_v62 = vld [vmem:[%s7588_s8 + $0x78] sm:$0xf0] }
 0x419   : > { %6959 = vrcp.f32 %v1705_v10  ;;  %vm1719_vm3 = vmor %vm1717_vm2, %vm1718_vm1  ;;  %v1738_v9 = vand.u32 2147483648, %v1705_v10  ;;  %v1736_v17 = vand.u32 2147483647, %v1705_v10  ;;  %vm1732_vm6 = vweird.f32 %v1705_v10 }
 0x41a   : > { %v1714_v41 = vsub.f32 1.0, %v1713_v16 }
 0x41b   : > { %v1739_v23 = vor.u32 1.1754944e-38, %v1738_v9  ;;  %vm1737_vm8 = vcmp.eq.f32.partialorder %v1736_v17, 8.507059e+37  ;;  %v5695_v17 = vld [vmem:[%s7588_s8 + $0x58] sm:$0xf0] }
 0x41c   : > { %v1715_v59 = vmul.f32 %v6958_v31, %v1714_v41 }
 0x41e   : > { %v1716_v63 = vadd.f32 %v6958_v31, %v1715_v59  ;;  %v6600_v59 = vld [vmem:[%s7588_s8 + $0x64] sm:$0xf] }
 0x41f   : > { %v6960_v1 = vpop.eup %6959 }
 0x420   : > { %v1720_v36 = vsel %vm1719_vm3, %v6958_v31, %v1716_v63  ;;  %v1728_v8 = vmul.f32 %v6960_v1, %v1705_v10  ;;  %v2032_v11 = vpop.xlane.xlu0 %2031  ;;  %vm1733_vm5 = vweird.f32 %v6960_v1  ;;  %v5701_v31 = vld [vmem:[%s7588_s8 + $0x60] sm:$0xf] }
 0x421   : > { %v1725_v12 = vsel %vm1722_vm4, %v1724_v60, %v1720_v36  ;;  %6961 = vrcp.f32 %v2032_v11  ;;  %vm1734_vm7 = vmor %vm1732_vm6, %vm1733_vm5  ;;  %v2051_v33 = vand.u32 2147483647, %v2032_v11  ;;  %v2053_v38 = vand.u32 2147483648, %v2032_v11  ;;  %v5703_v36 = vld [vmem:[%s7588_s8 + $0x68] sm:$0xf0] }
 0x422   : > { %v1729_v47 = vsub.f32 1.0, %v1728_v8  ;;  %v1708_v32 = vpop.xlane.xlu1 %1707  ;;  %v1726_v48 = vmul.f32 %v8171_v27, %v1725_v12  ;;  %vm2047_vm10 = vweird.f32 %v2032_v11  ;;  %v5702_v60 = vor.u32 %v6601_v15, %v5701_v31  ;;  %v5693_v12 = vld [vmem:[%s7588_s8 + $0x50] sm:$0xf] }
 0x423   : > { %6963 = vrcp.f32 %v1708_v32  ;;  %v1751_v57 = vand.u32 2147483647, %v1708_v32  ;;  %v1753_v34 = vand.u32 2147483648, %v1708_v32  ;;  %vm2052_vm13 = vcmp.eq.f32.partialorder %v2051_v33, 8.507059e+37  ;;  %v6619_v33 = vld [vmem:[%s7588_s8 + $0xf4] sm:$0xf0] }
 0x424   : > { %v1730_v24 = vmul.f32 %v6960_v1, %v1729_v47  ;;  %5579 = vmatmul.msk.f32.vlgmr.msrb.gmra.mxu2 %vm1675_vm15, %v1726_v48  ;;  %vm1747_vm14 = vweird.f32 %v1708_v32  ;;  %v6599_v47 = vld [vmem:[%s7588_s8 + $0x54] sm:$0xf0]  ;;  %v5706_v48 = vor.u32 %v6600_v59, %v5703_v36 }
 0x425   : > { %vm1752_vm1 = vcmp.eq.f32.partialorder %v1751_v57, 8.507059e+37  ;;  %v1754_v44 = vor.u32 1.1754944e-38, %v1753_v34  ;;  %2376 = vmatpush.bf16.msrb.mxu2 %v5710_v46  ;;  %v5687_v57 = vld [vmem:[%s7588_s8 + $0x48] sm:$0xf0] }
 0x426   : > { %v1731_v19 = vadd.f32 %v6960_v1, %v1730_v24  ;;  %v6598_v24 = vld [vmem:[%s7588_s8 + $0x54] sm:$0xf] }
 0x427   : > { %v6962_v22 = vpop.eup %6961 }
 0x428   : > { %v2043_v2 = vmul.f32 %v6962_v22, %v2032_v11  ;;  %v1735_v40 = vsel %vm1734_vm7, %v6960_v1, %v1731_v19  ;;  %vm2048_vm9 = vweird.f32 %v6962_v22 }
 0x429   : > { %v6964_v6 = vpop.eup %6963  ;;  %v1740_v25 = vsel %vm1737_vm8, %v1739_v23, %v1735_v40  ;;  %vm2049_vm12 = vmor %vm2047_vm10, %vm2048_vm9  ;;  %2377 = vmatpush.bf16.msrb.mxu2 %v5702_v60  ;;  %v5694_v23 = vor.u32 %v6599_v47, %v5693_v12  ;;  %v5671_v47 = vld [vmem:[%s7588_s8 + $0x28] sm:$0xf0] }
 0x42a   : > { %v2044_v35 = vsub.f32 1.0, %v2043_v2  ;;  %v1743_v5 = vmul.f32 %v6964_v6, %v1708_v32  ;;  %v8205_v27 = vpop.xlane.xlu2 %1710  ;;  %v1741_v30 = vmul.f32 %v8175_v45, %v1740_v25  ;;  %vm1748_vm11 = vweird.f32 %v6964_v6  ;;  %v6597_v25 = vld [vmem:[%s7588_s8 + $0x44] sm:$0xf0] }
 0x42b   : > { %6965 = vrcp.f32 %v8205_v27  ;;  %v8209_v28 = vpop.xlane.xlu1 %2034  ;;  %v2054_v45 = vor.u32 1.1754944e-38, %v2053_v38  ;;  %vm1749_vm0 = vmor %vm1747_vm14, %vm1748_vm11  ;;  %v1768_v10 = vand.u32 2147483648, %v8205_v27  ;;  %v1766_v1 = vand.u32 2147483647, %v8205_v27  ;;  %v6618_v38 = vld [vmem:[%s7588_s8 + $0xf4] sm:$0xf] }
 0x42c   : > { %v2045_v61 = vmul.f32 %v6962_v22, %v2044_v35  ;;  %v1744_v39 = vsub.f32 1.0, %v1743_v5  ;;  %6967 = vrcp.f32 %v8209_v28  ;;  %5580 = vmatmul.msk.f32.gmra.mxu2 %vm1675_vm15, %v1741_v30  ;;  %v2068_v63 = vand.u32 2147483648, %v8209_v28  ;;  %v5645_v30 = vld [vmem:[%s7588_s8 + $0xf0] sm:$0xf] }
 0x42d   : > { %vm1762_vm4 = vweird.f32 %v8205_v27  ;;  %vm2062_vm5 = vweird.f32 %v8209_v28  ;;  %v1769_v19 = vor.u32 1.1754944e-38, %v1768_v10  ;;  %vm1767_vm7 = vcmp.eq.f32.partialorder %v1766_v1, 8.507059e+37  ;;  %2378 = vmatpush.bf16.msrb.mxu2 %v5694_v23  ;;  %v6591_v23 = vld [vmem:[%s7588_s8 + $0x14] sm:$0xf0] }
 0x42e   : > { %v2046_v14 = vadd.f32 %v6962_v22, %v2045_v61  ;;  %v1745_v18 = vmul.f32 %v6964_v6, %v1744_v39  ;;  %v2069_v2 = vor.u32 1.1754944e-38, %v2068_v63  ;;  %v6596_v39 = vld [vmem:[%s7588_s8 + $0x44] sm:$0xf]  ;;  %v5646_v34 = vor.u32 %v6619_v33, %v5645_v30  ;;  %v5631_v33 = vld [vmem:[%s7588_s8 + $0xd8] sm:$0xf0] }
 0x430   : > { %v2050_v42 = vsel %vm2049_vm12, %v6962_v22, %v2046_v14  ;;  %v1746_v29 = vadd.f32 %v6964_v6, %v1745_v18  ;;  %v5647_v14 = vld [vmem:[%s7588_s8 + $0xf8] sm:$0xf0]  ;;  %2258 = vmatpush.bf16.msrb.mxu0 %v5646_v34  ;;  %v5655_v34 = vld [vmem:[%s7588_s8 + $0x8] sm:$0xf0] }
 0x431   : > { %v6966_v20 = vpop.eup %6965  ;;  %v2055_v54 = vsel %vm2052_vm13, %v2054_v45, %v2050_v42 }
 0x432   : > { %v8213_v53 = vpop.eup %6967  ;;  %v1750_v3 = vsel %vm1749_vm0, %v6964_v6, %v1746_v29  ;;  %v1758_v0 = vmul.f32 %v6966_v20, %v8205_v27  ;;  %v2056_v37 = vmul.f32 %v8179_v43, %v2055_v54  ;;  %v5714_v43 = vor.u32 %v6602_v56, %v5711_v62  ;;  %v5685_v6 = vld [vmem:[%s7588_s8 + $0x40] sm:$0xf] }
 0x433   : > { %v1755_v21 = vsel %vm1752_vm1, %v1754_v44, %v1750_v3  ;;  %v2058_v13 = vmul.f32 %v8213_v53, %v8209_v28  ;;  %vm1763_vm2 = vweird.f32 %v6966_v20  ;;  %vm2063_vm3 = vweird.f32 %v8213_v53  ;;  %v5677_v44 = vld [vmem:[%s7588_s8 + $0x30] sm:$0xf] }
 0x434   : > { %v1759_v16 = vsub.f32 1.0, %v1758_v0  ;;  %5583 = vmatmul.msk.f32.vlgmr.msra.gmra.mxu2 %vm1675_vm15, %v2056_v37  ;;  %v1756_v41 = vmul.f32 %v8183_v52, %v1755_v21  ;;  %v2066_v52 = vand.u32 2147483647, %v8209_v28  ;;  %vm1764_vm6 = vmor %vm1762_vm4, %vm1763_vm2  ;;  %v5698_v27 = vor.u32 %v6598_v24, %v5695_v17  ;;  %v6594_v0 = vld [vmem:[%s7588_s8 + $0x34] sm:$0xf] }
 0x435   : > { %v2059_v7 = vsub.f32 1.0, %v2058_v13  ;;  %vm2064_vm8 = vmor %vm2062_vm5, %vm2063_vm3  ;;  %v5686_v42 = vor.u32 %v6597_v25, %v5685_v6  ;;  %v5650_v29 = vor.u32 %v6618_v38, %v5647_v14  ;;  %v6616_v17 = vld [vmem:[%s7588_s8 + $0xe4] sm:$0xf] }
 0x436   : > { %v1760_v8 = vmul.f32 %v6966_v20, %v1759_v16  ;;  %5581 = vmatmul.msk.f32.vlgmr.msrb.gmra.mxu3 %vm1675_vm15, %v1756_v41  ;;  %v8233_v11 = vpop.xlane.xlu0 %2037  ;;  %vm2067_vm9 = vcmp.eq.f32.partialorder %v2066_v52, 8.507059e+37  ;;  %v6592_v52 = vld [vmem:[%s7588_s8 + $0x24] sm:$0xf] }
 0x437   : > { %v2060_v32 = vmul.f32 %v8213_v53, %v2059_v7  ;;  %6969 = vrcp.f32 %v8233_v11  ;;  %2395 = vmatpush.bf16.msrb.mxu3 %v5714_v43  ;;  %2277 = vmatpush.bf16.msrb.mxu1 %v5650_v29  ;;  %v2083_v37 = vand.u32 2147483648, %v8233_v11  ;;  %v2081_v56 = vand.u32 2147483647, %v8233_v11 }
 0x438   : > { %v1761_v9 = vadd.f32 %v6966_v20, %v1760_v8  ;;  %2379 = vmatpush.bf16.msrb.mxu2 %v5686_v42  ;;  %vm2077_vm11 = vweird.f32 %v8233_v11  ;;  %v5669_v8 = vld [vmem:[%s7588_s8 + $0x20] sm:$0xf]  ;;  %v6612_v42 = vld [vmem:[%s7588_s8 + $0xc4] sm:$0xf] }
 0x439   : > { %v2061_v22 = vadd.f32 %v8213_v53, %v2060_v32  ;;  %v2084_v62 = vor.u32 1.1754944e-38, %v2083_v37  ;;  %vm2082_vm13 = vcmp.eq.f32.partialorder %v2081_v56, 8.507059e+37  ;;  %v5637_v32 = vld [vmem:[%s7588_s8 + $0xe0] sm:$0xf] }
 0x43a   : > { %v1765_v40 = vsel %vm1764_vm6, %v6966_v20, %v1761_v9  ;;  %v5674_v9 = vor.u32 %v6592_v52, %v5671_v47  ;;  %v5605_v37 = vld [vmem:[%s7588_s8 + $0xa0] sm:$0xf] }
 0x43b   : > { %v1770_v35 = vsel %vm1767_vm7, %v1769_v19, %v1765_v40  ;;  %v2065_v5 = vsel %vm2064_vm8, %v8213_v53, %v2061_v22  ;;  %2396 = vmatpush.bf16.msrb.mxu3 %v5706_v48  ;;  %v5690_v53 = vor.u32 %v6596_v39, %v5687_v57  ;;  %v6617_v48 = vld [vmem:[%s7588_s8 + $0xe4] sm:$0xf0]  ;;  %v5639_v19 = vld [vmem:[%s7588_s8 + $0xe8] sm:$0xf0]  ;;  %v5663_v40 = vld [vmem:[%s7588_s8 + $0x18] sm:$0xf0] }
 0x43c   : > { %v1771_v28 = vmul.f32 %v8187_v49, %v1770_v35  ;;  %v2070_v61 = vsel %vm2067_vm9, %v2069_v2, %v2065_v5  ;;  %v6595_v49 = vld [vmem:[%s7588_s8 + $0x34] sm:$0xf0]  ;;  %v5638_v24 = vor.u32 %v6617_v48, %v5637_v32  ;;  %v5642_v22 = vor.u32 %v6616_v17, %v5639_v19  ;;  %v6590_v2 = vld [vmem:[%s7588_s8 + $0x14] sm:$0xf]  ;;  %v5629_v35 = vld [vmem:[%s7588_s8 + $0xd0] sm:$0xf] }
 0x43d   : > { %v6970_v18 = vpop.eup %6969  ;;  %v2071_v45 = vmul.f32 %v8189_v51, %v2070_v61  ;;  %v5679_v51 = vld [vmem:[%s7588_s8 + $0x38] sm:$0xf0]  ;;  %v5678_v50 = vor.u32 %v6595_v49, %v5677_v44  ;;  %v5666_v25 = vor.u32 %v6590_v2, %v5663_v40  ;;  %v6615_v5 = vld [vmem:[%s7588_s8 + $0xd4] sm:$0xf0]  ;;  %v6589_v61 = vld [vmem:[%s7588_s8 + $0x4] sm:$0xf0] }
 0x43e   : > { %v2073_v20 = vmul.f32 %v6970_v18, %v8233_v11  ;;  %v2041_v54 = vpop.xlane.xlu2 %2040  ;;  %5582 = vmatmul.msk.f32.gmra.mxu3 %vm1675_vm15, %v1771_v28  ;;  %vm2078_vm10 = vweird.f32 %v6970_v18  ;;  %v5682_v21 = vor.u32 %v6594_v0, %v5679_v51  ;;  %v6593_v11 = vld [vmem:[%s7588_s8 + $0x24] sm:$0xf0]  ;;  %2259 = vmatpush.bf16.msrb.mxu0 %v5638_v24  ;;  %v5630_v30 = vor.u32 %v6615_v5, %v5629_v35  ;;  %v5653_v28 = vld [vmem:[%s7588_s8] sm:$0xf]  ;;  %v6588_v39 = vld [vmem:[%s7588_s8 + $0x4] sm:$0xf] }
 0x43f   : > { %6971 = vrcp.f32 %v2041_v54  ;;  %5584 = vmatmul.msk.f32.gmra.mxu2 %vm1675_vm15, %v2071_v45  ;;  %2397 = vmatpush.bf16.msrb.mxu3 %v5698_v27  ;;  %vm2079_vm12 = vmor %vm2077_vm11, %vm2078_vm10  ;;  %v2098_v15 = vand.u32 2147483648, %v2041_v54  ;;  %v2096_v7 = vand.u32 2147483647, %v2041_v54  ;;  %vm2092_vm0 = vweird.f32 %v2041_v54  ;;  %v6614_v27 = vld [vmem:[%s7588_s8 + $0xd4] sm:$0xf]  ;;  %v7045_v40 = vld [vmem:[#allocation2 + $0x30] sm:$0xff] }
 0x440   : > { %v2074_v3 = vsub.f32 1.0, %v2073_v20  ;;  %2380 = vmatpush.bf16.msrb.mxu2 %v5678_v50  ;;  %v5670_v12 = vor.u32 %v6593_v11, %v5669_v8  ;;  %2278 = vmatpush.bf16.msrb.mxu1 %v5642_v22  ;;  %v5634_v38 = vor.u32 %v6614_v27, %v5631_v33  ;;  %v5654_v57 = vor.u32 %v6589_v61, %v5653_v28  ;;  %v6613_v45 = vld [vmem:[%s7588_s8 + $0xc4] sm:$0xf0]  ;;  %v5623_v20 = vld [vmem:[%s7588_s8 + $0xc8] sm:$0xf0] }
 0x441   : > { %v2099_v1 = vor.u32 1.1754944e-38, %v2098_v15  ;;  %vm2097_vm2 = vcmp.eq.f32.partialorder %v2096_v7, 8.507059e+37  ;;  %v5658_v14 = vor.u32 %v6588_v39, %v5655_v34  ;;  %v5613_v44 = vld [vmem:[%s7588_s8 + $0xb0] sm:$0xf]  ;;  %v6611_v49 = vld [vmem:[%s7588_s8 + $0xb4] sm:$0xf0] }
 0x442   : > { %v2075_v55 = vmul.f32 %v6970_v18, %v2074_v3  ;;  %2260 = vmatpush.bf16.msrb.mxu0 %v5630_v30  ;;  %v5614_v3 = vor.u32 %v6611_v49, %v5613_v44  ;;  %v5615_v0 = vld [vmem:[%s7588_s8 + $0xb8] sm:$0xf0]  ;;  %v6609_v50 = vld [vmem:[%s7588_s8 + $0xa4] sm:$0xf0]  ;;  %v7048_v34 = vld [vmem:[#allocation2 + $0x10] sm:$0xff] }
 0x443   : > { %2398 = vmatpush.bf16.msrb.mxu3 %v5690_v53  ;;  %v6610_v53 = vld [vmem:[%s7588_s8 + $0xb4] sm:$0xf]  ;;  %v5606_v56 = vor.u32 %v6609_v50, %v5605_v37  ;;  %v6605_v15 = vld [vmem:[%s7588_s8 + $0x84] sm:$0xf0]  ;;  %v7049_v49 = vld [vmem:[#allocation2 + $0x8] sm:$0xff] }
 0x444   : > { %v2076_v13 = vadd.f32 %v6970_v18, %v2075_v55  ;;  %2381 = vmatpush.bf16.msrb.mxu2 %v5670_v12  ;;  %2279 = vmatpush.bf16.msrb.mxu1 %v5634_v38  ;;  %v5618_v51 = vor.u32 %v6610_v53, %v5615_v0  ;;  %v6608_v55 = vld [vmem:[%s7588_s8 + $0xa4] sm:$0xf]  ;;  %v7047_v39 = vld [vmem:[#allocation2 + $0x18] sm:$0xff] }
 0x445   : > { %v6972_v46 = vpop.eup %6971 }
 0x446   : > { %v2080_v31 = vsel %vm2079_vm12, %v6970_v18, %v2076_v13  ;;  %v2088_v16 = vmul.f32 %v6972_v46, %v2041_v54  ;;  %vm2093_vm14 = vweird.f32 %v6972_v46  ;;  %v5621_v18 = vld [vmem:[%s7588_s8 + $0xc0] sm:$0xf]  ;;  %v5626_v54 = vor.u32 %v6612_v42, %v5623_v20  ;;  %v5597_v13 = vld [vmem:[%s7588_s8 + $0x90] sm:$0xf] }
 0x447   : > { %v2085_v10 = vsel %vm2082_vm13, %v2084_v62, %v2080_v31  ;;  %2399 = vmatpush.bf16.msrb.mxu3 %v5682_v21  ;;  %vm2094_vm1 = vmor %vm2092_vm0, %vm2093_vm14  ;;  %v5622_v29 = vor.u32 %v6613_v45, %v5621_v18  ;;  %v5607_v21 = vld [vmem:[%s7588_s8 + $0xa8] sm:$0xf0]  ;;  %v6606_v31 = vld [vmem:[%s7588_s8 + $0x94] sm:$0xf] }
 0x448   : > { %v2089_v41 = vsub.f32 1.0, %v2088_v16  ;;  %v2086_v43 = vmul.f32 %v8195_v4, %v2085_v10  ;;  %2280 = vmatpush.bf16.msrb.mxu1 %v5626_v54  ;;  %v5610_v62 = vor.u32 %v6608_v55, %v5607_v21  ;;  %v5599_v16 = vld [vmem:[%s7588_s8 + $0x98] sm:$0xf0] }
 0x449   : > { %2261 = vmatpush.bf16.msrb.mxu0 %v5622_v29 }
 0x44a   : > { %v2090_v59 = vmul.f32 %v6972_v46, %v2089_v41  ;;  %5585 = vmatmul.msk.f32.vlgmr.msra.gmra.mxu3 %vm1675_vm15, %v2086_v43  ;;  %v5602_v41 = vor.u32 %v6606_v31, %v5599_v16  ;;  %v5589_v43 = vld [vmem:[%s7588_s8 + $0x80] sm:$0xf]  ;;  %v7052_v31 = vld [vmem:[#allocation2 + $0x38] sm:$0xff] }
 0x44b   : > { %2400 = vmatpush.bf16.msrb.mxu3 %v5674_v9  ;;  %v5590_v7 = vor.u32 %v6605_v15, %v5589_v43 }
 0x44c   : > { %v2091_v63 = vadd.f32 %v6972_v46, %v2090_v59  ;;  %2281 = vmatpush.bf16.msrb.mxu1 %v5618_v51  ;;  %v6604_v59 = vld [vmem:[%s7588_s8 + $0x84] sm:$0xf] }
 0x44d   : > { %2262 = vmatpush.bf16.msrb.mxu0 %v5614_v3  ;;  %v7050_v3 = vld [vmem:[#allocation2 + $0x20] sm:$0xff] }
 0x44e   : > { %v2095_v60 = vsel %vm2094_vm1, %v6972_v46, %v2091_v63  ;;  %v6607_v46 = vld [vmem:[%s7588_s8 + $0x94] sm:$0xf0]  ;;  %v5591_v63 = vld [vmem:[%s7588_s8 + $0x88] sm:$0xf0] }
 0x44f   : > { %v2100_v4 = vsel %vm2097_vm2, %v2099_v1, %v2095_v60  ;;  %2401 = vmatpush.bf16.msrb.mxu3 %v5666_v25  ;;  %v5598_v10 = vor.u32 %v6607_v46, %v5597_v13  ;;  %v5594_v1 = vor.u32 %v6604_v59, %v5591_v63  ;;  %v7046_v25 = vld [vmem:[#allocation2] sm:$0xff]  ;;  %v7051_v46 = vld [vmem:[#allocation2 + $0x28] sm:$0xff] }
 0x450   : > { %v2101_v36 = vmul.f32 %v8199_v58, %v2100_v4  ;;  %v5661_v58 = vld [vmem:[%s7588_s8 + $0x10] sm:$0xf]  ;;  %2282 = vmatpush.bf16.msrb.mxu1 %v5610_v62 }
 0x451   : > { %v5662_v6 = vor.u32 %v6591_v23, %v5661_v58  ;;  %2263 = vmatpush.bf16.msrb.mxu0 %v5606_v56 }
 0x452   : > { %5586 = vmatmul.msk.f32.gmra.mxu3 %vm1675_vm15, %v2101_v36 }
 0x453   : > { %2382 = vmatpush.bf16.msrb.mxu2 %v5662_v6  ;;  %2402 = vmatpush.bf16.msrb.mxu3 %v5658_v14 }
 0x454   : > { %2283 = vmatpush.bf16.msrb.mxu1 %v5602_v41 }
 0x455   : > { %2264 = vmatpush.bf16.msrb.mxu0 %v5598_v10 }
 0x457   : > { %2383 = vmatpush.bf16.msrb.mxu2 %v5654_v57 }
 0x458   : > { %2284 = vmatpush.bf16.msrb.mxu1 %v5594_v1 }
 0x459   : > { %2265 = vmatpush.bf16.msrb.mxu0 %v5590_v7 }
 0x4a7   : > { %v1795_v60 = vpop.f32.mrf.mxu2 }
 0x4af   : > { %v1798_v4 = vpop.f32.mrf.mxu2 }
 0x4b0   : > { %v1830_v36 = vpack.c.bf16 %v1798_v4, %v1795_v60 }
 0x4b2   : > { %2384 = vmatmul.bf16.vlgmr.msrb.gmra.mxu2 %v1830_v36  ;;  %2403 = vmatmul.bf16.vlgmr.msrb.gmra.mxu3 %v1830_v36 }
 0x4b7   : > { %v2125_v11 = vpop.f32.mrf.mxu2 }
 0x4b9   : > { %v1824_v8 = vpop.f32.mrf.mxu3 }
 0x4c1   : > { %v1827_v52 = vpop.f32.mrf.mxu3 }
 0x4c2   : > { %v2128_v12 = vpop.f32.mrf.mxu2  ;;  %v1831_v47 = vpack.c.bf16 %v1827_v52, %v1824_v8 }
 0x4c3   : > { %v2160_v32 = vpack.c.bf16 %v2128_v12, %v2125_v11 }
 0x4c4   : > { %2389 = vmatmul.bf16.gmra.mxu2 %v1831_v47  ;;  %2408 = vmatmul.bf16.gmra.mxu3 %v1831_v47 }
 0x4c5   : > { %2266 = vmatmul.bf16.vlgmr.msrb.gmra.mxu0 %v2160_v32  ;;  %2285 = vmatmul.bf16.vlgmr.msrb.gmra.mxu1 %v2160_v32 }
 0x4cd   : > { %v2154_v48 = vpop.f32.mrf.mxu3 }
 0x4d5   : > { %v2157_v9 = vpop.f32.mrf.mxu3 }
 0x4d6   : > { %v2161_v24 = vpack.c.bf16 %v2157_v9, %v2154_v48 }
 0x4d8   : > { %2271 = vmatmul.bf16.gmra.mxu0 %v2161_v24  ;;  %2290 = vmatmul.bf16.gmra.mxu1 %v2161_v24 }
 0x535   : > { %v2385_v17 = vpop.f32.mrf.mxu2  ;;  %v2404_v19 = vpop.f32.mrf.mxu3 }
 0x53d   : > { %v2387_v27 = vpop.f32.mrf.mxu2  ;;  %v2406_v30 = vpop.f32.mrf.mxu3 }
 0x542   : > { %v2267_v58 = vpop.f32.mrf.mxu0  ;;  %v2286_v22 = vpop.f32.mrf.mxu1 }
 0x543   : > { %v2386_v23 = vadd.f32 %v2385_v17, %v2267_v58  ;;  %v2405_v2 = vadd.f32 %v2404_v19, %v2286_v22 }
 0x545   : > { %v8314_v6 = vadd.f32 %v7045_v40, %v2386_v23  ;;  %v8316_v35 = vadd.f32 %v7046_v25, %v2405_v2 }
 0x547   : > { %9869 = vst [vmem:[#allocation22_spill] sm:$0xff] %v8314_v6  ;;  %v2422_v5 = vadd.f32 %v8316_v35, %v8314_v6  ;;  %v2390_v45 = vpop.f32.mrf.mxu2  ;;  %v2409_v42 = vpop.f32.mrf.mxu3 }
 0x548   : > { %9870 = vst [vmem:[#allocation23_spill] sm:$0xff] %v8316_v35 }
 0x549   : > { %2423 = vadd.xlane.f32.xlu1 %v2422_v5 }
 0x54a   : > { %v2269_v33 = vpop.f32.mrf.mxu0  ;;  %v2288_v38 = vpop.f32.mrf.mxu1 }
 0x54b   : > { %v2388_v28 = vadd.f32 %v2387_v27, %v2269_v33  ;;  %v2407_v61 = vadd.f32 %v2406_v30, %v2288_v38  ;;  %v5941_v27 = vld [vmem:[%s7590_s22 + $0x1c0] sm:$0xf] }
 0x54c   : > { %v6680_v30 = vld [vmem:[%s7590_s22 + $0x1dc] sm:$0xf0] }
 0x54d   : > { %v8320_v57 = vadd.f32 %v7047_v39, %v2388_v28  ;;  %v8322_v14 = vadd.f32 %v7048_v34, %v2407_v61  ;;  %v6197_v33 = vld [vmem:[%s7590_s22 + $0x3c0] sm:$0xf]  ;;  %v5942_v38 = vor.u32 %v6680_v30, %v5941_v27  ;;  %v6676_v61 = vld [vmem:[%s7590_s22 + $0x1c4] sm:$0xf] }
 0x54e   : > { %v6744_v28 = vld [vmem:[%s7590_s22 + $0x3dc] sm:$0xf0]  ;;  %v5943_v39 = vld [vmem:[%s7590_s22 + $0x1e0] sm:$0xf0] }
 0x54f   : > { %9871 = vst [vmem:[#allocation24_spill] sm:$0xff] %v8320_v57  ;;  %v2425_v18 = vadd.f32 %v8322_v14, %v8320_v57  ;;  %v2392_v37 = vpop.f32.mrf.mxu2  ;;  %v2411_v50 = vpop.f32.mrf.mxu3  ;;  %v6198_v34 = vor.u32 %v6744_v28, %v6197_v33  ;;  %3322 = vmatpush.bf16.msra.mxu0 %v5942_v38  ;;  %v5813_v30 = vld [vmem:[%s7590_s22 + $0xc0] sm:$0xf] }
 0x550   : > { %9872 = vst [vmem:[#allocation25_spill] sm:$0xff] %v8322_v14  ;;  %v6648_v33 = vld [vmem:[%s7590_s22 + $0xdc] sm:$0xf0] }
 0x551   : > { %2426 = vadd.xlane.f32.xlu0 %v2425_v18  ;;  %v5946_v18 = vor.u32 %v6676_v61, %v5943_v39  ;;  %3341 = vmatpush.bf16.msra.mxu1 %v6198_v34  ;;  %v6069_v38 = vld [vmem:[%s7590_s22 + $0x2c0] sm:$0xf]  ;;  %v5814_v28 = vor.u32 %v6648_v33, %v5813_v30  ;;  %v6644_v39 = vld [vmem:[%s7590_s22 + $0xc4] sm:$0xf] }
 0x552   : > { %v6712_v61 = vld [vmem:[%s7590_s22 + $0x2dc] sm:$0xf0]  ;;  %v5815_v34 = vld [vmem:[%s7590_s22 + $0xe0] sm:$0xf0] }
 0x553   : > { %3360 = vmatpush.bf16.msra.mxu2 %v5946_v18  ;;  %v6070_v18 = vor.u32 %v6712_v61, %v6069_v38  ;;  %v6684_v30 = vld [vmem:[%s7590_s22 + $0x204] sm:$0xf] }
 0x554   : > { %v5975_v33 = vld [vmem:[%s7590_s22 + $0x220] sm:$0xf0] }
 0x555   : > { %v2272_v29 = vpop.f32.mrf.mxu0  ;;  %v2291_v20 = vpop.f32.mrf.mxu1 }
 0x556   : > { %v2391_v54 = vadd.f32 %v2390_v45, %v2272_v29  ;;  %v2410_v44 = vadd.f32 %v2409_v42, %v2291_v20  ;;  %v6740_v45 = vld [vmem:[%s7590_s22 + $0x3c4] sm:$0xf]  ;;  %v5909_v20 = vld [vmem:[%s7590_s22 + $0x180] sm:$0xf] }
 0x557   : > { %v6199_v42 = vld [vmem:[%s7590_s22 + $0x3e0] sm:$0xf0] }
 0x558   : > { %v8326_v53 = vadd.f32 %v7049_v49, %v2391_v54  ;;  %v8328_v0 = vadd.f32 %v7050_v3, %v2410_v44  ;;  %v6202_v29 = vor.u32 %v6740_v45, %v6199_v42  ;;  %v6672_v54 = vld [vmem:[%s7590_s22 + $0x19c] sm:$0xf0]  ;;  %v5818_v45 = vor.u32 %v6644_v39, %v5815_v34  ;;  %v6708_v42 = vld [vmem:[%s7590_s22 + $0x2c4] sm:$0xf]  ;;  %v5949_v34 = vld [vmem:[%s7590_s22 + $0x1c8] sm:$0xf] }
 0x559   : > { %v6165_v44 = vld [vmem:[%s7590_s22 + $0x380] sm:$0xf]  ;;  %v5910_v49 = vor.u32 %v6672_v54, %v5909_v20 }
 0x55a   : > { %9873 = vst [vmem:[#allocation26_spill] sm:$0xff] %v8326_v53  ;;  %v2428_v51 = vadd.f32 %v8328_v0, %v8326_v53  ;;  %3379 = vmatpush.bf16.msra.mxu3 %v6202_v29  ;;  %v6736_v3 = vld [vmem:[%s7590_s22 + $0x39c] sm:$0xf0]  ;;  %v6071_v29 = vld [vmem:[%s7590_s22 + $0x2e0] sm:$0xf0] }
 0x55b   : > { %9874 = vst [vmem:[#allocation27_spill] sm:$0xff] %v8328_v0  ;;  %3323 = vmatpush.bf16.msra.mxu0 %v5910_v49  ;;  %v6074_v20 = vor.u32 %v6708_v42, %v6071_v29  ;;  %v5781_v54 = vld [vmem:[%s7590_s22 + $0x80] sm:$0xf] }
 0x55c   : > { %2429 = vadd.xlane.f32.xlu2 %v2428_v51  ;;  %v6668_v51 = vld [vmem:[%s7590_s22 + $0x184] sm:$0xf]  ;;  %v6037_v49 = vld [vmem:[%s7590_s22 + $0x280] sm:$0xf] }
 0x55d   : > { %v2274_v55 = vpop.f32.mrf.mxu0  ;;  %v2293_v56 = vpop.f32.mrf.mxu1 }
 0x55e   : > { %v2393_v21 = vadd.f32 %v2392_v37, %v2274_v55  ;;  %v2412_v13 = vadd.f32 %v2411_v50, %v2293_v56  ;;  %v5911_v37 = vld [vmem:[%s7590_s22 + $0x1a0] sm:$0xf0]  ;;  %v6166_v50 = vor.u32 %v6736_v3, %v6165_v44  ;;  %v6640_v44 = vld [vmem:[%s7590_s22 + $0x9c] sm:$0xf0] }
 0x55f   : > { %v5914_v55 = vor.u32 %v6668_v51, %v5911_v37  ;;  %v6732_v56 = vld [vmem:[%s7590_s22 + $0x384] sm:$0xf]  ;;  %v5782_v3 = vor.u32 %v6640_v44, %v5781_v54  ;;  %v6704_v51 = vld [vmem:[%s7590_s22 + $0x29c] sm:$0xf0]  ;;  %v6745_v54 = vld [vmem:[%s7590_s22 + $0x3e4] sm:$0xf0] }
 0x560   : > { %v8332_v62 = vadd.f32 %v7051_v46, %v2393_v21  ;;  %v8334_v16 = vadd.f32 %v7052_v31, %v2412_v13  ;;  %v6167_v21 = vld [vmem:[%s7590_s22 + $0x3a0] sm:$0xf0]  ;;  %3342 = vmatpush.bf16.msra.mxu1 %v6166_v50  ;;  %v5877_v46 = vld [vmem:[%s7590_s22 + $0x140] sm:$0xf]  ;;  %v6677_v44 = vld [vmem:[%s7590_s22 + $0x1cc] sm:$0xf] }
 0x561   : > { %v6170_v13 = vor.u32 %v6732_v56, %v6167_v21  ;;  %3361 = vmatpush.bf16.msra.mxu2 %v5914_v55  ;;  %v6664_v31 = vld [vmem:[%s7590_s22 + $0x15c] sm:$0xf0]  ;;  %v6636_v37 = vld [vmem:[%s7590_s22 + $0x84] sm:$0xf]  ;;  %v6038_v55 = vor.u32 %v6704_v51, %v6037_v49  ;;  %v5951_v51 = vld [vmem:[%s7590_s22 + $0x1e8] sm:$0xf0] }
 0x562   : > { %9875 = vst [vmem:[#allocation28_spill] sm:$0xff] %v8332_v62  ;;  %v2431_v10 = vadd.f32 %v8334_v16, %v8332_v62  ;;  %v5783_v50 = vld [vmem:[%s7590_s22 + $0xa0] sm:$0xf0] }
 0x563   : > { %9876 = vst [vmem:[#allocation29_spill] sm:$0xff] %v8334_v16  ;;  %3380 = vmatpush.bf16.msra.mxu3 %v6170_v13  ;;  %v5786_v56 = vor.u32 %v6636_v37, %v5783_v50  ;;  %v6700_v21 = vld [vmem:[%s7590_s22 + $0x284] sm:$0xf]  ;;  %v6741_v37 = vld [vmem:[%s7590_s22 + $0x3cc] sm:$0xf] }
 0x564   : > { %2432 = vadd.xlane.f32.xlu1 %v2431_v10  ;;  %v6133_v10 = vld [vmem:[%s7590_s22 + $0x340] sm:$0xf]  ;;  %v6039_v13 = vld [vmem:[%s7590_s22 + $0x2a0] sm:$0xf0]  ;;  %v6207_v50 = vld [vmem:[%s7590_s22 + $0x3e8] sm:$0xf0] }
 0x5bc   : > { %v2424_v41 = vpop.xlane.xlu1 %2423 }
 0x5bd   : > { %v2434_v43 = vmul.f32 %v2424_v41, %v7595_v26  ;;  %v5878_v41 = vor.u32 %v6664_v31, %v5877_v46  ;;  %v6042_v46 = vor.u32 %v6700_v21, %v6039_v13  ;;  %v5749_v31 = vld [vmem:[%s7590_s22 + $0x40] sm:$0xf]  ;;  %v5917_v13 = vld [vmem:[%s7590_s22 + $0x188] sm:$0xf] }
 0x5bf   : > { %v8340_v15 = vsub.f32 %v8314_v6, %v2434_v43  ;;  %v8343_v59 = vsub.f32 %v8316_v35, %v2434_v43  ;;  %v6728_v43 = vld [vmem:[%s7590_s22 + $0x35c] sm:$0xf0]  ;;  %3324 = vmatpush.bf16.msra.mxu0 %v5878_v41 }
 0x5c0   : > { %v6005_v41 = vld [vmem:[%s7590_s22 + $0x240] sm:$0xf] }
 0x5c1   : > { %v2446_v7 = vmul.f32 %v8340_v15, %v8340_v15  ;;  %v2447_v63 = vmul.f32 %v8343_v59, %v8343_v59 }
 0x5c3   : > { %v2454_v1 = vadd.f32 %v2447_v63, %v2446_v7  ;;  %v6660_v7 = vld [vmem:[%s7590_s22 + $0x144] sm:$0xf] }
 0x5c4   : > { %v2427_v60 = vpop.xlane.xlu0 %2426  ;;  %v5879_v63 = vld [vmem:[%s7590_s22 + $0x160] sm:$0xf0] }
 0x5c5   : > { %v2435_v4 = vmul.f32 %v2427_v60, %v7595_v26  ;;  %2455 = vadd.xlane.f32.xlu0 %v2454_v1  ;;  %v6134_v1 = vor.u32 %v6728_v43, %v6133_v10  ;;  %v5882_v60 = vor.u32 %v6660_v7, %v5879_v63  ;;  %v6632_v10 = vld [vmem:[%s7590_s22 + $0x5c] sm:$0xf0]  ;;  %v6628_v63 = vld [vmem:[%s7590_s22 + $0x44] sm:$0xf] }
 0x5c6   : > { %v5750_v43 = vor.u32 %v6632_v10, %v5749_v31  ;;  %v6696_v7 = vld [vmem:[%s7590_s22 + $0x25c] sm:$0xf0]  ;;  %v6173_v31 = vld [vmem:[%s7590_s22 + $0x388] sm:$0xf] }
 0x5c7   : > { %v8351_v36 = vsub.f32 %v8320_v57, %v2435_v4  ;;  %v8354_v8 = vsub.f32 %v8322_v14, %v2435_v4  ;;  %v6724_v4 = vld [vmem:[%s7590_s22 + $0x344] sm:$0xf]  ;;  %3343 = vmatpush.bf16.msra.mxu1 %v6134_v1  ;;  %3362 = vmatpush.bf16.msra.mxu2 %v5882_v60 }
 0x5c8   : > { %v5751_v1 = vld [vmem:[%s7590_s22 + $0x60] sm:$0xf0] }
 0x5c9   : > { %v2448_v11 = vmul.f32 %v8351_v36, %v8351_v36  ;;  %v2449_v52 = vmul.f32 %v8354_v8, %v8354_v8 }
 0x5cb   : > { %v2457_v12 = vadd.f32 %v2449_v52, %v2448_v11  ;;  %v6135_v11 = vld [vmem:[%s7590_s22 + $0x360] sm:$0xf0] }
 0x5cc   : > { %v6138_v52 = vor.u32 %v6724_v4, %v6135_v11  ;;  %v6006_v4 = vor.u32 %v6696_v7, %v6005_v41  ;;  %v5754_v11 = vor.u32 %v6628_v63, %v5751_v1  ;;  %v6737_v41 = vld [vmem:[%s7590_s22 + $0x3a4] sm:$0xf0]  ;;  %v5919_v7 = vld [vmem:[%s7590_s22 + $0x1a8] sm:$0xf0] }
 0x5cd   : > { %2458 = vadd.xlane.f32.xlu2 %v2457_v12  ;;  %v5845_v12 = vld [vmem:[%s7590_s22 + $0x100] sm:$0xf]  ;;  %v6174_v1 = vor.u32 %v6737_v41, %v6173_v31  ;;  %v6717_v41 = vld [vmem:[%s7590_s22 + $0x30c] sm:$0xf] }
 0x5ce   : > { %3381 = vmatpush.bf16.msra.mxu3 %v6138_v52  ;;  %v6692_v52 = vld [vmem:[%s7590_s22 + $0x244] sm:$0xf] }
 0x5cf   : > { %v2430_v47 = vpop.xlane.xlu2 %2429 }
 0x5d0   : > { %v2436_v32 = vmul.f32 %v2430_v47, %v7595_v26  ;;  %v6656_v47 = vld [vmem:[%s7590_s22 + $0x11c] sm:$0xf0] }
 0x5d2   : > { %v8362_v48 = vsub.f32 %v8326_v53, %v2436_v32  ;;  %v8365_v9 = vsub.f32 %v8328_v0, %v2436_v32  ;;  %v6101_v32 = vld [vmem:[%s7590_s22 + $0x300] sm:$0xf] }
 0x5d4   : > { %v2450_v24 = vmul.f32 %v8362_v48, %v8362_v48  ;;  %v2451_v17 = vmul.f32 %v8365_v9, %v8365_v9 }
 0x5d6   : > { %v2460_v19 = vadd.f32 %v2451_v17, %v2450_v24  ;;  %v5846_v24 = vor.u32 %v6656_v47, %v5845_v12  ;;  %v6720_v17 = vld [vmem:[%s7590_s22 + $0x31c] sm:$0xf0]  ;;  %v6007_v12 = vld [vmem:[%s7590_s22 + $0x260] sm:$0xf0] }
 0x5d7   : > { %v2433_v58 = vpop.xlane.xlu1 %2432 }
 0x5d8   : > { %v2437_v22 = vmul.f32 %v2433_v58, %v7595_v26  ;;  %2461 = vadd.xlane.f32.xlu1 %v2460_v19  ;;  %v6652_v19 = vld [vmem:[%s7590_s22 + $0x104] sm:$0xf]  ;;  %3325 = vmatpush.bf16.msra.mxu0 %v5846_v24  ;;  %v5717_v24 = vld [vmem:[%s7590_s22] sm:$0xf] }
 0x5d9   : > { %v5847_v58 = vld [vmem:[%s7590_s22 + $0x120] sm:$0xf0] }
 0x5da   : > { %v8373_v23 = vsub.f32 %v8332_v62, %v2437_v22  ;;  %v8376_v2 = vsub.f32 %v8334_v16, %v2437_v22  ;;  %v6102_v22 = vor.u32 %v6720_v17, %v6101_v32  ;;  %v6010_v32 = vor.u32 %v6692_v52, %v6007_v12  ;;  %v6624_v17 = vld [vmem:[%s7590_s22 + $0x1c] sm:$0xf0]  ;;  %v7053_v52 = vld [vmem:[%s7580_s19] sm:$0xff] }
 0x5db   : > { %v2522_v12 = vperm.slane %v7053_v52, 2 }
 0x5dc   : > { %v2452_v40 = vmul.f32 %v8373_v23, %v8373_v23  ;;  %v2453_v25 = vmul.f32 %v8376_v2, %v8376_v2  ;;  %3344 = vmatpush.bf16.msra.mxu1 %v6102_v22  ;;  %3326 = vmatpush.bf16.msra.mxu0 %v5814_v28  ;;  %v5718_v22 = vor.u32 %v6624_v17, %v5717_v24  ;;  %v2537_v17 = vperm.slane %v7053_v52, 7 }
 0x5dd   : > { %v5978_v28 = vor.u32 %v6684_v30, %v5975_v33  ;;  %v6141_v30 = vld [vmem:[%s7590_s22 + $0x348] sm:$0xf] }
 0x5de   : > { %v2463_v5 = vadd.f32 %v2453_v25, %v2452_v40  ;;  %v5850_v40 = vor.u32 %v6652_v19, %v5847_v58  ;;  %v6716_v25 = vld [vmem:[%s7590_s22 + $0x304] sm:$0xf]  ;;  %v5973_v19 = vld [vmem:[%s7590_s22 + $0x200] sm:$0xf]  ;;  %v6729_v33 = vld [vmem:[%s7590_s22 + $0x364] sm:$0xf0] }
 0x5e0   : > { %2464 = vadd.xlane.f32.xlu0 %v2463_v5  ;;  %v6103_v5 = vld [vmem:[%s7590_s22 + $0x320] sm:$0xf0]  ;;  %3363 = vmatpush.bf16.msra.mxu2 %v5850_v40  ;;  %v6688_v40 = vld [vmem:[%s7590_s22 + $0x21c] sm:$0xf0] }
 0x5e1   : > { %v6106_v27 = vor.u32 %v6716_v25, %v6103_v5  ;;  %3345 = vmatpush.bf16.msra.mxu1 %v6070_v18  ;;  %3327 = vmatpush.bf16.msra.mxu0 %v5782_v3  ;;  %v6620_v25 = vld [vmem:[%s7590_s22 + $0x4] sm:$0xf]  ;;  %v5974_v5 = vor.u32 %v6688_v40, %v5973_v19  ;;  %v6681_v18 = vld [vmem:[%s7590_s22 + $0x1e4] sm:$0xf0] }
 0x5e2   : > { %v6665_v40 = vld [vmem:[%s7590_s22 + $0x164] sm:$0xf0] }
 0x5e3   : > { %3382 = vmatpush.bf16.msra.mxu3 %v6106_v27  ;;  %v5719_v27 = vld [vmem:[%s7590_s22 + $0x20] sm:$0xf0] }
 0x5e4   : > { %3364 = vmatpush.bf16.msra.mxu2 %v5818_v45  ;;  %v5722_v38 = vor.u32 %v6620_v25, %v5719_v27  ;;  %v6205_v45 = vld [vmem:[%s7590_s22 + $0x3c8] sm:$0xf] }
 0x5e5   : > { %3346 = vmatpush.bf16.msra.mxu1 %v6038_v55  ;;  %3328 = vmatpush.bf16.msra.mxu0 %v5750_v43  ;;  %v6206_v3 = vor.u32 %v6745_v54, %v6205_v45  ;;  %v5954_v55 = vor.u32 %v6677_v44, %v5951_v51  ;;  %v6669_v43 = vld [vmem:[%s7590_s22 + $0x18c] sm:$0xf]  ;;  %v6142_v54 = vor.u32 %v6729_v33, %v6141_v30 }
 0x5e6   : > { %v6143_v45 = vld [vmem:[%s7590_s22 + $0x368] sm:$0xf0] }
 0x5e7   : > { %3383 = vmatpush.bf16.msra.mxu3 %v6074_v20  ;;  %v5950_v20 = vor.u32 %v6681_v18, %v5949_v34  ;;  %v5887_v34 = vld [vmem:[%s7590_s22 + $0x168] sm:$0xf0] }
 0x5e8   : > { %3365 = vmatpush.bf16.msra.mxu2 %v5786_v56  ;;  %v6210_v56 = vor.u32 %v6741_v37, %v6207_v50  ;;  %v6725_v18 = vld [vmem:[%s7590_s22 + $0x34c] sm:$0xf]  ;;  %v5853_v37 = vld [vmem:[%s7590_s22 + $0x108] sm:$0xf] }
 0x5e9   : > { %3347 = vmatpush.bf16.msra.mxu1 %v6006_v4  ;;  %3329 = vmatpush.bf16.msra.mxu0 %v5718_v22  ;;  %v6733_v4 = vld [vmem:[%s7590_s22 + $0x38c] sm:$0xf]  ;;  %v5885_v22 = vld [vmem:[%s7590_s22 + $0x148] sm:$0xf]  ;;  %v6146_v44 = vor.u32 %v6725_v18, %v6143_v45 }
 0x5ea   : > { %v5886_v27 = vor.u32 %v6665_v40, %v5885_v22  ;;  %v6657_v50 = vld [vmem:[%s7590_s22 + $0x124] sm:$0xf0]  ;;  %v6079_v30 = vld [vmem:[%s7590_s22 + $0x2e8] sm:$0xf0] }
 0x5eb   : > { %3384 = vmatpush.bf16.msra.mxu3 %v6042_v46  ;;  %v6673_v46 = vld [vmem:[%s7590_s22 + $0x1a4] sm:$0xf0] }
 0x5ec   : > { %3366 = vmatpush.bf16.msra.mxu2 %v5754_v11  ;;  %v5918_v10 = vor.u32 %v6673_v46, %v5917_v13  ;;  %v6175_v11 = vld [vmem:[%s7590_s22 + $0x3a8] sm:$0xf0] }
 0x5ed   : > { %3348 = vmatpush.bf16.msra.mxu1 %v5974_v5  ;;  %3398 = vmatpush.bf16.msrb.mxu0 %v5950_v20  ;;  %v6178_v24 = vor.u32 %v6733_v4, %v6175_v11  ;;  %v8492_v20 = vperm.slane %v2522_v12, 2  ;;  %v6653_v13 = vld [vmem:[%s7590_s22 + $0x10c] sm:$0xf]  ;;  %v6649_v12 = vld [vmem:[%s7590_s22 + $0xe4] sm:$0xf0] }
 0x5ef   : > { %3385 = vmatpush.bf16.msra.mxu3 %v6010_v32  ;;  %v2536_v32 = vperm.slane %v7053_v52, 3 }
 0x5f0   : > { %3367 = vmatpush.bf16.msra.mxu2 %v5722_v38  ;;  %v6661_v38 = vld [vmem:[%s7590_s22 + $0x14c] sm:$0xf] }
 0x5f1   : > { %3417 = vmatpush.bf16.msrb.mxu1 %v6206_v3  ;;  %3399 = vmatpush.bf16.msrb.mxu0 %v5918_v10  ;;  %v5855_v10 = vld [vmem:[%s7590_s22 + $0x128] sm:$0xf0] }
 0x5f3   : > { %3386 = vmatpush.bf16.msra.mxu3 %v5978_v28 }
 0x5f4   : > { %3436 = vmatpush.bf16.msrb.mxu2 %v5954_v55  ;;  %v5854_v55 = vor.u32 %v6657_v50, %v5853_v37 }
 0x5f5   : > { %3418 = vmatpush.bf16.msrb.mxu1 %v6174_v1  ;;  %3400 = vmatpush.bf16.msrb.mxu0 %v5886_v27  ;;  %v6111_v1 = vld [vmem:[%s7590_s22 + $0x328] sm:$0xf0] }
 0x5f6   : > { %v6709_v27 = vld [vmem:[%s7590_s22 + $0x2cc] sm:$0xf] }
 0x5f7   : > { %3455 = vmatpush.bf16.msrb.mxu3 %v6210_v56  ;;  %v6109_v56 = vld [vmem:[%s7590_s22 + $0x308] sm:$0xf] }
 0x5f9   : > { %3419 = vmatpush.bf16.msrb.mxu1 %v6142_v54  ;;  %3401 = vmatpush.bf16.msrb.mxu0 %v5854_v55 }
 0x5fb   : > { %3456 = vmatpush.bf16.msrb.mxu3 %v6178_v24  ;;  %v6713_v24 = vld [vmem:[%s7590_s22 + $0x2e4] sm:$0xf0] }
 0x5ff   : > { %3457 = vmatpush.bf16.msrb.mxu3 %v6146_v44 }
 0x638   : > { %v2456_v60 = vpop.xlane.xlu0 %2455 }
 0x639   : > { %v2466_v47 = vmul.f32 %v2456_v60, %v7595_v26  ;;  %v5922_v60 = vor.u32 %v6669_v43, %v5919_v7  ;;  %v8511_v43 = vperm.slane %v2536_v32, 3 }
 0x63b   : > { %v8442_v58 = vadd.f32 1e-05, %v2466_v47  ;;  %v2523_v47 = vperm.slane %v7053_v52, 6  ;;  %3437 = vmatpush.bf16.msrb.mxu2 %v5922_v60  ;;  %v8516_v60 = vperm.slane %v2537_v17, 3  ;;  %v6645_v17 = vld [vmem:[%s7590_s22 + $0xcc] sm:$0xf] }
 0x63d   : > { %6973 = vrsqrt.f32 %v8442_v58  ;;  %vm2480_vm3 = vweird.f32 %v8442_v58  ;;  %v8506_v46 = vperm.slane %v2523_v47, 2 }
 0x640   : > { %v2459_v61 = vpop.xlane.xlu2 %2458 }
 0x641   : > { %v2467_v39 = vmul.f32 %v2459_v61, %v7595_v26 }
 0x643   : > { %v8454_v42 = vpop.eup %6973  ;;  %v8456_v29 = vadd.f32 1e-05, %v2467_v39 }
 0x644   : > { %v2475_v49 = vmul.f32 %v8454_v42, %v8442_v58  ;;  %vm2481_vm15 = vweird.f32 %v8454_v42  ;;  %v5890_v58 = vor.u32 %v6661_v38, %v5887_v34  ;;  %v6045_v34 = vld [vmem:[%s7590_s22 + $0x288] sm:$0xf] }
 0x645   : > { %6975 = vrsqrt.f32 %v8456_v29  ;;  %vm2482_vm4 = vmor %vm2480_vm3, %vm2481_vm15  ;;  %vm2490_vm6 = vweird.f32 %v8456_v29 }
 0x646   : > { %v2476_v21 = vmul.f32 %v8454_v42, %v2475_v49  ;;  %3438 = vmatpush.bf16.msrb.mxu2 %v5890_v58 }
 0x648   : > { %v2477_v63 = vmul.f32 0.5, %v2476_v21  ;;  %v6721_v21 = vld [vmem:[%s7590_s22 + $0x324] sm:$0xf0] }
 0x649   : > { %v6110_v31 = vor.u32 %v6721_v21, %v6109_v56  ;;  %v5791_v56 = vld [vmem:[%s7590_s22 + $0xa8] sm:$0xf0] }
 0x64a   : > { %v2478_v19 = vsub.f32 1.5, %v2477_v63  ;;  %v5858_v63 = vor.u32 %v6653_v13, %v5855_v10  ;;  %v6047_v21 = vld [vmem:[%s7590_s22 + $0x2a8] sm:$0xf0] }
 0x64b   : > { %v8479_v25 = vpop.eup %6975  ;;  %v2462_v5 = vpop.xlane.xlu1 %2461  ;;  %3420 = vmatpush.bf16.msrb.mxu1 %v6110_v31 }
 0x64c   : > { %v2479_v28 = vmul.f32 %v8454_v42, %v2478_v19  ;;  %v2485_v61 = vmul.f32 %v8479_v25, %v8456_v29  ;;  %v2468_v39 = vmul.f32 %v2462_v5, %v7595_v26  ;;  %vm2491_vm5 = vweird.f32 %v8479_v25  ;;  %v5821_v29 = vld [vmem:[%s7590_s22 + $0xc8] sm:$0xf]  ;;  %3439 = vmatpush.bf16.msrb.mxu2 %v5858_v63  ;;  %v5823_v5 = vld [vmem:[%s7590_s22 + $0xe8] sm:$0xf0] }
 0x64d   : > { %vm8521_vm7 = vmor %vm2490_vm6, %vm2491_vm5  ;;  %v5822_v32 = vor.u32 %v6649_v12, %v5821_v29  ;;  %v5826_v38 = vor.u32 %v6645_v17, %v5823_v5  ;;  %v6013_v63 = vld [vmem:[%s7590_s22 + $0x248] sm:$0xf]  ;;  %v6693_v29 = vld [vmem:[%s7590_s22 + $0x24c] sm:$0xf] }
 0x64e   : > { %v2483_v49 = vsel %vm2482_vm4, %v8454_v42, %v2479_v28  ;;  %v2486_v3 = vmul.f32 %v8479_v25, %v2485_v61  ;;  %v8498_v51 = vadd.f32 1e-05, %v2468_v39  ;;  %v6082_v28 = vor.u32 %v6709_v27, %v6079_v30  ;;  %v5789_v61 = vld [vmem:[%s7590_s22 + $0x88] sm:$0xf]  ;;  %v6015_v12 = vld [vmem:[%s7590_s22 + $0x268] sm:$0xf0] }
 0x64f   : > { %v2514_v7 = vmul.f32 %v2483_v49, %v8340_v15  ;;  %v2515_v4 = vmul.f32 %v2483_v49, %v8343_v59  ;;  %v6114_v15 = vor.u32 %v6717_v41, %v6111_v1  ;;  %v6077_v59 = vld [vmem:[%s7590_s22 + $0x2c8] sm:$0xf]  ;;  %3402 = vmatpush.bf16.msrb.mxu0 %v5822_v32 }
 0x650   : > { %v2487_v42 = vmul.f32 0.5, %v2486_v3  ;;  %6977 = vrsqrt.f32 %v8498_v51  ;;  %v6078_v40 = vor.u32 %v6713_v24, %v6077_v59  ;;  %v6641_v39 = vld [vmem:[%s7590_s22 + $0xa4] sm:$0xf0]  ;;  %v6637_v3 = vld [vmem:[%s7590_s22 + $0x8c] sm:$0xf]  ;;  %3440 = vmatpush.bf16.msrb.mxu2 %v5826_v38  ;;  %vm2500_vm9 = vweird.f32 %v8498_v51 }
 0x651   : > { %3458 = vmatpush.bf16.msrb.mxu3 %v6114_v15  ;;  %v2528_v33 = vmul.f32 %v8492_v20, %v2514_v7  ;;  %v2529_v45 = vmul.f32 %v8506_v46, %v2515_v4  ;;  %v5790_v44 = vor.u32 %v6641_v39, %v5789_v61  ;;  %v6705_v49 = vld [vmem:[%s7590_s22 + $0x2a4] sm:$0xf0]  ;;  %v6629_v4 = vld [vmem:[%s7590_s22 + $0x4c] sm:$0xf] }
 0x652   : > { %v2488_v11 = vsub.f32 1.5, %v2487_v42  ;;  %3421 = vmatpush.bf16.msrb.mxu1 %v6078_v40  ;;  %v6046_v13 = vor.u32 %v6705_v49, %v6045_v34  ;;  %v6633_v42 = vld [vmem:[%s7590_s22 + $0x64] sm:$0xf0]  ;;  %v5759_v15 = vld [vmem:[%s7590_s22 + $0x68] sm:$0xf0] }
 0x653   : > { %v2465_v47 = vpop.xlane.xlu0 %2464  ;;  %3403 = vmatpush.bf16.msrb.mxu0 %v5790_v44  ;;  %v6697_v1 = vld [vmem:[%s7590_s22 + $0x264] sm:$0xf0]  ;;  %v5762_v30 = vor.u32 %v6629_v4, %v5759_v15  ;;  %v6621_v34 = vld [vmem:[%s7590_s22 + $0xc] sm:$0xf]  ;;  %v6674_v15 = vld [vmem:[%s7590_s22 + $0x1ac] sm:$0xf0] }
 0x654   : > { %v2489_v19 = vmul.f32 %v8479_v25, %v2488_v11  ;;  %v2469_v22 = vmul.f32 %v2465_v47, %v7595_v26  ;;  %v2542_v11 = vadd.f32 %v8511_v43, %v2528_v33  ;;  %v2543_v47 = vadd.f32 %v8516_v60, %v2529_v45  ;;  %v5725_v17 = vld [vmem:[%s7590_s22 + $0x8] sm:$0xf]  ;;  %v5727_v45 = vld [vmem:[%s7590_s22 + $0x28] sm:$0xf0] }
 0x655   : > { %3459 = vmatpush.bf16.msrb.mxu3 %v6082_v28  ;;  %v5981_v33 = vld [vmem:[%s7590_s22 + $0x208] sm:$0xf]  ;;  %v6018_v28 = vor.u32 %v6693_v29, %v6015_v12  ;;  %v6685_v49 = vld [vmem:[%s7590_s22 + $0x20c] sm:$0xf]  ;;  %v6181_v12 = vld [vmem:[%s7590_s22 + $0x390] sm:$0xf] }
 0x656   : > { %v8539_v18 = vpop.eup %6977  ;;  %v2493_v54 = vsel %vm8521_vm7, %v8479_v25, %v2489_v19  ;;  %v8545_v58 = vadd.f32 1e-05, %v2469_v22  ;;  %v6701_v25 = vld [vmem:[%s7590_s22 + $0x28c] sm:$0xf]  ;;  %3422 = vmatpush.bf16.msrb.mxu1 %v6046_v13  ;;  %v6625_v19 = vld [vmem:[%s7590_s22 + $0x24] sm:$0xf0]  ;;  %v6014_v22 = vor.u32 %v6697_v1, %v6013_v63 }
 0x657   : > { %v2516_v37 = vmul.f32 %v2493_v54, %v8351_v36  ;;  %v2517_v50 = vmul.f32 %v2493_v54, %v8354_v8  ;;  %v2495_v55 = vmul.f32 %v8539_v18, %v8498_v51  ;;  %v5794_v36 = vor.u32 %v6637_v3, %v5791_v56  ;;  %v5757_v8 = vld [vmem:[%s7590_s22 + $0x48] sm:$0xf]  ;;  %v5983_v3 = vld [vmem:[%s7590_s22 + $0x228] sm:$0xf0]  ;;  %v6213_v13 = vld [vmem:[%s7590_s22 + $0x3d0] sm:$0xf] }
 0x658   : > { %6979 = vrsqrt.f32 %v8545_v58  ;;  %v6050_v7 = vor.u32 %v6701_v25, %v6047_v21  ;;  %v5758_v52 = vor.u32 %v6633_v42, %v5757_v8  ;;  %vm2501_vm8 = vweird.f32 %v8539_v18  ;;  %v6689_v39 = vld [vmem:[%s7590_s22 + $0x224] sm:$0xf0]  ;;  %v5957_v25 = vld [vmem:[%s7590_s22 + $0x1d0] sm:$0xf] }
 0x659   : > { %v2530_v31 = vmul.f32 %v8492_v20, %v2516_v37  ;;  %v2531_v10 = vmul.f32 %v8506_v46, %v2517_v50  ;;  %v2496_v41 = vmul.f32 %v8539_v18, %v2495_v55  ;;  %3441 = vmatpush.bf16.msrb.mxu2 %v5794_v36  ;;  %v5726_v61 = vor.u32 %v6625_v19, %v5725_v17  ;;  %vm2502_vm10 = vmor %vm2500_vm9, %vm2501_vm8  ;;  %v6682_v21 = vld [vmem:[%s7590_s22 + $0x1ec] sm:$0xf0]  ;;  %v5927_v17 = vld [vmem:[%s7590_s22 + $0x1b0] sm:$0xf0] }
 0x65a   : > { %3460 = vmatpush.bf16.msrb.mxu3 %v6050_v7  ;;  %3404 = vmatpush.bf16.msrb.mxu0 %v5758_v52  ;;  %v5982_v50 = vor.u32 %v6689_v39, %v5981_v33  ;;  %v5730_v55 = vor.u32 %v6621_v34, %v5727_v45  ;;  %v5986_v56 = vor.u32 %v6685_v49, %v5983_v3  ;;  %v6746_v42 = vld [vmem:[%s7590_s22 + $0x3ec] sm:$0xf0]  ;;  %vm2510_vm12 = vweird.f32 %v8545_v58  ;;  %v6215_v7 = vld [vmem:[%s7590_s22 + $0x3f0] sm:$0xf0] }
 0x65b   : > { %v2544_v32 = vadd.f32 %v8511_v43, %v2530_v31  ;;  %v2545_v59 = vadd.f32 %v8516_v60, %v2531_v10  ;;  %v2497_v24 = vmul.f32 0.5, %v2496_v41  ;;  %3423 = vmatpush.bf16.msrb.mxu1 %v6014_v22  ;;  %v5958_v8 = vor.u32 %v6682_v21, %v5957_v25  ;;  %v6678_v31 = vld [vmem:[%s7590_s22 + $0x1d4] sm:$0xf]  ;;  %v5925_v52 = vld [vmem:[%s7590_s22 + $0x190] sm:$0xf] }
 0x65c   : > { %v6214_v10 = vor.u32 %v6746_v42, %v6213_v13  ;;  %v5959_v41 = vld [vmem:[%s7590_s22 + $0x1f0] sm:$0xf0]  ;;  %v6666_v33 = vld [vmem:[%s7590_s22 + $0x16c] sm:$0xf0] }
 0x65d   : > { %v8574_v40 = vpack.c.bf16 %v2544_v32, %v2542_v11  ;;  %v8576_v5 = vpack.c.bf16 %v2545_v59, %v2543_v47  ;;  %v2498_v27 = vsub.f32 1.5, %v2497_v24  ;;  %3442 = vmatpush.bf16.msrb.mxu2 %v5762_v30  ;;  %v6738_v47 = vld [vmem:[%s7590_s22 + $0x3ac] sm:$0xf0]  ;;  %v6670_v32 = vld [vmem:[%s7590_s22 + $0x194] sm:$0xf] }
 0x65e   : > { %v8579_v38 = vpop.eup %6979  ;;  %3461 = vmatpush.bf16.msrb.mxu3 %v6018_v28  ;;  %3405 = vmatpush.bf16.msrb.mxu0 %v5726_v61  ;;  %v6182_v24 = vor.u32 %v6738_v47, %v6181_v12  ;;  %v6734_v19 = vld [vmem:[%s7590_s22 + $0x394] sm:$0xf]  ;;  %v5930_v22 = vor.u32 %v6670_v32, %v5927_v17  ;;  %v5893_v30 = vld [vmem:[%s7590_s22 + $0x150] sm:$0xf] }
 0x65f   : > { %v2499_v54 = vmul.f32 %v8539_v18, %v2498_v27  ;;  %v2505_v44 = vmul.f32 %v8579_v38, %v8545_v58  ;;  %3330 = vmatmul.bf16.vlgmr.msra.gmra.mxu0 %v8574_v40  ;;  %3349 = vmatmul.bf16.vlgmr.msra.gmra.mxu1 %v8576_v5  ;;  %vm2511_vm11 = vweird.f32 %v8579_v38  ;;  %v5962_v58 = vor.u32 %v6678_v31, %v5959_v41  ;;  %v6149_v28 = vld [vmem:[%s7590_s22 + $0x350] sm:$0xf]  ;;  %v6662_v45 = vld [vmem:[%s7590_s22 + $0x154] sm:$0xf] }
 0x660   : > { %3368 = vmatmul.bf16.vlgmr.msra.gmra.mxu2 %v8574_v40  ;;  %3387 = vmatmul.bf16.vlgmr.msra.gmra.mxu3 %v8576_v5  ;;  %vm8612_vm13 = vmor %vm2510_vm12, %vm2511_vm11  ;;  %v6730_v34 = vld [vmem:[%s7590_s22 + $0x36c] sm:$0xf0]  ;;  %v6710_v32 = vld [vmem:[%s7590_s22 + $0x2d4] sm:$0xf] }
 0x661   : > { %v2506_v37 = vmul.f32 %v8579_v38, %v2505_v44  ;;  %v2503_v51 = vsel %vm2502_vm10, %v8539_v18, %v2499_v54  ;;  %v6742_v18 = vld [vmem:[%s7590_s22 + $0x3d4] sm:$0xf]  ;;  %3424 = vmatpush.bf16.msrb.mxu1 %v5982_v50  ;;  %3443 = vmatpush.bf16.msrb.mxu2 %v5730_v55  ;;  %v6658_v21 = vld [vmem:[%s7590_s22 + $0x12c] sm:$0xf0] }
 0x662   : > { %v2518_v63 = vmul.f32 %v2503_v51, %v8362_v48  ;;  %v6218_v11 = vor.u32 %v6742_v18, %v6215_v7  ;;  %v2519_v29 = vmul.f32 %v2503_v51, %v8365_v9  ;;  %3462 = vmatpush.bf16.msrb.mxu3 %v5986_v56  ;;  %3474 = vmatpush.bf16.msra.mxu0 %v5958_v8  ;;  %v6183_v9 = vld [vmem:[%s7590_s22 + $0x3b0] sm:$0xf0]  ;;  %v6117_v13 = vld [vmem:[%s7590_s22 + $0x310] sm:$0xf] }
 0x663   : > { %v2507_v36 = vmul.f32 0.5, %v2506_v37  ;;  %v5926_v48 = vor.u32 %v6674_v15, %v5925_v52  ;;  %v6186_v27 = vor.u32 %v6734_v19, %v6183_v9  ;;  %v5895_v54 = vld [vmem:[%s7590_s22 + $0x170] sm:$0xf0]  ;;  %v5894_v37 = vor.u32 %v6666_v33, %v5893_v30  ;;  %v6085_v52 = vld [vmem:[%s7590_s22 + $0x2d0] sm:$0xf] }
 0x664   : > { %v2532_v61 = vmul.f32 %v8492_v20, %v2518_v63  ;;  %v2533_v44 = vmul.f32 %v8506_v46, %v2519_v29  ;;  %v6726_v50 = vld [vmem:[%s7590_s22 + $0x354] sm:$0xf]  ;;  %v5898_v51 = vor.u32 %v6662_v45, %v5895_v54  ;;  %v6714_v15 = vld [vmem:[%s7590_s22 + $0x2ec] sm:$0xf0] }
 0x665   : > { %v2508_v1 = vsub.f32 1.5, %v2507_v36  ;;  %3493 = vmatpush.bf16.msra.mxu1 %v6214_v10  ;;  %3512 = vmatpush.bf16.msra.mxu2 %v5962_v58  ;;  %v6151_v55 = vld [vmem:[%s7590_s22 + $0x370] sm:$0xf0]  ;;  %v6722_v36 = vld [vmem:[%s7590_s22 + $0x32c] sm:$0xf0]  ;;  %v6086_v47 = vor.u32 %v6714_v15, %v6085_v52 }
 0x666   : > { %3531 = vmatpush.bf16.msra.mxu3 %v6218_v11  ;;  %3475 = vmatpush.bf16.msra.mxu0 %v5926_v48  ;;  %v6154_v25 = vor.u32 %v6726_v50, %v6151_v55  ;;  %v6654_v8 = vld [vmem:[%s7590_s22 + $0x114] sm:$0xf]  ;;  %v2546_v42 = vadd.f32 %v8511_v43, %v2532_v61  ;;  %v2547_v31 = vadd.f32 %v8516_v60, %v2533_v44  ;;  %v5829_v58 = vld [vmem:[%s7590_s22 + $0xd0] sm:$0xf]  ;;  %v6679_v52 = vld [vmem:[%s7590_s22 + $0x1dc] sm:$0xf] }
 0x667   : > { %v2509_v59 = vmul.f32 %v8579_v38, %v2508_v1  ;;  %v6119_v18 = vld [vmem:[%s7590_s22 + $0x330] sm:$0xf0]  ;;  %v6118_v1 = vor.u32 %v6722_v36, %v6117_v13  ;;  %v6650_v11 = vld [vmem:[%s7590_s22 + $0xec] sm:$0xf0]  ;;  %v5967_v15 = vld [vmem:[%s7590_s22 + $0x1f8] sm:$0xf0] }
 0x668   : > { %v6646_v29 = vld [vmem:[%s7590_s22 + $0xd4] sm:$0xf]  ;;  %v5830_v12 = vor.u32 %v6650_v11, %v5829_v58  ;;  %v6642_v9 = vld [vmem:[%s7590_s22 + $0xac] sm:$0xf0]  ;;  %v6747_v11 = vld [vmem:[%s7590_s22 + $0x3f4] sm:$0xf0] }
 0x669   : > { %v2513_v39 = vsel %vm8612_vm13, %v8579_v38, %v2509_v59  ;;  %3494 = vmatpush.bf16.msra.mxu1 %v6182_v24  ;;  %3513 = vmatpush.bf16.msra.mxu2 %v5930_v22  ;;  %v6150_v38 = vor.u32 %v6730_v34, %v6149_v28  ;;  %v5831_v48 = vld [vmem:[%s7590_s22 + $0xf0] sm:$0xf0]  ;;  %v5797_v24 = vld [vmem:[%s7590_s22 + $0x90] sm:$0xf] }
 0x66a   : > { %v2520_v49 = vmul.f32 %v2513_v39, %v8373_v23  ;;  %v2521_v3 = vmul.f32 %v2513_v39, %v8376_v2  ;;  %3532 = vmatpush.bf16.msra.mxu3 %v6186_v27  ;;  %v5861_v2 = vld [vmem:[%s7590_s22 + $0x110] sm:$0xf]  ;;  %3476 = vmatpush.bf16.msra.mxu0 %v5894_v37  ;;  %v6087_v59 = vld [vmem:[%s7590_s22 + $0x2f0] sm:$0xf0]  ;;  %v5834_v17 = vor.u32 %v6646_v29, %v5831_v48 }
 0x66b   : > { %v6090_v19 = vor.u32 %v6710_v32, %v6087_v59  ;;  %v6053_v22 = vld [vmem:[%s7590_s22 + $0x290] sm:$0xf]  ;;  %v6638_v30 = vld [vmem:[%s7590_s22 + $0x94] sm:$0xf]  ;;  %v5798_v39 = vor.u32 %v6642_v9, %v5797_v24  ;;  %v5970_v48 = vor.u32 %v6679_v52, %v5967_v15  ;;  %v5933_v32 = vld [vmem:[%s7590_s22 + $0x198] sm:$0xf] }
 0x66c   : > { %v2534_v56 = vmul.f32 %v8492_v20, %v2520_v49  ;;  %v2535_v23 = vmul.f32 %v8506_v46, %v2521_v3  ;;  %v5863_v20 = vld [vmem:[%s7590_s22 + $0x130] sm:$0xf0]  ;;  %v6706_v27 = vld [vmem:[%s7590_s22 + $0x2ac] sm:$0xf0]  ;;  %v6675_v24 = vld [vmem:[%s7590_s22 + $0x1b4] sm:$0xf0] }
 0x66d   : > { %v6718_v46 = vld [vmem:[%s7590_s22 + $0x314] sm:$0xf]  ;;  %3495 = vmatpush.bf16.msra.mxu1 %v6150_v38  ;;  %3514 = vmatpush.bf16.msra.mxu2 %v5898_v51  ;;  %v6054_v34 = vor.u32 %v6706_v27, %v6053_v22  ;;  %v5765_v45 = vld [vmem:[%s7590_s22 + $0x50] sm:$0xf]  ;;  %v5934_v9 = vor.u32 %v6675_v24, %v5933_v32  ;;  %v6671_v27 = vld [vmem:[%s7590_s22 + $0x19c] sm:$0xf] }
 0x66e   : > { %v2548_v10 = vadd.f32 %v8511_v43, %v2534_v56  ;;  %v2549_v41 = vadd.f32 %v8516_v60, %v2535_v23  ;;  %3533 = vmatpush.bf16.msra.mxu3 %v6154_v25  ;;  %v5862_v43 = vor.u32 %v6658_v21, %v5861_v2  ;;  %v5866_v60 = vor.u32 %v6654_v8, %v5863_v20  ;;  %v5799_v33 = vld [vmem:[%s7590_s22 + $0xb0] sm:$0xf0]  ;;  %v6634_v54 = vld [vmem:[%s7590_s22 + $0x6c] sm:$0xf0]  ;;  %v6711_v52 = vld [vmem:[%s7590_s22 + $0x2dc] sm:$0xf] }
 0x66f   : > { %v6122_v4 = vor.u32 %v6718_v46, %v6119_v18  ;;  %v6702_v28 = vld [vmem:[%s7590_s22 + $0x294] sm:$0xf]  ;;  %v5802_v44 = vor.u32 %v6638_v30, %v5799_v33  ;;  %v6021_v3 = vld [vmem:[%s7590_s22 + $0x250] sm:$0xf]  ;;  %v5766_v56 = vor.u32 %v6634_v54, %v5765_v45  ;;  %v5935_v30 = vld [vmem:[%s7590_s22 + $0x1b8] sm:$0xf0] }
 0x670   : > { %v8655_v7 = vpack.c.bf16 %v2548_v10, %v2546_v42  ;;  %v8657_v63 = vpack.c.bf16 %v2549_v41, %v2547_v31  ;;  %3477 = vmatpush.bf16.msra.mxu0 %v5862_v43  ;;  %v6055_v61 = vld [vmem:[%s7590_s22 + $0x2b0] sm:$0xf0]  ;;  %v6698_v37 = vld [vmem:[%s7590_s22 + $0x26c] sm:$0xf0]  ;;  %v6735_v33 = vld [vmem:[%s7590_s22 + $0x39c] sm:$0xf] }
 0x671   : > { %3496 = vmatpush.bf16.msra.mxu1 %v6118_v1  ;;  %3515 = vmatpush.bf16.msra.mxu2 %v5866_v60  ;;  %v6058_v49 = vor.u32 %v6702_v28, %v6055_v61  ;;  %v6630_v50 = vld [vmem:[%s7590_s22 + $0x54] sm:$0xf]  ;;  %v6022_v23 = vor.u32 %v6698_v37, %v6021_v3  ;;  %v5733_v25 = vld [vmem:[%s7590_s22 + $0x10] sm:$0xf]  ;;  %v5965_v1 = vld [vmem:[%s7590_s22 + $0x1d8] sm:$0xf]  ;;  %v5938_v28 = vor.u32 %v6671_v27, %v5935_v30 }
 0x672   : > { %3335 = vmatmul.bf16.gmra.mxu0 %v8655_v7  ;;  %3354 = vmatmul.bf16.gmra.mxu1 %v8657_v63  ;;  %v5767_v55 = vld [vmem:[%s7590_s22 + $0x70] sm:$0xf0]  ;;  %v6626_v2 = vld [vmem:[%s7590_s22 + $0x2c] sm:$0xf0]  ;;  %v6683_v60 = vld [vmem:[%s7590_s22 + $0x1f4] sm:$0xf0] }
 0x673   : > { %3373 = vmatmul.bf16.gmra.mxu2 %v8655_v7  ;;  %3392 = vmatmul.bf16.gmra.mxu3 %v8657_v63  ;;  %v6694_v38 = vld [vmem:[%s7590_s22 + $0x254] sm:$0xf]  ;;  %v5770_v21 = vor.u32 %v6630_v50, %v5767_v55  ;;  %v5989_v36 = vld [vmem:[%s7590_s22 + $0x210] sm:$0xf]  ;;  %v5734_v20 = vor.u32 %v6626_v2, %v5733_v25  ;;  %v5966_v58 = vor.u32 %v6683_v60, %v5965_v1  ;;  %v6191_v61 = vld [vmem:[%s7590_s22 + $0x3b8] sm:$0xf0] }
 0x674   : > { %3534 = vmatpush.bf16.msra.mxu3 %v6122_v4  ;;  %3478 = vmatpush.bf16.msra.mxu0 %v5830_v12  ;;  %v6023_v51 = vld [vmem:[%s7590_s22 + $0x270] sm:$0xf0]  ;;  %v6690_v8 = vld [vmem:[%s7590_s22 + $0x22c] sm:$0xf0]  ;;  %v6221_v4 = vld [vmem:[%s7590_s22 + $0x3d8] sm:$0xf]  ;;  %v6194_v45 = vor.u32 %v6735_v33, %v6191_v61 }
 0x675   : > { %3497 = vmatpush.bf16.msra.mxu1 %v6086_v47  ;;  %3516 = vmatpush.bf16.msra.mxu2 %v5834_v17  ;;  %v6026_v13 = vor.u32 %v6694_v38, %v6023_v51  ;;  %v6622_v42 = vld [vmem:[%s7590_s22 + $0x14] sm:$0xf]  ;;  %v5990_v46 = vor.u32 %v6690_v8, %v5989_v36  ;;  %v6222_v29 = vor.u32 %v6747_v11, %v6221_v4  ;;  %v6743_v12 = vld [vmem:[%s7590_s22 + $0x3dc] sm:$0xf]  ;;  %v6189_v17 = vld [vmem:[%s7590_s22 + $0x398] sm:$0xf] }
 0x676   : > { %v5735_v31 = vld [vmem:[%s7590_s22 + $0x30] sm:$0xf0]  ;;  %v6223_v47 = vld [vmem:[%s7590_s22 + $0x3f8] sm:$0xf0]  ;;  %v6157_v54 = vld [vmem:[%s7590_s22 + $0x358] sm:$0xf] }
 0x677   : > { %v6686_v10 = vld [vmem:[%s7590_s22 + $0x214] sm:$0xf]  ;;  %v5738_v18 = vor.u32 %v6622_v42, %v5735_v31  ;;  %v6226_v59 = vor.u32 %v6743_v12, %v6223_v47  ;;  %v5903_v3 = vld [vmem:[%s7590_s22 + $0x178] sm:$0xf0]  ;;  %v6659_v25 = vld [vmem:[%s7590_s22 + $0x134] sm:$0xf0] }
 0x678   : > { %3535 = vmatpush.bf16.msra.mxu3 %v6090_v19  ;;  %3479 = vmatpush.bf16.msra.mxu0 %v5798_v39  ;;  %v5991_v41 = vld [vmem:[%s7590_s22 + $0x230] sm:$0xf0]  ;;  %v6739_v19 = vld [vmem:[%s7590_s22 + $0x3b4] sm:$0xf0]  ;;  %v6727_v37 = vld [vmem:[%s7590_s22 + $0x35c] sm:$0xf] }
 0x679   : > { %3498 = vmatpush.bf16.msra.mxu1 %v6054_v34  ;;  %3517 = vmatpush.bf16.msra.mxu2 %v5802_v44  ;;  %v5994_v43 = vor.u32 %v6686_v10, %v5991_v41  ;;  %v6190_v22 = vor.u32 %v6739_v19, %v6189_v17  ;;  %v5901_v39 = vld [vmem:[%s7590_s22 + $0x158] sm:$0xf]  ;;  %v6159_v50 = vld [vmem:[%s7590_s22 + $0x378] sm:$0xf0] }
 0x67a   : > { %v6667_v34 = vld [vmem:[%s7590_s22 + $0x174] sm:$0xf0]  ;;  %v5871_v36 = vld [vmem:[%s7590_s22 + $0x138] sm:$0xf0] }
 0x67b   : > { %v6731_v44 = vld [vmem:[%s7590_s22 + $0x374] sm:$0xf0]  ;;  %v5902_v55 = vor.u32 %v6667_v34, %v5901_v39  ;;  %v6719_v8 = vld [vmem:[%s7590_s22 + $0x31c] sm:$0xf] }
 0x67c   : > { %3536 = vmatpush.bf16.msra.mxu3 %v6058_v49  ;;  %3480 = vmatpush.bf16.msra.mxu0 %v5766_v56  ;;  %v6663_v49 = vld [vmem:[%s7590_s22 + $0x15c] sm:$0xf]  ;;  %v6158_v38 = vor.u32 %v6731_v44, %v6157_v54  ;;  %v6162_v56 = vor.u32 %v6727_v37, %v6159_v50  ;;  %v6125_v2 = vld [vmem:[%s7590_s22 + $0x318] sm:$0xf] }
 0x67d   : > { %3499 = vmatpush.bf16.msra.mxu1 %v6022_v23  ;;  %3518 = vmatpush.bf16.msra.mxu2 %v5770_v21  ;;  %v5906_v51 = vor.u32 %v6663_v49, %v5903_v3  ;;  %v5869_v23 = vld [vmem:[%s7590_s22 + $0x118] sm:$0xf]  ;;  %v6127_v42 = vld [vmem:[%s7590_s22 + $0x338] sm:$0xf0] }
 0x67e   : > { %v6723_v21 = vld [vmem:[%s7590_s22 + $0x334] sm:$0xf0]  ;;  %v5870_v31 = vor.u32 %v6659_v25, %v5869_v23  ;;  %v6647_v60 = vld [vmem:[%s7590_s22 + $0xdc] sm:$0xf] }
 0x67f   : > { %v6126_v10 = vor.u32 %v6723_v21, %v6125_v2  ;;  %v6715_v1 = vld [vmem:[%s7590_s22 + $0x2f4] sm:$0xf0]  ;;  %v5839_v4 = vld [vmem:[%s7590_s22 + $0xf8] sm:$0xf0] }
 0x680   : > { %3537 = vmatpush.bf16.msra.mxu3 %v6026_v13  ;;  %3481 = vmatpush.bf16.msra.mxu0 %v5734_v20  ;;  %v6655_v13 = vld [vmem:[%s7590_s22 + $0x11c] sm:$0xf]  ;;  %v6130_v20 = vor.u32 %v6719_v8, %v6127_v42  ;;  %v6643_v47 = vld [vmem:[%s7590_s22 + $0xb4] sm:$0xf0] }
 0x681   : > { %3500 = vmatpush.bf16.msra.mxu1 %v5990_v46  ;;  %3519 = vmatpush.bf16.msra.mxu2 %v5738_v18  ;;  %v5874_v41 = vor.u32 %v6655_v13, %v5871_v36  ;;  %v5837_v46 = vld [vmem:[%s7590_s22 + $0xd8] sm:$0xf]  ;;  %v6095_v15 = vld [vmem:[%s7590_s22 + $0x2f8] sm:$0xf0] }
 0x682   : > { %3406 = vmatmul.bf16.vlgmr.msrb.gmra.mxu0 %v8574_v40  ;;  %3425 = vmatmul.bf16.vlgmr.msrb.gmra.mxu1 %v8576_v5  ;;  %v6651_v18 = vld [vmem:[%s7590_s22 + $0xf4] sm:$0xf0]  ;;  %v6098_v12 = vor.u32 %v6711_v52, %v6095_v15  ;;  %v6639_v24 = vld [vmem:[%s7590_s22 + $0x9c] sm:$0xf] }
 0x683   : > { %3444 = vmatmul.bf16.vlgmr.msrb.gmra.mxu2 %v8574_v40  ;;  %3463 = vmatmul.bf16.vlgmr.msrb.gmra.mxu3 %v8576_v5  ;;  %v6061_v32 = vld [vmem:[%s7590_s22 + $0x298] sm:$0xf]  ;;  %v5807_v17 = vld [vmem:[%s7590_s22 + $0xb8] sm:$0xf0] }
 0x684   : > { %3538 = vmatpush.bf16.msra.mxu3 %v5994_v43  ;;  %3550 = vmatpush.bf16.msrb.mxu0 %v5966_v58  ;;  %v6093_v43 = vld [vmem:[%s7590_s22 + $0x2d8] sm:$0xf]  ;;  %v5838_v58 = vor.u32 %v6651_v18, %v5837_v46  ;;  %v6703_v19 = vld [vmem:[%s7590_s22 + $0x29c] sm:$0xf] }
 0x685   : > { %3569 = vmatpush.bf16.msrb.mxu1 %v6222_v29  ;;  %3588 = vmatpush.bf16.msrb.mxu2 %v5970_v48  ;;  %v6094_v11 = vor.u32 %v6715_v1, %v6093_v43  ;;  %v5805_v29 = vld [vmem:[%s7590_s22 + $0x98] sm:$0xf]  ;;  %v5842_v48 = vor.u32 %v6647_v60, %v5839_v4  ;;  %v5775_v54 = vld [vmem:[%s7590_s22 + $0x78] sm:$0xf0] }
 0x686   : > { %v5773_v30 = vld [vmem:[%s7590_s22 + $0x58] sm:$0xf]  ;;  %v6695_v44 = vld [vmem:[%s7590_s22 + $0x25c] sm:$0xf] }
 0x687   : > { %v6635_v33 = vld [vmem:[%s7590_s22 + $0x74] sm:$0xf0]  ;;  %v6031_v49 = vld [vmem:[%s7590_s22 + $0x278] sm:$0xf0] }
 0x688   : > { %3607 = vmatpush.bf16.msrb.mxu3 %v6226_v59  ;;  %3551 = vmatpush.bf16.msrb.mxu0 %v5934_v9  ;;  %v6707_v59 = vld [vmem:[%s7590_s22 + $0x2b4] sm:$0xf0]  ;;  %v6063_v9 = vld [vmem:[%s7590_s22 + $0x2b8] sm:$0xf0]  ;;  %v5774_v3 = vor.u32 %v6635_v33, %v5773_v30 }
 0x689   : > { %3570 = vmatpush.bf16.msrb.mxu1 %v6190_v22  ;;  %3589 = vmatpush.bf16.msrb.mxu2 %v5938_v28  ;;  %v5806_v22 = vor.u32 %v6643_v47, %v5805_v29  ;;  %v6062_v27 = vor.u32 %v6707_v59, %v6061_v32  ;;  %v5810_v28 = vor.u32 %v6639_v24, %v5807_v17  ;;  %v6029_v39 = vld [vmem:[%s7590_s22 + $0x258] sm:$0xf]  ;;  %v6623_v25 = vld [vmem:[%s7590_s22 + $0x1c] sm:$0xf] }
 0x68a   : > { %v6066_v61 = vor.u32 %v6703_v19, %v6063_v9  ;;  %v6699_v34 = vld [vmem:[%s7590_s22 + $0x274] sm:$0xf0]  ;;  %v5743_v2 = vld [vmem:[%s7590_s22 + $0x38] sm:$0xf0] }
 0x68b   : > { %v6030_v37 = vor.u32 %v6699_v34, %v6029_v39  ;;  %v5741_v50 = vld [vmem:[%s7590_s22 + $0x18] sm:$0xf]  ;;  %v6687_v21 = vld [vmem:[%s7590_s22 + $0x21c] sm:$0xf]  ;;  %v5746_v42 = vor.u32 %v6623_v25, %v5743_v2 }
 0x68c   : > { %3608 = vmatpush.bf16.msrb.mxu3 %v6194_v45  ;;  %3552 = vmatpush.bf16.msrb.mxu0 %v5902_v55  ;;  %v6631_v45 = vld [vmem:[%s7590_s22 + $0x5c] sm:$0xf]  ;;  %v6627_v55 = vld [vmem:[%s7590_s22 + $0x34] sm:$0xf0] }
 0x68d   : > { %3571 = vmatpush.bf16.msrb.mxu1 %v6158_v38  ;;  %3590 = vmatpush.bf16.msrb.mxu2 %v5906_v51  ;;  %v5778_v38 = vor.u32 %v6631_v45, %v5775_v54  ;;  %v6034_v51 = vor.u32 %v6695_v44, %v6031_v49  ;;  %v6691_v23 = vld [vmem:[%s7590_s22 + $0x234] sm:$0xf0]  ;;  %v5999_v13 = vld [vmem:[%s7590_s22 + $0x238] sm:$0xf0]  ;;  %v5742_v36 = vor.u32 %v6627_v55, %v5741_v50 }
 0x690   : > { %3609 = vmatpush.bf16.msrb.mxu3 %v6162_v56  ;;  %3553 = vmatpush.bf16.msrb.mxu0 %v5870_v31  ;;  %v5997_v56 = vld [vmem:[%s7590_s22 + $0x218] sm:$0xf]  ;;  %v6002_v31 = vor.u32 %v6687_v21, %v5999_v13 }
 0x691   : > { %3572 = vmatpush.bf16.msrb.mxu1 %v6126_v10  ;;  %3591 = vmatpush.bf16.msrb.mxu2 %v5874_v41  ;;  %v5998_v8 = vor.u32 %v6691_v23, %v5997_v56 }
 0x692   : > { %3411 = vmatmul.bf16.gmra.mxu0 %v8655_v7  ;;  %3430 = vmatmul.bf16.gmra.mxu1 %v8657_v63 }
 0x693   : > { %3449 = vmatmul.bf16.gmra.mxu2 %v8655_v7  ;;  %3468 = vmatmul.bf16.gmra.mxu3 %v8657_v63 }
 0x694   : > { %3610 = vmatpush.bf16.msrb.mxu3 %v6130_v20  ;;  %3554 = vmatpush.bf16.msrb.mxu0 %v5838_v58 }
 0x695   : > { %3573 = vmatpush.bf16.msrb.mxu1 %v6094_v11  ;;  %3592 = vmatpush.bf16.msrb.mxu2 %v5842_v48 }
 0x698   : > { %3611 = vmatpush.bf16.msrb.mxu3 %v6098_v12  ;;  %3555 = vmatpush.bf16.msrb.mxu0 %v5806_v22 }
 0x699   : > { %3574 = vmatpush.bf16.msrb.mxu1 %v6062_v27  ;;  %3593 = vmatpush.bf16.msrb.mxu2 %v5810_v28 }
 0x69c   : > { %3612 = vmatpush.bf16.msrb.mxu3 %v6066_v61  ;;  %3556 = vmatpush.bf16.msrb.mxu0 %v5774_v3 }
 0x69d   : > { %3575 = vmatpush.bf16.msrb.mxu1 %v6030_v37  ;;  %3594 = vmatpush.bf16.msrb.mxu2 %v5778_v38 }
 0x6a0   : > { %3613 = vmatpush.bf16.msrb.mxu3 %v6034_v51  ;;  %3557 = vmatpush.bf16.msrb.mxu0 %v5742_v36 }
 0x6a1   : > { %3576 = vmatpush.bf16.msrb.mxu1 %v5998_v8  ;;  %3595 = vmatpush.bf16.msrb.mxu2 %v5746_v42 }
 0x6a2   : > { %3482 = vmatmul.bf16.vlgmr.msra.gmra.mxu0 %v8574_v40  ;;  %3501 = vmatmul.bf16.vlgmr.msra.gmra.mxu1 %v8576_v5 }
 0x6a3   : > { %3520 = vmatmul.bf16.vlgmr.msra.gmra.mxu2 %v8574_v40  ;;  %3539 = vmatmul.bf16.vlgmr.msra.gmra.mxu3 %v8576_v5 }
 0x6a4   : > { %3614 = vmatpush.bf16.msrb.mxu3 %v6002_v31 }
 0x6b2   : > { %3487 = vmatmul.bf16.gmra.mxu0 %v8655_v7  ;;  %3506 = vmatmul.bf16.gmra.mxu1 %v8657_v63 }
 0x6b3   : > { %3525 = vmatmul.bf16.gmra.mxu2 %v8655_v7  ;;  %3544 = vmatmul.bf16.gmra.mxu3 %v8657_v63 }
 0x6c2   : > { %3558 = vmatmul.bf16.vlgmr.msrb.gmra.mxu0 %v8574_v40  ;;  %3577 = vmatmul.bf16.vlgmr.msrb.gmra.mxu1 %v8576_v5 }
 0x6c3   : > { %3596 = vmatmul.bf16.vlgmr.msrb.gmra.mxu2 %v8574_v40  ;;  %3615 = vmatmul.bf16.vlgmr.msrb.gmra.mxu3 %v8576_v5 }
 0x6d2   : > { %3563 = vmatmul.bf16.gmra.mxu0 %v8655_v7  ;;  %3582 = vmatmul.bf16.gmra.mxu1 %v8657_v63 }
 0x6d3   : > { %3601 = vmatmul.bf16.gmra.mxu2 %v8655_v7  ;;  %3620 = vmatmul.bf16.gmra.mxu3 %v8657_v63 }
 0x6dc   : > { %v3331_v10 = vpop.f32.mrf.mxu0  ;;  %v3350_v41 = vpop.f32.mrf.mxu1 }
 0x6dd   : > { %v8783_v20 = vadd.f32 %v3350_v41, %v3331_v10 }
 0x6df   : > { %v8786_v46 = vmul.f32 0.70710677, %v8783_v20 }
 0x6e1   : > { %v8789_v18 = vand.u32 2147483647, %v8786_v46  ;;  %vm3658_vm8 = vcmp.ge.f32.partialorder %v8786_v46, 0.0 }
 0x6e3   : > { %v3706_v40 = vmul.f32 0.3275911, %v8789_v18  ;;  %v3369_v5 = vpop.f32.mrf.mxu2  ;;  %v3388_v43 = vpop.f32.mrf.mxu3 }
 0x6e4   : > { %v8792_v1 = vadd.f32 %v3388_v43, %v3369_v5  ;;  %v3333_v60 = vpop.f32.mrf.mxu0  ;;  %v3352_v7 = vpop.f32.mrf.mxu1 }
 0x6e5   : > { %v3722_v4 = vadd.f32 1.0, %v3706_v40  ;;  %v8794_v63 = vadd.f32 %v3352_v7, %v3333_v60 }
 0x6e6   : > { %v8797_v58 = vmul.f32 0.70710677, %v8792_v1 }
 0x6e7   : > { %6981 = vrcp.f32 %v3722_v4  ;;  %v8803_v52 = vmul.f32 0.70710677, %v8794_v63  ;;  %v3749_v33 = vand.u32 2147483648, %v3722_v4  ;;  %v3747_v61 = vand.u32 2147483647, %v3722_v4 }
 0x6e8   : > { %v8800_v11 = vand.u32 2147483647, %v8797_v58  ;;  %vm3743_vm0 = vweird.f32 %v3722_v4  ;;  %vm3659_vm13 = vcmp.ge.f32.partialorder %v8797_v58, 0.0 }
 0x6e9   : > { %v8807_v29 = vand.u32 2147483647, %v8803_v52  ;;  %v3750_v44 = vor.u32 1.1754944e-38, %v3749_v33  ;;  %vm3748_vm2 = vcmp.eq.f32.partialorder %v3747_v61, 8.507059e+37 }
 0x6ea   : > { %v3707_v15 = vmul.f32 0.3275911, %v8800_v11 }
 0x6eb   : > { %v3371_v48 = vpop.f32.mrf.mxu2  ;;  %v3390_v12 = vpop.f32.mrf.mxu3  ;;  %v3710_v24 = vmul.f32 0.3275911, %v8807_v29 }
 0x6ec   : > { %v3723_v47 = vadd.f32 1.0, %v3707_v15  ;;  %v8809_v32 = vadd.f32 %v3390_v12, %v3371_v48  ;;  %v4122_v15 = vsub.f32 0.0, %v8789_v18 }
 0x6ed   : > { %v6982_v59 = vpop.eup %6981  ;;  %v8812_v19 = vadd.f32 1.0, %v3710_v24 }
 0x6ee   : > { %v3739_v17 = vmul.f32 %v6982_v59, %v3722_v4  ;;  %6983 = vrcp.f32 %v3723_v47  ;;  %v8815_v22 = vmul.f32 0.70710677, %v8809_v32  ;;  %vm3744_vm14 = vweird.f32 %v6982_v59 }
 0x6ef   : > { %v3336_v27 = vpop.f32.mrf.mxu0  ;;  %v3355_v30 = vpop.f32.mrf.mxu1  ;;  %6985 = vrcp.f32 %v8812_v19  ;;  %vm3745_vm1 = vmor %vm3743_vm0, %vm3744_vm14  ;;  %v3762_v51 = vand.u32 2147483647, %v3723_v47  ;;  %v3764_v25 = vand.u32 2147483648, %v3723_v47  ;;  %vm3758_vm3 = vweird.f32 %v3723_v47 }
 0x6f0   : > { %v3740_v9 = vsub.f32 1.0, %v3739_v17  ;;  %v8819_v39 = vand.u32 2147483647, %v8815_v22  ;;  %v8821_v34 = vadd.f32 %v3355_v30, %v3336_v27  ;;  %v3807_v40 = vand.u32 2147483647, %v8812_v19 }
 0x6f1   : > { %vm3763_vm4 = vcmp.eq.f32.partialorder %v3762_v51, 8.507059e+37  ;;  %v3765_v41 = vor.u32 1.1754944e-38, %v3764_v25  ;;  %v3809_v5 = vand.u32 2147483648, %v8812_v19  ;;  %vm3803_vm7 = vweird.f32 %v8812_v19 }
 0x6f2   : > { %v3741_v28 = vmul.f32 %v6982_v59, %v3740_v9  ;;  %v3711_v3 = vmul.f32 0.3275911, %v8819_v39  ;;  %v8825_v50 = vmul.f32 0.70710677, %v8821_v34  ;;  %vm3808_vm10 = vcmp.eq.f32.partialorder %v3807_v40, 8.507059e+37 }
 0x6f3   : > { %v3810_v9 = vor.u32 1.1754944e-38, %v3809_v5  ;;  %v4138_v61 = vmul.f32 %v4122_v15, %v8789_v18 }
 0x6f4   : > { %v6984_v45 = vpop.eup %6983  ;;  %v3742_v54 = vadd.f32 %v6982_v59, %v3741_v28  ;;  %v8829_v56 = vadd.f32 1.0, %v3711_v3  ;;  %v8832_v2 = vand.u32 2147483647, %v8825_v50 }
 0x6f5   : > { %v3754_v49 = vmul.f32 %v6984_v45, %v3723_v47  ;;  %v6986_v23 = vpop.eup %6985  ;;  %vm3759_vm15 = vweird.f32 %v6984_v45 }
 0x6f6   : > { %v3746_v37 = vsel %vm3745_vm1, %v6982_v59, %v3742_v54  ;;  %v3799_v36 = vmul.f32 %v6986_v23, %v8812_v19  ;;  %6987 = vrcp.f32 %v8829_v56  ;;  %v3374_v31 = vpop.f32.mrf.mxu2  ;;  %v3393_v10 = vpop.f32.mrf.mxu3  ;;  %vm3760_vm5 = vmor %vm3758_vm3, %vm3759_vm15  ;;  %v3714_v43 = vmul.f32 0.3275911, %v8832_v2 }
 0x6f7   : > { %v8827_v55 = vsel %vm3748_vm2, %v3750_v44, %v3746_v37  ;;  %v3755_v38 = vsub.f32 1.0, %v3754_v49  ;;  %vm3804_vm6 = vweird.f32 %v6986_v23  ;;  %v8845_v47 = vadd.f32 %v3393_v10, %v3374_v31 }
 0x6f8   : > { %v3978_v21 = vmul.f32 1.0614054, %v8827_v55  ;;  %v3800_v42 = vsub.f32 1.0, %v3799_v36  ;;  %v8843_v12 = vadd.f32 1.0, %v3714_v43  ;;  %vm3805_vm9 = vmor %vm3803_vm7, %vm3804_vm6  ;;  %v8860_v44 = vmul.f32 0.5, %v8783_v20 }
 0x6f9   : > { %v3756_v13 = vmul.f32 %v6984_v45, %v3755_v38  ;;  %v8857_v19 = vmul.f32 0.70710677, %v8845_v47  ;;  %v3824_v37 = vand.u32 2147483648, %v8829_v56  ;;  %v9822_v38 = vmov -1.0  }
 0x6fa   : > { %v3994_v60 = vadd.f32 -1.4531521, %v3978_v21  ;;  %v3801_v4 = vmul.f32 %v6986_v23, %v3800_v42  ;;  %6989 = vrcp.f32 %v8843_v12  ;;  %v8868_v18 = vsel %vm3658_vm8, 1.0, %v9822_v38 }
 0x6fb   : > { %v3757_v8 = vadd.f32 %v6984_v45, %v3756_v13  ;;  %v8872_v20 = vmul.f32 0.5, %v8792_v1  ;;  %v4123_v21 = vsub.f32 0.0, %v8800_v11  ;;  %vm3818_vm12 = vweird.f32 %v8829_v56 }
 0x6fc   : > { %v6988_v59 = vpop.eup %6987  ;;  %v3802_v17 = vadd.f32 %v6986_v23, %v3801_v4  ;;  %v4010_v30 = vmul.f32 %v3994_v60, %v8827_v55  ;;  %v8877_v46 = vand.u32 2147483647, %v8857_v19  ;;  %v3825_v10 = vor.u32 1.1754944e-38, %v3824_v37 }
 0x6fd   : > { %v3761_v7 = vsel %vm3760_vm5, %v6984_v45, %v3757_v8  ;;  %v3814_v27 = vmul.f32 %v6988_v59, %v8829_v56  ;;  %vm3819_vm11 = vweird.f32 %v6988_v59  ;;  %v4154_v8 = vmul.f32 1.442695, %v4138_v61 }
 0x6fe   : > { %v8841_v48 = vsel %vm3763_vm4, %v3765_v41, %v3761_v7  ;;  %v3806_v28 = vsel %vm3805_vm9, %v6986_v23, %v3802_v17  ;;  %v3822_v23 = vand.u32 2147483647, %v8829_v56  ;;  %v4026_v25 = vadd.f32 1.4214138, %v4010_v30  ;;  %vm3820_vm14 = vmor %vm3818_vm12, %vm3819_vm11 }
 0x6ff   : > { %v3979_v24 = vmul.f32 1.0614054, %v8841_v48  ;;  %v8854_v45 = vsel %vm3808_vm10, %v3810_v9, %v3806_v28  ;;  %v3815_v54 = vsub.f32 1.0, %v3814_v27  ;;  %v3715_v5 = vmul.f32 0.3275911, %v8877_v46  ;;  %v3338_v9 = vpop.f32.mrf.mxu0 }
 0x700   : > { %v3982_v3 = vmul.f32 1.0614054, %v8854_v45  ;;  %v6990_v36 = vpop.eup %6989  ;;  %vm3823_vm0 = vcmp.eq.f32.partialorder %v3822_v23, 8.507059e+37  ;;  %v4042_v43 = vmul.f32 %v4026_v25, %v8827_v55  ;;  %v4139_v56 = vmul.f32 %v4123_v21, %v8800_v11 }
 0x701   : > { %v3995_v33 = vadd.f32 -1.4531521, %v3979_v24  ;;  %v3816_v51 = vmul.f32 %v6988_v59, %v3815_v54  ;;  %v3859_v41 = vmul.f32 %v6990_v36, %v8843_v12  ;;  %v4126_v4 = vsub.f32 0.0, %v8807_v29 }
 0x702   : > { %v3998_v13 = vadd.f32 -1.4531521, %v3982_v3  ;;  %v3869_v24 = vand.u32 2147483648, %v8843_v12  ;;  %v8890_v17 = vadd.f32 1.0, %v3715_v5  ;;  %vm3864_vm1 = vweird.f32 %v6990_v36 }
 0x703   : > { %v4011_v49 = vmul.f32 %v3995_v33, %v8841_v48  ;;  %v3817_v42 = vadd.f32 %v6988_v59, %v3816_v51  ;;  %v3860_v7 = vsub.f32 1.0, %v3859_v41  ;;  %v3867_v33 = vand.u32 2147483647, %v8843_v12 }
 0x704   : > { %v4014_v1 = vmul.f32 %v3998_v13, %v8854_v45  ;;  %v8895_v11 = vmul.f32 0.5, %v8794_v63  ;;  %vm3863_vm2 = vweird.f32 %v8843_v12  ;;  %6991 = vrcp.f32 %v8890_v17 }
 0x705   : > { %v4027_v31 = vadd.f32 1.4214138, %v4011_v49  ;;  %v3821_v40 = vsel %vm3820_vm14, %v6988_v59, %v3817_v42  ;;  %v3357_v59 = vpop.f32.mrf.mxu1  ;;  %v3861_v30 = vmul.f32 %v6990_v36, %v3860_v7  ;;  %v4058_v61 = vadd.f32 -0.28449672, %v4042_v43  ;;  %vm3865_vm3 = vmor %vm3863_vm2, %vm3864_vm1  ;;  %v3376_v43 = vpop.f32.mrf.mxu2 }
 0x706   : > { %v8885_v60 = vsel %vm3823_vm0, %v3825_v10, %v3821_v40  ;;  %v4030_v28 = vadd.f32 1.4214138, %v4014_v1  ;;  %v8899_v3 = vadd.f32 %v3357_v59, %v3338_v9  ;;  %v8904_v37 = vsel %vm3659_vm13, 1.0, %v9822_v38 }
 0x707   : > { %v3983_v15 = vmul.f32 1.0614054, %v8885_v60  ;;  %v4043_v27 = vmul.f32 %v4027_v31, %v8841_v48  ;;  %v3862_v49 = vadd.f32 %v6990_v36, %v3861_v30  ;;  %vm3662_vm15 = vcmp.ge.f32.partialorder %v8803_v52, 0.0 }
 0x708   : > { %v4142_v63 = vmul.f32 %v4126_v4, %v8807_v29  ;;  %v3870_v51 = vor.u32 1.1754944e-38, %v3869_v24  ;;  %v4156_v12 = vmul.f32 1.442695, %v4139_v56  ;;  %vm3868_vm4 = vcmp.eq.f32.partialorder %v3867_v33, 8.507059e+37  ;;  %v3395_v56 = vpop.f32.mrf.mxu3 }
 0x709   : > { %v3999_v54 = vadd.f32 -1.4531521, %v3983_v15  ;;  %v4059_v23 = vadd.f32 -0.28449672, %v4043_v27  ;;  %v3866_v25 = vsel %vm3865_vm3, %v6990_v36, %v3862_v49  ;;  %6993 = vpow2.f32 %v4154_v8 }
 0x70a   : > { %v4046_v21 = vmul.f32 %v4030_v28, %v8854_v45  ;;  %v4127_v13 = vsub.f32 0.0, %v8819_v39  ;;  %v8910_v42 = vsel %vm3868_vm4, %v3870_v51, %v3866_v25  ;;  %v4074_v58 = vmul.f32 %v4058_v61, %v8827_v55  ;;  %v8918_v10 = vpop.eup %6991  ;;  %v3407_v28 = vpop.f32.mrf.mxu0 }
 0x70b   : > { %vm3663_vm5 = vcmp.ge.f32.partialorder %v8815_v22, 0.0  ;;  %v4015_v31 = vmul.f32 %v3999_v54, %v8885_v60  ;;  %v8916_v29 = vmul.f32 0.70710677, %v8899_v3  ;;  %v8923_v36 = vsel %vm3662_vm15, 1.0, %v9822_v38 }
 0x70c   : > { %v4162_v8 = vmul.f32 1.442695, %v4142_v63  ;;  %v8926_v41 = vmul.f32 0.5, %v8809_v32  ;;  %v3986_v1 = vmul.f32 1.0614054, %v8910_v42  ;;  %v4075_v22 = vmul.f32 %v4059_v23, %v8841_v48 }
 0x70d   : > { %6995 = vpow2.f32 %v4156_v12  ;;  %v4130_v40 = vsub.f32 0.0, %v8832_v2  ;;  %v3874_v5 = vmul.f32 %v8918_v10, %v8890_v17  ;;  %v4062_v7 = vadd.f32 -0.28449672, %v4046_v21  ;;  %v3426_v61 = vpop.f32.mrf.mxu1 }
 0x70e   : > { %v8934_v52 = vsel %vm3663_vm5, 1.0, %v9822_v38  ;;  %v4143_v4 = vmul.f32 %v4127_v13, %v8819_v39  ;;  %v8938_v32 = vand.u32 2147483647, %v8916_v29  ;;  %v4090_v15 = vadd.f32 0.2548296, %v4074_v58 }
 0x70f   : > { %v4031_v24 = vadd.f32 1.4214138, %v4015_v31  ;;  %vm3666_vm6 = vcmp.ge.f32.partialorder %v8825_v50, 0.0  ;;  %v3875_v9 = vsub.f32 1.0, %v3874_v5  ;;  %v6994_v59 = vpop.eup %6993  ;;  %6997 = vpow2.f32 %v4162_v8 }
 0x710   : > { %v4002_v27 = vadd.f32 -1.4531521, %v3986_v1  ;;  %v3718_v30 = vmul.f32 0.3275911, %v8938_v32  ;;  %v8942_v33 = vadd.f32 %v3395_v56, %v3376_v43  ;;  %v4091_v54 = vadd.f32 0.2548296, %v4075_v22 }
 0x711   : > { %v8945_v39 = vmul.f32 0.5, %v8821_v34  ;;  %v4146_v49 = vmul.f32 %v4130_v40, %v8832_v2  ;;  %v3876_v63 = vmul.f32 %v8918_v10, %v3875_v9  ;;  %v4078_v50 = vmul.f32 %v4062_v7, %v8854_v45 }
 0x712   : > { %v4164_v51 = vmul.f32 1.442695, %v4143_v4  ;;  %v8951_v23 = vsel %vm3666_vm6, 1.0, %v9822_v38  ;;  %v8953_v12 = vadd.f32 1.0, %v3718_v30  ;;  %v4106_v21 = vmul.f32 %v4090_v15, %v8827_v55  ;;  %v3445_v15 = vpop.f32.mrf.mxu2 }
 0x713   : > { %v6996_v25 = vpop.eup %6995  ;;  %v4047_v13 = vmul.f32 %v4031_v24, %v8885_v60  ;;  %vm3879_vm7 = vweird.f32 %v8918_v10  ;;  %v8958_v34 = vadd.f32 %v3426_v61, %v3407_v28  ;;  %v4018_v2 = vmul.f32 %v4002_v27, %v8910_v42  ;;  %v3464_v24 = vpop.f32.mrf.mxu3 }
 0x714   : > { %v3877_v58 = vadd.f32 %v8918_v10, %v3876_v63  ;;  %6999 = vrcp.f32 %v8953_v12  ;;  %v8964_v31 = vmul.f32 0.70710677, %v8942_v33  ;;  %v4107_v8 = vmul.f32 %v4091_v54, %v8841_v48 }
 0x715   : > { %v4170_v1 = vmul.f32 1.442695, %v4146_v49  ;;  %v3884_v55 = vand.u32 2147483648, %v8890_v17  ;;  %v4131_v22 = vsub.f32 0.0, %v8877_v46  ;;  %v6998_v40 = vpop.eup %6997  ;;  %v4094_v5 = vadd.f32 0.2548296, %v4078_v50 }
 0x716   : > { %7001 = vpow2.f32 %v4164_v51  ;;  %vm3878_vm8 = vweird.f32 %v8890_v17  ;;  %v3882_v43 = vand.u32 2147483647, %v8890_v17  ;;  %v4186_v56 = vmul.f32 %v6994_v59, %v4106_v21 }
 0x717   : > { %v4063_v7 = vadd.f32 -0.28449672, %v4047_v13  ;;  %v8972_v4 = vmul.f32 0.5, %v8845_v47  ;;  %vm3667_vm9 = vcmp.ge.f32.partialorder %v8857_v19, 0.0  ;;  %vm8977_vm10 = vmor %vm3878_vm8, %vm3879_vm7  ;;  %v4034_v9 = vadd.f32 1.4214138, %v4018_v2 }
 0x718   : > { %v3881_v17 = vsel %vm8977_vm10, %v8918_v10, %v3877_v58  ;;  %v8985_v59 = vand.u32 2147483647, %v8964_v31  ;;  %v8988_v47 = vmul.f32 0.70710677, %v8958_v34  ;;  %v4187_v27 = vmul.f32 %v6996_v25, %v4107_v8 }
 0x719   : > { %9881 = vst [vmem:[#allocation30_spill] sm:$0xff] %v8972_v4  ;;  %7003 = vpow2.f32 %v4170_v1  ;;  %v3885_v30 = vor.u32 1.1754944e-38, %v3884_v55  ;;  %v4147_v28 = vmul.f32 %v4131_v22, %v8877_v46  ;;  %v4110_v54 = vmul.f32 %v4094_v5, %v8854_v45 }
 0x71a   : > { %v7000_v61 = vpop.eup %6999  ;;  %vm3883_vm11 = vcmp.eq.f32.partialorder %v3882_v43, 8.507059e+37  ;;  %v3719_v49 = vmul.f32 0.3275911, %v8985_v59  ;;  %v8993_v63 = vadd.f32 %v3464_v24, %v3445_v15  ;;  %v4079_v10 = vmul.f32 %v4063_v7, %v8885_v60 }
 0x71b   : > { %v8999_v50 = vsel %vm3667_vm9, 1.0, %v9822_v38  ;;  %v9001_v51 = vsel %vm3883_vm11, %v3885_v30, %v3881_v17  ;;  %v3919_v25 = vmul.f32 %v7000_v61, %v8953_v12  ;;  %v4202_v21 = vsub.f32 1.0, %v4186_v56 }
 0x71c   : > { %9884 = vst [vmem:[#allocation31_spill] sm:$0xff] %v8993_v63  ;;  %v7002_v46 = vpop.eup %7001  ;;  %v4050_v45 = vmul.f32 %v4034_v9, %v8910_v42  ;;  %v9005_v13 = vadd.f32 1.0, %v3719_v49  ;;  %v9008_v2 = vand.u32 2147483647, %v8988_v47  ;;  %v4203_v58 = vsub.f32 1.0, %v4187_v27 }
 0x71d   : > { %v4172_v8 = vmul.f32 1.442695, %v4147_v28  ;;  %v9011_v1 = vmul.f32 0.5, %v8899_v3  ;;  %v3920_v19 = vsub.f32 1.0, %v3919_v25  ;;  %v4190_v55 = vmul.f32 %v6998_v40, %v4110_v54  ;;  %v3409_v25 = vpop.f32.mrf.mxu0 }
 0x71e   : > { %v3987_v22 = vmul.f32 1.0614054, %v9001_v51  ;;  %7005 = vrcp.f32 %v9005_v13  ;;  %v9016_v5 = vmul.f32 0.70710677, %v8993_v63  ;;  %v4095_v56 = vadd.f32 0.2548296, %v4079_v10 }
 0x71f   : > { %v9018_v43 = vpop.eup %7003  ;;  %v3921_v7 = vmul.f32 %v7000_v61, %v3920_v19  ;;  %vm3924_vm12 = vweird.f32 %v7000_v61  ;;  %v4134_v48 = vsub.f32 0.0, %v8938_v32  ;;  %v9022_v15 = vmul.f32 %v4202_v21, %v8868_v18 }
 0x720   : > { %v4066_v3 = vadd.f32 -0.28449672, %v4050_v45  ;;  %v3929_v40 = vand.u32 2147483648, %v8953_v12  ;;  %v3708_v24 = vmul.f32 0.3275911, %v9008_v2  ;;  %7007 = vpow2.f32 %v4172_v8 }
 0x721   : > { %v3922_v9 = vadd.f32 %v7000_v61, %v3921_v7  ;;  %vm3923_vm13 = vweird.f32 %v8953_v12  ;;  %v3927_v17 = vand.u32 2147483647, %v8953_v12  ;;  %v4003_v27 = vadd.f32 -1.4531521, %v3987_v22 }
 0x722   : > { %vm3670_vm14 = vcmp.ge.f32.partialorder %v8916_v29, 0.0  ;;  %vm9029_vm0 = vmor %vm3923_vm13, %vm3924_vm12  ;;  %v9033_v18 = vadd.f32 1.0, %v3708_v24  ;;  %v9036_v28 = vand.u32 2147483647, %v9016_v5  ;;  %v9039_v54 = vmul.f32 %v4203_v58, %v8904_v37  ;;  %v3428_v29 = vpop.f32.mrf.mxu1 }
 0x723   : > { %v4206_v49 = vsub.f32 1.0, %v4190_v55  ;;  %v3926_v10 = vsel %vm9029_vm0, %v7000_v61, %v3922_v9  ;;  %v4150_v12 = vmul.f32 %v4134_v48, %v8938_v32  ;;  %v4111_v45 = vmul.f32 %v4095_v56, %v8885_v60 }
 0x724   : > { %v7006_v21 = vpop.eup %7005  ;;  %v4082_v8 = vmul.f32 %v4066_v3, %v8910_v42  ;;  %v3930_v19 = vor.u32 1.1754944e-38, %v3929_v40  ;;  %7009 = vrcp.f32 %v9033_v18  ;;  %v9048_v22 = vsel %vm3670_vm14, 1.0, %v9822_v38 }
 0x725   : > { %vm3928_vm1 = vcmp.eq.f32.partialorder %v3927_v17, 8.507059e+37  ;;  %v9051_v37 = vmul.f32 0.5, %v8942_v33  ;;  %v3934_v61 = vmul.f32 %v7006_v21, %v9005_v13  ;;  %v4019_v32 = vmul.f32 %v4003_v27, %v9001_v51 }
 0x726   : > { %v9055_v58 = vsel %vm3928_vm1, %v3930_v19, %v3926_v10  ;;  %v3709_v60 = vmul.f32 0.3275911, %v9036_v28  ;;  %v9058_v55 = vadd.f32 %v3428_v29, %v3409_v25  ;;  %v9060_v56 = vpop.eup %7007  ;;  %v9063_v7 = vmul.f32 %v4206_v49, %v8923_v36 }
 0x727   : > { %v4178_v48 = vmul.f32 1.442695, %v4150_v12  ;;  %v3935_v3 = vsub.f32 1.0, %v3934_v61  ;;  %v9066_v33 = vmul.f32 0.5, %v8958_v34  ;;  %v9068_v40 = vmul.f32 %v7002_v46, %v4111_v45 }
 0x728   : > { %v4098_v24 = vadd.f32 0.2548296, %v4082_v8  ;;  %v3944_v9 = vand.u32 2147483648, %v9005_v13  ;;  %v9071_v17 = vadd.f32 1.0, %v3709_v60  ;;  %v3990_v27 = vmul.f32 1.0614054, %v9055_v58 }
 0x729   : > { %9887 = vst [vmem:[#allocation32_spill] sm:$0xff] %v9066_v33  ;;  %v3936_v30 = vmul.f32 %v7006_v21, %v3935_v3  ;;  %vm3939_vm2 = vweird.f32 %v7006_v21  ;;  %v3942_v10 = vand.u32 2147483647, %v9005_v13  ;;  %v4035_v49 = vadd.f32 1.4214138, %v4019_v32 }
 0x72a   : > { %v7010_v36 = vpop.eup %7009  ;;  %vm3671_vm15 = vcmp.ge.f32.partialorder %v8964_v31, 0.0  ;;  %7011 = vrcp.f32 %v9071_v17  ;;  %v9078_v34 = vmul.f32 0.70710677, %v9058_v55  ;;  %vm3938_vm3 = vweird.f32 %v9005_v13  ;;  %v6777_v33 = vld [vmem:[%s7592_s13 + $0xe4] sm:$0xf0] }
 0x72b   : > { %7013 = vpow2.f32 %v4178_v48  ;;  %v3937_v46 = vadd.f32 %v7006_v21, %v3936_v30  ;;  %v3769_v12 = vmul.f32 %v7010_v36, %v9033_v18  ;;  %v4207_v25 = vsub.f32 1.0, %v9068_v40  ;;  %vm3940_vm4 = vmor %vm3938_vm3, %vm3939_vm2 }
 0x72c   : > { %v4114_v29 = vmul.f32 %v4098_v24, %v8910_v42  ;;  %v3945_v45 = vor.u32 1.1754944e-38, %v3944_v9  ;;  %v4135_v8 = vsub.f32 0.0, %v8985_v59  ;;  %v4006_v19 = vadd.f32 -1.4531521, %v3990_v27  ;;  %v3447_v9 = vpop.f32.mrf.mxu2  ;;  %v3466_v27 = vpop.f32.mrf.mxu3 }
 0x72d   : > { %v3941_v61 = vsel %vm3940_vm4, %v7006_v21, %v3937_v46  ;;  %vm3943_vm5 = vcmp.eq.f32.partialorder %v3942_v10, 8.507059e+37  ;;  %v3770_v32 = vsub.f32 1.0, %v3769_v12  ;;  %v4051_v60 = vmul.f32 %v4035_v49, %v9001_v51 }
 0x72e   : > { %v9086_v48 = vsel %vm3943_vm5, %v3945_v45, %v3941_v61  ;;  %v3779_v13 = vand.u32 2147483648, %v9033_v18  ;;  %v9090_v3 = vand.u32 2147483647, %v9078_v34  ;;  %vm3774_vm6 = vweird.f32 %v7010_v36 }
 0x72f   : > { %v3991_v40 = vmul.f32 1.0614054, %v9086_v48  ;;  %v3771_v42 = vmul.f32 %v7010_v36, %v3770_v32  ;;  %v3777_v24 = vand.u32 2147483647, %v9033_v18  ;;  %v4194_v30 = vmul.f32 %v9018_v43, %v4114_v29 }
 0x730   : > { %v7012_v21 = vpop.eup %7011  ;;  %v9098_v10 = vsel %vm3671_vm15, 1.0, %v9822_v38  ;;  %v4151_v49 = vmul.f32 %v4135_v8, %v8985_v59  ;;  %v3712_v46 = vmul.f32 0.3275911, %v9090_v3  ;;  %v4022_v45 = vmul.f32 %v4006_v19, %v9055_v58 }
 0x731   : > { %v9102_v12 = vpop.eup %7013  ;;  %v3772_v61 = vadd.f32 %v7010_v36, %v3771_v42  ;;  %vm3773_vm7 = vweird.f32 %v9033_v18  ;;  %v3784_v32 = vmul.f32 %v7012_v21, %v9071_v17  ;;  %v4067_v26 = vadd.f32 -0.28449672, %v4051_v60 }
 0x732   : > { %vm3775_vm8 = vmor %vm3773_vm7, %vm3774_vm6  ;;  %v3780_v43 = vor.u32 1.1754944e-38, %v3779_v13  ;;  %v9108_v31 = vadd.f32 1.0, %v3712_v46  ;;  %v9110_v29 = vadd.f32 %v3466_v27, %v3447_v9  ;;  %v4007_v59 = vadd.f32 -1.4531521, %v3991_v40 }
 0x733   : > { %v3776_v8 = vsel %vm3775_vm8, %v7010_v36, %v3772_v61  ;;  %vm3778_vm9 = vcmp.eq.f32.partialorder %v3777_v24, 8.507059e+37  ;;  %v3785_v38 = vsub.f32 1.0, %v3784_v32  ;;  %v4124_v19 = vsub.f32 0.0, %v9008_v2 }
 0x734   : > { %v9112_v16 = vsel %vm3778_vm9, %v3780_v43, %v3776_v8  ;;  %v3794_v18 = vand.u32 2147483648, %v9071_v17  ;;  %7015 = vrcp.f32 %v9108_v31  ;;  %v4038_v60 = vadd.f32 1.4214138, %v4022_v45  ;;  %v3431_v8 = vpop.f32.mrf.mxu1 }
 0x735   : > { %v3786_v42 = vmul.f32 %v7012_v21, %v3785_v38  ;;  %vm3789_vm10 = vweird.f32 %v7012_v21  ;;  %v3792_v13 = vand.u32 2147483647, %v9071_v17  ;;  %v4210_v46 = vsub.f32 1.0, %v4194_v30 }
 0x736   : > { %v4083_v9 = vmul.f32 %v4067_v26, %v9001_v51  ;;  %vm3660_vm11 = vcmp.ge.f32.partialorder %v8988_v47, 0.0  ;;  %v9121_v36 = vmul.f32 0.70710677, %v9110_v29  ;;  %v4023_v40 = vmul.f32 %v4007_v59, %v9086_v48  ;;  %v3412_v59 = vpop.f32.mrf.mxu0 }
 0x737   : > { %v3980_v24 = vmul.f32 1.0614054, %v9112_v16  ;;  %v3787_v27 = vadd.f32 %v7012_v21, %v3786_v42  ;;  %vm3788_vm12 = vweird.f32 %v9071_v17  ;;  %v9127_v38 = vmul.f32 %v4207_v25, %v8934_v52 }
 0x738   : > { %v4140_v45 = vmul.f32 %v4124_v19, %v9008_v2  ;;  %vm3790_vm13 = vmor %vm3788_vm12, %vm3789_vm10  ;;  %v3795_v30 = vor.u32 1.1754944e-38, %v3794_v18  ;;  %v9131_v26 = vand.u32 2147483647, %v9121_v36  ;;  %v4054_v61 = vmul.f32 %v4038_v60, %v9055_v58 }
 0x739   : > { %v4180_v32 = vmul.f32 1.442695, %v4151_v49  ;;  %v3791_v43 = vsel %vm3790_vm13, %v7012_v21, %v3787_v27  ;;  %vm3793_vm14 = vcmp.eq.f32.partialorder %v3792_v13, 8.507059e+37  ;;  %v4099_v0 = vadd.f32 0.2548296, %v4083_v9 }
 0x73a   : > { %v7016_v42 = vpop.eup %7015  ;;  %v9888_v17 = vmov -1.0   ;;  %v9139_v2 = vsel %vm3793_vm14, %v3795_v30, %v3791_v43  ;;  %v3713_v25 = vmul.f32 0.3275911, %v9131_v26  ;;  %v9143_v19 = vmul.f32 %v4210_v46, %v8951_v23 }
 0x73b   : > { %v9137_v52 = vsel %vm3660_vm11, 1.0, %v9888_v17  ;;  %v4039_v18 = vadd.f32 1.4214138, %v4023_v40  ;;  %v3996_v49 = vadd.f32 -1.4531521, %v3980_v24  ;;  %vm3661_vm0 = vcmp.ge.f32.partialorder %v9016_v5, 0.0 }
 0x73c   : > { %v4158_v21 = vmul.f32 1.442695, %v4140_v45  ;;  %v3829_v60 = vmul.f32 %v7016_v42, %v9108_v31  ;;  %v9147_v13 = vadd.f32 1.0, %v3713_v25  ;;  %v9149_v9 = vadd.f32 %v3431_v8, %v3412_v59  ;;  %v6285_v25 = vld [vmem:[%s7592_s13 + $0x70] sm:$0xf] }
 0x73d   : > { %v4070_v47 = vadd.f32 -0.28449672, %v4054_v61  ;;  %7017 = vpow2.f32 %v4180_v32  ;;  %v3981_v27 = vmul.f32 1.0614054, %v9139_v2  ;;  %v4125_v30 = vsub.f32 0.0, %v9036_v28 }
 0x73e   : > { %9889 = vst [vmem:[#allocation33_spill] sm:$0xff] %v9149_v9  ;;  %v4115_v23 = vmul.f32 %v4099_v0, %v9001_v51  ;;  %v9155_v46 = vsel %vm3661_vm0, 1.0, %v9888_v17  ;;  %v3830_v5 = vsub.f32 1.0, %v3829_v60  ;;  %7019 = vrcp.f32 %v9147_v13 }
 0x73f   : > { %9890 = vst [vmem:[#allocation34_spill] sm:$0xff] %v9155_v46  ;;  %v4055_v40 = vmul.f32 %v4039_v18, %v9086_v48  ;;  %v4012_v24 = vmul.f32 %v3996_v49, %v9112_v16  ;;  %v9161_v45 = vmul.f32 0.5, %v9058_v55  ;;  %v3839_v61 = vand.u32 2147483648, %v9108_v31  ;;  %v6763_v18 = vld [vmem:[%s7592_s13 + $0x74] sm:$0xf0] }
 0x740   : > { %v3831_v32 = vmul.f32 %v7016_v42, %v3830_v5  ;;  %vm3834_vm1 = vweird.f32 %v7016_v42  ;;  %v3837_v0 = vand.u32 2147483647, %v9108_v31  ;;  %v9166_v51 = vmul.f32 0.70710677, %v9149_v9  ;;  %v6277_v5 = vld [vmem:[%s7592_s13 + $0x60] sm:$0xf]  ;;  %v3433_v9 = vpop.f32.mrf.mxu1 }
 0x741   : > { %9891 = vst [vmem:[#allocation35_spill] sm:$0xff] %v9161_v45  ;;  %v4086_v43 = vmul.f32 %v4070_v47, %v9055_v58  ;;  %7021 = vpow2.f32 %v4158_v21  ;;  %v3997_v59 = vadd.f32 -1.4531521, %v3981_v27  ;;  %v4141_v8 = vmul.f32 %v4125_v30, %v9036_v28 }
 0x742   : > { %9892 = vst [vmem:[#allocation36_spill] sm:$0xff] %v9166_v51  ;;  %v9173_v55 = vmul.f32 %v9060_v56, %v4115_v23  ;;  %v3832_v49 = vadd.f32 %v7016_v42, %v3831_v32  ;;  %vm3833_vm2 = vweird.f32 %v9108_v31  ;;  %v9177_v60 = vand.u32 2147483647, %v9166_v51  ;;  %v6761_v32 = vld [vmem:[%s7592_s13 + $0x64] sm:$0xf0] }
 0x743   : > { %v9180_v14 = vpop.eup %7017  ;;  %v4071_v47 = vadd.f32 -0.28449672, %v4055_v40  ;;  %v4028_v21 = vadd.f32 1.4214138, %v4012_v24  ;;  %vm3835_vm15 = vmor %vm3833_vm2, %vm3834_vm1  ;;  %v3840_v28 = vor.u32 1.1754944e-38, %v3839_v61  ;;  %v4128_v27 = vsub.f32 0.0, %v9090_v3  ;;  %v3450_v40 = vpop.f32.mrf.mxu2 }
 0x744   : > { %v9184_v30 = vpop.eup %7019  ;;  %v3836_v56 = vsel %vm3835_vm15, %v7016_v42, %v3832_v49  ;;  %vm3838_vm3 = vcmp.eq.f32.partialorder %v3837_v0, 8.507059e+37  ;;  %v3716_v23 = vmul.f32 0.3275911, %v9177_v60  ;;  %v6286_v31 = vor.u32 %v6763_v18, %v6285_v25  ;;  %v3469_v24 = vpop.f32.mrf.mxu3  ;;  %v6762_v51 = vld [vmem:[%s7592_s13 + $0x74] sm:$0xf] }
 0x745   : > { %v4102_v35 = vadd.f32 0.2548296, %v4086_v43  ;;  %v4013_v62 = vmul.f32 %v3997_v59, %v9139_v2  ;;  %v4160_v53 = vmul.f32 1.442695, %v4141_v8  ;;  %v9189_v57 = vsel %vm3838_vm3, %v3840_v28, %v3836_v56  ;;  %v3414_v61 = vpop.f32.mrf.mxu0 }
 0x746   : > { %v3984_v6 = vmul.f32 1.0614054, %v9189_v57  ;;  %v3844_v42 = vmul.f32 %v9184_v30, %v9147_v13  ;;  %v9195_v0 = vadd.f32 1.0, %v3716_v23  ;;  %4674 = vmatpush.bf16.msra.mxu0 %v6286_v31  ;;  %v4087_v59 = vmul.f32 %v4071_v47, %v9086_v48  ;;  %v6349_v23 = vld [vmem:[%s7592_s13 + $0xf0] sm:$0xf] }
 0x747   : > { %v9197_v43 = vpop.eup %7021  ;;  %v4044_v8 = vmul.f32 %v4028_v21, %v9112_v16  ;;  %v4144_v25 = vmul.f32 %v4128_v27, %v9090_v3  ;;  %v6278_v18 = vor.u32 %v6761_v32, %v6277_v5  ;;  %v3852_v56 = vand.u32 2147483647, %v9147_v13  ;;  %v6779_v31 = vld [vmem:[%s7592_s13 + $0xf4] sm:$0xf0]  ;;  %v6269_v5 = vld [vmem:[%s7592_s13 + $0x50] sm:$0xf] }
 0x748   : > { %v4000_v49 = vadd.f32 -1.4531521, %v3984_v6  ;;  %v3845_v28 = vsub.f32 1.0, %v3844_v42  ;;  %7023 = vrcp.f32 %v9195_v0  ;;  %v4118_v47 = vmul.f32 %v4102_v35, %v9055_v58  ;;  %v6759_v32 = vld [vmem:[%s7592_s13 + $0x54] sm:$0xf0] }
 0x749   : > { %v4029_v63 = vadd.f32 1.4214138, %v4013_v62  ;;  %7025 = vpow2.f32 %v4160_v53  ;;  %v3854_v3 = vand.u32 2147483648, %v9147_v13  ;;  %vm3849_vm4 = vweird.f32 %v9184_v30  ;;  %v6341_v42 = vld [vmem:[%s7592_s13 + $0xe0] sm:$0xf] }
 0x74a   : > { %v4016_v6 = vmul.f32 %v4000_v49, %v9189_v57  ;;  %v3846_v21 = vmul.f32 %v9184_v30, %v3845_v28  ;;  %4675 = vmatpush.bf16.msra.mxu0 %v6278_v18  ;;  %v9212_v27 = vadd.f32 %v3469_v24, %v3450_v40  ;;  %v4103_v45 = vadd.f32 0.2548296, %v4087_v59 }
 0x74b   : > { %v9217_v46 = vmul.f32 1.442695, %v4144_v25  ;;  %vm3848_vm5 = vweird.f32 %v9147_v13  ;;  %v4129_v35 = vsub.f32 0.0, %v9131_v26  ;;  %v4060_v53 = vadd.f32 -0.28449672, %v4044_v8 }
 0x74c   : > { %9893 = vst [vmem:[#allocation37_spill] sm:$0xff] %v9212_v27  ;;  %v4032_v62 = vadd.f32 1.4214138, %v4016_v6  ;;  %v3847_v58 = vadd.f32 %v9184_v30, %v3846_v21  ;;  %vm3853_vm6 = vcmp.eq.f32.partialorder %v3852_v56, 8.507059e+37  ;;  %v4045_v49 = vmul.f32 %v4029_v63, %v9139_v2  ;;  %vm3850_vm7 = vmor %vm3848_vm5, %vm3849_vm4  ;;  %v6757_v21 = vld [vmem:[%s7592_s13 + $0x44] sm:$0xf0] }
 0x74d   : > { %v3855_v40 = vor.u32 1.1754944e-38, %v3854_v3  ;;  %v9226_v24 = vmul.f32 0.70710677, %v9212_v27  ;;  %v6350_v59 = vor.u32 %v6779_v31, %v6349_v23  ;;  %v9230_v18 = vadd.f32 %v3433_v9, %v3414_v61  ;;  %v6261_v31 = vld [vmem:[%s7592_s13 + $0x40] sm:$0xf] }
 0x74e   : > { %v7024_v13 = vpop.eup %7023  ;;  %v4048_v25 = vmul.f32 %v4032_v62, %v9189_v57  ;;  %v3851_v8 = vsel %vm3850_vm7, %v9184_v30, %v3847_v58  ;;  %v6270_v28 = vor.u32 %v6759_v32, %v6269_v5  ;;  %v9235_v63 = vmul.f32 %v9102_v12, %v4118_v47  ;;  %v3452_v62 = vpop.f32.mrf.mxu2 }
 0x74f   : > { %9894 = vst [vmem:[#allocation38_spill] sm:$0xff] %v9226_v24  ;;  %v9232_v56 = vpop.eup %7025  ;;  %vm3664_vm8 = vcmp.ge.f32.partialorder %v9078_v34, 0.0  ;;  %v9238_v3 = vsel %vm3853_vm6, %v3855_v40, %v3851_v8  ;;  %v3889_v6 = vmul.f32 %v7024_v13, %v9195_v0  ;;  %4693 = vmatpush.bf16.msra.mxu1 %v6350_v59  ;;  %v6342_v23 = vor.u32 %v6777_v33, %v6341_v42  ;;  %v3471_v30 = vpop.f32.mrf.mxu3 }
 0x750   : > { %9895 = vst [vmem:[#allocation39_spill] sm:$0xff] %v9230_v18  ;;  %v4119_v9 = vmul.f32 %v4103_v45, %v9086_v48  ;;  %v4076_v61 = vmul.f32 %v4060_v53, %v9112_v16  ;;  %v3985_v5 = vmul.f32 1.0614054, %v9238_v3  ;;  %v4145_v12 = vmul.f32 %v4129_v35, %v9131_v26  ;;  %4676 = vmatpush.bf16.msra.mxu0 %v6270_v28  ;;  %v9254_v45 = vpop.f32.mrf.mxu0  ;;  %v9256_v53 = vpop.f32.mrf.mxu1 }
 0x751   : > { %v4061_v47 = vadd.f32 -0.28449672, %v4045_v49  ;;  %v3890_v32 = vsub.f32 1.0, %v3889_v6  ;;  %v3899_v58 = vand.u32 2147483648, %v9195_v0  ;;  %v9249_v40 = vand.u32 2147483647, %v9226_v24 }
 0x752   : > { %v4064_v33 = vadd.f32 -0.28449672, %v4048_v25  ;;  %v4001_v42 = vadd.f32 -1.4531521, %v3985_v5  ;;  %v9252_v59 = vmul.f32 0.70710677, %v9230_v18  ;;  %v6262_v48 = vor.u32 %v6757_v21, %v6261_v31 }
 0x753   : > { %v3891_v8 = vmul.f32 %v7024_v13, %v3890_v32  ;;  %vm3894_vm9 = vweird.f32 %v7024_v13  ;;  %v3897_v26 = vand.u32 2147483647, %v9195_v0  ;;  %v3717_v35 = vmul.f32 0.3275911, %v9249_v40  ;;  %4694 = vmatpush.bf16.msra.mxu1 %v6342_v23 }
 0x754   : > { %9896 = vst [vmem:[#allocation40_spill] sm:$0xff] %v9252_v59  ;;  %v4199_v49 = vmul.f32 %v9180_v14, %v4119_v9  ;;  %v4092_v28 = vadd.f32 0.2548296, %v4076_v61  ;;  %v4017_v25 = vmul.f32 %v4001_v42, %v9238_v3  ;;  %v9263_v6 = vand.u32 2147483647, %v9252_v59  ;;  %4677 = vmatpush.bf16.msra.mxu0 %v6262_v48 }
 0x755   : > { %v4077_v31 = vmul.f32 %v4061_v47, %v9139_v2  ;;  %v3892_v21 = vadd.f32 %v7024_v13, %v3891_v8  ;;  %vm3893_vm10 = vweird.f32 %v9195_v0  ;;  %v9267_v5 = vadd.f32 1.0, %v3717_v35 }
 0x756   : > { %v4080_v32 = vmul.f32 %v4064_v33, %v9189_v57  ;;  %v4033_v27 = vadd.f32 1.4214138, %v4017_v25  ;;  %vm3895_vm11 = vmor %vm3893_vm10, %vm3894_vm9  ;;  %v3900_v14 = vor.u32 1.1754944e-38, %v3899_v58  ;;  %v3720_v23 = vmul.f32 0.3275911, %v9263_v6  ;;  %v9281_v35 = vpop.f32.mrf.mxu2 }
 0x757   : > { %vm3665_vm12 = vcmp.ge.f32.partialorder %v9121_v36, 0.0  ;;  %v3896_v9 = vsel %vm3895_vm11, %v7024_v13, %v3892_v21  ;;  %vm3898_vm13 = vcmp.eq.f32.partialorder %v3897_v26, 8.507059e+37  ;;  %7027 = vrcp.f32 %v9267_v5  ;;  %v9283_v13 = vpop.f32.mrf.mxu3 }
 0x758   : > { %v4214_v61 = vsub.f32 1.0, %v9235_v63  ;;  %v4168_v47 = vmul.f32 1.442695, %v4145_v12  ;;  %v9275_v0 = vsel %vm3898_vm13, %v3900_v14, %v3896_v9  ;;  %v4132_v42 = vsub.f32 0.0, %v9177_v60  ;;  %v9314_v36 = vpop.f32.mrf.mxu1 }
 0x759   : > { %v4215_v33 = vsub.f32 1.0, %v4199_v49  ;;  %v4093_v48 = vadd.f32 0.2548296, %v4077_v31  ;;  %v3988_v8 = vmul.f32 1.0614054, %v9275_v0  ;;  %v9279_v58 = vadd.f32 1.0, %v3720_v23 }
 0x75a   : > { %v4108_v26 = vmul.f32 %v4092_v28, %v9112_v16  ;;  %v9289_v63 = vsel %vm3664_vm8, 1.0, %v9888_v17  ;;  %v4096_v12 = vadd.f32 0.2548296, %v4080_v32  ;;  %v4049_v49 = vmul.f32 %v4033_v27, %v9238_v3  ;;  %v9312_v32 = vpop.f32.mrf.mxu0 }
 0x75b   : > { %7029 = vpow2.f32 %v9217_v46  ;;  %v9294_v25 = vmul.f32 0.5, %v9110_v29  ;;  %v9299_v31 = vsel %vm3665_vm12, 1.0, %v9888_v17  ;;  %v9301_v21 = vadd.f32 %v3471_v30, %v3452_v62  ;;  %v6333_v29 = vld [vmem:[%s7592_s13 + $0xd0] sm:$0xf]  ;;  %v6775_v46 = vld [vmem:[%s7592_s13 + $0xd4] sm:$0xf0] }
 0x75c   : > { %9898 = vst [vmem:[#allocation42_spill] sm:$0xff] %v9299_v31  ;;  %v9900_v16 = vsub.f32 1.0, %v9173_v55  ;;  %v4004_v28 = vadd.f32 -1.4531521, %v3988_v8  ;;  %v4148_v27 = vmul.f32 %v4132_v42, %v9177_v60  ;;  %7031 = vrcp.f32 %v9279_v58  ;;  %v6253_v42 = vld [vmem:[%s7592_s13 + $0x30] sm:$0xf] }
 0x75d   : > { %9897 = vst [vmem:[#allocation41_spill] sm:$0xff] %v9294_v25  ;;  %v7028_v62 = vpop.eup %7027  ;;  %v9317_v30 = vmul.f32 %v4214_v61, %v9048_v22  ;;  %v4109_v55 = vmul.f32 %v4093_v48, %v9139_v2  ;;  %7033 = vpow2.f32 %v4168_v47  ;;  %v9324_v60 = vmul.f32 %v9197_v43, %v4108_v26  ;;  %v6755_v8 = vld [vmem:[%s7592_s13 + $0x34] sm:$0xf0] }
 0x75e   : > { %9899 = vst [vmem:[#allocation43_spill] sm:$0xff] %v9301_v21  ;;  %v9306_v34 = vmul.f32 %v9900_v16, %v8999_v50  ;;  %v9320_v50 = vmul.f32 %v4215_v33, %v9098_v10  ;;  %v4112_v14 = vmul.f32 %v4096_v12, %v9189_v57  ;;  %v4065_v23 = vadd.f32 -0.28449672, %v4049_v49 }
 0x75f   : > { %v3904_v9 = vmul.f32 %v7028_v62, %v9267_v5  ;;  %v3912_v16 = vand.u32 2147483647, %v9267_v5  ;;  %v3914_v22 = vand.u32 2147483648, %v9267_v5  ;;  %v9333_v10 = vmul.f32 0.70710677, %v9301_v21 }
 0x760   : > { %v6334_v61 = vor.u32 %v6775_v46, %v6333_v29  ;;  %v4020_v2 = vmul.f32 %v4004_v28, %v9275_v0  ;;  %v9336_v43 = vmul.f32 1.442695, %v4148_v27  ;;  %v4136_v47 = vsub.f32 0.0, %v9263_v6  ;;  %v6325_v46 = vld [vmem:[%s7592_s13 + $0xc0] sm:$0xf]  ;;  %v9378_v59 = vpop.f32.mrf.mxu1 }
 0x761   : > { %9901 = vst [vmem:[#allocation44_spill] sm:$0xff] %v9333_v10  ;;  %v3905_v57 = vsub.f32 1.0, %v3904_v9  ;;  %v7030_v33 = vpop.eup %7029  ;;  %v9340_v48 = vmul.f32 %v9232_v56, %v4109_v55  ;;  %vm3908_vm14 = vweird.f32 %v9267_v5  ;;  %v9344_v26 = vand.u32 2147483647, %v9333_v10  ;;  %v6773_v9 = vld [vmem:[%s7592_s13 + $0xc4] sm:$0xf0] }
 0x762   : > { %4695 = vmatpush.bf16.msra.mxu1 %v6334_v61  ;;  %v6254_v12 = vor.u32 %v6755_v8, %v6253_v42  ;;  %v9346_v49 = vpop.eup %7031  ;;  %v9348_v28 = vmul.f32 %v7030_v33, %v4112_v14  ;;  %v4081_v27 = vmul.f32 %v4065_v23, %v9238_v3  ;;  %vm3909_vm0 = vweird.f32 %v7028_v62  ;;  %v6245_v56 = vld [vmem:[%s7592_s13 + $0x20] sm:$0xf]  ;;  %v6753_v8 = vld [vmem:[%s7592_s13 + $0x24] sm:$0xf0]  ;;  %v9364_v23 = vpop.f32.mrf.mxu2 }
 0x763   : > { %9902 = vst [vmem:[#allocation45_spill] sm:$0xff] %v9340_v48  ;;  %v3906_v29 = vmul.f32 %v7028_v62, %v3905_v57  ;;  %v9354_v55 = vpop.eup %7033  ;;  %vm9356_vm1 = vcmp.eq.f32.partialorder %v3912_v16, 8.507059e+37  ;;  %v3915_v61 = vor.u32 1.1754944e-38, %v3914_v22  ;;  %v3949_v42 = vmul.f32 %v9346_v49, %v9279_v58  ;;  %v9366_v57 = vpop.f32.mrf.mxu3  ;;  %vm3910_vm2 = vmor %vm3908_vm14, %vm3909_vm0 }
 0x764   : > { %v3721_v14 = vmul.f32 0.3275911, %v9344_v26  ;;  %4678 = vmatpush.bf16.msra.mxu0 %v6254_v12  ;;  %v4036_v33 = vadd.f32 1.4214138, %v4020_v2  ;;  %v3957_v10 = vand.u32 2147483647, %v9279_v58  ;;  %v4152_v16 = vmul.f32 %v4136_v47, %v9263_v6  ;;  %v9376_v25 = vpop.f32.mrf.mxu0 }
 0x765   : > { %v3907_v18 = vadd.f32 %v7028_v62, %v3906_v29  ;;  %v3950_v22 = vsub.f32 1.0, %v3949_v42  ;;  %v3959_v24 = vand.u32 2147483648, %v9279_v58  ;;  %v6326_v12 = vor.u32 %v6773_v9, %v6325_v46 }
 0x766   : > { %v9374_v17 = vadd.f32 1.0, %v3721_v14  ;;  %v4097_v2 = vadd.f32 0.2548296, %v4081_v27  ;;  %v4234_v6 = vadd.f32 1.0, %v9022_v15  ;;  %v6246_v47 = vor.u32 %v6753_v8, %v6245_v56  ;;  %v6771_v27 = vld [vmem:[%s7592_s13 + $0xb4] sm:$0xf0] }
 0x767   : > { %v3911_v29 = vsel %vm3910_vm2, %v7028_v62, %v3907_v18  ;;  %v3951_v42 = vmul.f32 %v9346_v49, %v3950_v22  ;;  %vm3954_vm15 = vweird.f32 %v9346_v49  ;;  %4696 = vmatpush.bf16.msra.mxu1 %v6326_v12  ;;  %v4052_v15 = vmul.f32 %v4036_v33, %v9275_v0  ;;  %v6317_v62 = vld [vmem:[%s7592_s13 + $0xb0] sm:$0xf]  ;;  %v6751_v8 = vld [vmem:[%s7592_s13 + $0x14] sm:$0xf0]  ;;  %v6309_v22 = vld [vmem:[%s7592_s13 + $0xa0] sm:$0xf] }
 0x768   : > { %v9383_v5 = vsel %vm9356_vm1, %v3915_v61, %v3911_v29  ;;  %7035 = vrcp.f32 %v9374_v17  ;;  %v3503_v21 = vadd.f32 %v9256_v53, %v9254_v45  ;;  %4679 = vmatpush.bf16.msra.mxu0 %v6246_v47  ;;  %vm3953_vm3 = vweird.f32 %v9279_v58  ;;  %v6237_v14 = vld [vmem:[%s7592_s13 + $0x10] sm:$0xf]  ;;  %v6229_v18 = vld [vmem:[%s7592_s13] sm:$0xf] }
 0x769   : > { %v3952_v61 = vadd.f32 %v9346_v49, %v3951_v42  ;;  %v3989_v33 = vmul.f32 1.0614054, %v9383_v5  ;;  %vm3955_vm4 = vmor %vm3953_vm3, %vm3954_vm15  ;;  %vm3958_vm5 = vcmp.eq.f32.partialorder %v3957_v10, 8.507059e+37  ;;  %v3960_v45 = vor.u32 1.1754944e-38, %v3959_v24  ;;  %v6769_v42 = vld [vmem:[%s7592_s13 + $0xa4] sm:$0xf0] }
 0x76a   : > { %v4250_v53 = vmul.f32 %v4234_v6, %v8860_v44  ;;  %v9407_v12 = vmul.f32 %v4097_v2, %v9238_v3  ;;  %v9410_v47 = vmul.f32 1.442695, %v4152_v16  ;;  %v6318_v58 = vor.u32 %v6771_v27, %v6317_v62  ;;  %v9414_v9 = vpop.f32.mrf.mxu2  ;;  %v6749_v2 = vld [vmem:[%s7592_s13 + $0x4] sm:$0xf0]  ;;  %v6301_v27 = vld [vmem:[%s7592_s13 + $0x90] sm:$0xf] }
 0x76b   : > { %v3956_v29 = vsel %vm3955_vm4, %v9346_v49, %v3952_v61  ;;  %v9416_v56 = vpop.f32.mrf.mxu3  ;;  %v9418_v10 = vadd.f32 -0.28449672, %v4052_v15  ;;  %v3505_v6 = vadd.f32 %v9314_v36, %v9312_v32  ;;  %v4238_v62 = vadd.f32 1.0, %v9063_v7  ;;  %v6767_v32 = vld [vmem:[%s7592_s13 + $0x94] sm:$0xf0] }
 0x76c   : > { %v9420_v24 = vsel %vm3958_vm5, %v3960_v45, %v3956_v29  ;;  %v4266_v3 = vmul.f32 %v4250_v53, %v3503_v21  ;;  %4697 = vmatpush.bf16.msra.mxu1 %v6318_v58  ;;  %v6238_v15 = vor.u32 %v6751_v8, %v6237_v14  ;;  %v9431_v61 = vpop.f32.mrf.mxu0  ;;  %v9433_v45 = vpop.f32.mrf.mxu1  ;;  %v4005_v21 = vadd.f32 -1.4531521, %v3989_v33  ;;  %v6413_v58 = vld [vmem:[%s7592_s13 + $0x170] sm:$0xf] }
 0x76d   : > { %v3992_v16 = vmul.f32 1.0614054, %v9420_v24  ;;  %vm3968_vm6 = vweird.f32 %v9374_v17  ;;  %v3972_v29 = vand.u32 2147483647, %v9374_v17  ;;  %v3974_v7 = vand.u32 2147483648, %v9374_v17 }
 0x76e   : > { %v9424_v49 = vpop.eup %7035  ;;  %v4254_v14 = vmul.f32 %v4238_v62, %v8895_v11  ;;  %4680 = vmatpush.bf16.msra.mxu0 %v6238_v15  ;;  %v6310_v8 = vor.u32 %v6769_v42, %v6309_v22  ;;  %v4235_v44 = vadd.f32 1.0, %v9039_v54  ;;  %v6230_v46 = vor.u32 %v6749_v2, %v6229_v18  ;;  %v6287_v42 = vld [vmem:[%s7592_s13 + $0x78] sm:$0xf0]  ;;  %v6293_v54 = vld [vmem:[%s7592_s13 + $0x80] sm:$0xf] }
 0x76f   : > { %v3964_v53 = vmul.f32 %v9424_v49, %v9374_v17  ;;  %v4008_v36 = vadd.f32 -1.4531521, %v3992_v16  ;;  %v3543_v48 = vadd.f32 %v9366_v57, %v9364_v23  ;;  %v6795_v16 = vld [vmem:[%s7592_s13 + $0x174] sm:$0xf0]  ;;  %v4239_v11 = vadd.f32 1.0, %v9127_v38 }
 0x770   : > { %v4270_v4 = vmul.f32 %v4254_v14, %v3505_v6  ;;  %4698 = vmatpush.bf16.msra.mxu1 %v6310_v8  ;;  %v6302_v22 = vor.u32 %v6767_v32, %v6301_v27  ;;  %v4021_v18 = vmul.f32 %v4005_v21, %v9383_v5  ;;  %vm3969_vm7 = vweird.f32 %v9424_v49  ;;  %v6765_v57 = vld [vmem:[%s7592_s13 + $0x84] sm:$0xf0]  ;;  %v6405_v6 = vld [vmem:[%s7592_s13 + $0x160] sm:$0xf]  ;;  %v6760_v21 = vld [vmem:[%s7592_s13 + $0x64] sm:$0xf] }
 0x771   : > { %v3965_v33 = vsub.f32 1.0, %v3964_v53  ;;  %v4024_v31 = vmul.f32 %v4008_v36, %v9420_v24  ;;  %v3541_v23 = vadd.f32 %v9283_v13, %v9281_v35  ;;  %v6793_v62 = vld [vmem:[%s7592_s13 + $0x164] sm:$0xf0]  ;;  %v4255_v27 = vmul.f32 %v4239_v11, %v8926_v41  ;;  %v6279_v32 = vld [vmem:[%s7592_s13 + $0x68] sm:$0xf0]  ;;  %vm9482_vm9 = vmor %vm3968_vm6, %vm3969_vm7 }
 0x772   : > { %v9460_v15 = vpack.c.bf16 %v4270_v4, %v4266_v3  ;;  %4681 = vmatpush.bf16.msra.mxu0 %v6230_v46  ;;  %v6414_v53 = vor.u32 %v6795_v16, %v6413_v58  ;;  %v9465_v36 = vpop.f32.mrf.mxu2  ;;  %vm9470_vm8 = vcmp.eq.f32.partialorder %v3972_v29, 8.507059e+37  ;;  %v4251_v4 = vmul.f32 %v4235_v44, %v8872_v20  ;;  %v6477_v46 = vld [vmem:[%s7592_s13 + $0x1f0] sm:$0xf]  ;;  %v6811_v41 = vld [vmem:[%s7592_s13 + $0x1f4] sm:$0xf0] }
 0x773   : > { %v3966_v2 = vmul.f32 %v9424_v49, %v3965_v33  ;;  %v4040_v38 = vadd.f32 1.4214138, %v4024_v31  ;;  %v9467_v14 = vpop.f32.mrf.mxu3  ;;  %v6290_v31 = vor.u32 %v6762_v51, %v6287_v42  ;;  %v3975_v29 = vor.u32 1.1754944e-38, %v3974_v7  ;;  %v6778_v51 = vld [vmem:[%s7592_s13 + $0xf4] sm:$0xf] }
 0x774   : > { %v4271_v58 = vmul.f32 %v4255_v27, %v3543_v48  ;;  %4699 = vmatpush.bf16.msra.mxu1 %v6302_v22  ;;  %4712 = vmatpush.bf16.msra.mxu2 %v6414_v53  ;;  %v6294_v20 = vor.u32 %v6765_v57, %v6293_v54  ;;  %v6351_v44 = vld [vmem:[%s7592_s13 + $0xf8] sm:$0xf0]  ;;  %v9909_v33 = vsub.f32 1.0, %v9324_v60  ;;  %v4267_v11 = vmul.f32 %v4251_v4, %v3541_v23  ;;  %v6397_v7 = vld [vmem:[%s7592_s13 + $0x150] sm:$0xf] }
 0x775   : > { %v3967_v35 = vadd.f32 %v9424_v49, %v3966_v2  ;;  %v4056_v3 = vmul.f32 %v4040_v38, %v9420_v24  ;;  %4682 = vmatmul.bf16.vlgmr.msra.gmra.mxu0 %v9460_v15  ;;  %v6406_v48 = vor.u32 %v6793_v62, %v6405_v6  ;;  %v6791_v22 = vld [vmem:[%s7592_s13 + $0x154] sm:$0xf0]  ;;  %v6758_v42 = vld [vmem:[%s7592_s13 + $0x54] sm:$0xf]  ;;  %v6271_v54 = vld [vmem:[%s7592_s13 + $0x58] sm:$0xf0]  ;;  %v9503_v60 = vmul.f32 %v9354_v55, %v9407_v12  ;;  %v9511_v6 = vpop.f32.mrf.mxu0  ;;  %v9513_v62 = vpop.f32.mrf.mxu1 }
 0x776   : > { %v9491_v16 = vmul.f32 %v9909_v33, %v9137_v52  ;;  %v4037_v52 = vadd.f32 1.4214138, %v4021_v18  ;;  %4750 = vmatpush.bf16.msrb.mxu0 %v6290_v31  ;;  %v6469_v23 = vld [vmem:[%s7592_s13 + $0x1e0] sm:$0xf]  ;;  %v6809_v57 = vld [vmem:[%s7592_s13 + $0x1e4] sm:$0xf0]  ;;  %v9517_v38 = vmul.f32 %v9418_v10, %v9275_v0  ;;  %v9525_v27 = vpack.c.bf16 %v4271_v58, %v4267_v11 }
 0x777   : > { %v3971_v17 = vsel %vm9482_vm9, %v9424_v49, %v3967_v35  ;;  %v6282_v49 = vor.u32 %v6760_v21, %v6279_v32  ;;  %v9910_v55 = vsub.f32 0.0, %v9249_v40  ;;  %v6776_v53 = vld [vmem:[%s7592_s13 + $0xe4] sm:$0xf]  ;;  %v6343_v21 = vld [vmem:[%s7592_s13 + $0xe8] sm:$0xf0]  ;;  %v6478_v35 = vor.u32 %v6811_v41, %v6477_v46 }
 0x778   : > { %v9507_v2 = vsel %vm9470_vm8, %v3975_v29, %v3971_v17  ;;  %v4072_v32 = vadd.f32 -0.28449672, %v4056_v3  ;;  %4700 = vmatpush.bf16.msra.mxu1 %v6294_v20  ;;  %4713 = vmatpush.bf16.msra.mxu2 %v6406_v48  ;;  %v6354_v13 = vor.u32 %v6778_v51, %v6351_v44  ;;  %v4246_v10 = vadd.f32 1.0, %v9317_v30  ;;  %v6389_v4 = vld [vmem:[%s7592_s13 + $0x140] sm:$0xf] }
 0x779   : > { %v9522_v12 = vmul.f32 %v9910_v55, %v9249_v40  ;;  %v3993_v18 = vmul.f32 1.0614054, %v9507_v2  ;;  %v9911_v40 = vsub.f32 0.0, %v9344_v26  ;;  %v4242_v29 = vadd.f32 1.0, %v9143_v19  ;;  %v6789_v58 = vld [vmem:[%s7592_s13 + $0x144] sm:$0xf0]  ;;  %4731 = vmatpush.bf16.msra.mxu3 %v6478_v35 }
 0x77a   : > { %v3510_v3 = vadd.f32 %v9433_v45, %v9431_v61  ;;  %v4209_v46 = vsub.f32 1.0, %v9503_v60  ;;  %v4053_v30 = vmul.f32 %v4037_v52, %v9383_v5  ;;  %4751 = vmatpush.bf16.msrb.mxu0 %v6282_v49  ;;  %v6398_v41 = vor.u32 %v6791_v22, %v6397_v7  ;;  %v6263_v44 = vld [vmem:[%s7592_s13 + $0x48] sm:$0xf0]  ;;  %v6461_v33 = vld [vmem:[%s7592_s13 + $0x1d0] sm:$0xf] }
 0x77b   : > { %v4009_v31 = vadd.f32 -1.4531521, %v3993_v18  ;;  %v9534_v8 = vmul.f32 %v9911_v40, %v9344_v26  ;;  %v6274_v20 = vor.u32 %v6758_v42, %v6271_v54  ;;  %v6756_v26 = vld [vmem:[%s7592_s13 + $0x44] sm:$0xf]  ;;  %v3508_v19 = vadd.f32 %v9378_v59, %v9376_v25  ;;  %4701 = vmatmul.bf16.vlgmr.msra.gmra.mxu1 %v9525_v27  ;;  %v6807_v17 = vld [vmem:[%s7592_s13 + $0x1d4] sm:$0xf0]  ;;  %v9556_v42 = vpop.f32.mrf.mxu2 }
 0x77c   : > { %v4262_v61 = vmul.f32 %v4246_v10, %v9011_v1  ;;  %v6470_v45 = vor.u32 %v6809_v57, %v6469_v23  ;;  %7037 = vpow2.f32 %v9336_v43  ;;  %v4088_v11 = vmul.f32 %v4072_v32, %v9420_v24  ;;  %4769 = vmatpush.bf16.msrb.mxu1 %v6354_v13  ;;  %4714 = vmatpush.bf16.msra.mxu2 %v6398_v41  ;;  %v6774_v22 = vld [vmem:[%s7592_s13 + $0xd4] sm:$0xf]  ;;  %v6335_v59 = vld [vmem:[%s7592_s13 + $0xd8] sm:$0xf0]  ;;  %v6381_v25 = vld [vmem:[%s7592_s13 + $0x130] sm:$0xf]  ;;  %v9558_v1 = vpop.f32.mrf.mxu3 }
 0x77d   : > { %v4025_v51 = vmul.f32 %v4009_v31, %v9507_v2  ;;  %v6346_v48 = vor.u32 %v6776_v53, %v6343_v21  ;;  %v6390_v7 = vor.u32 %v6789_v58, %v6389_v4  ;;  %v4258_v52 = vmul.f32 %v4242_v29, %v8945_v39  ;;  %v6787_v23 = vld [vmem:[%s7592_s13 + $0x134] sm:$0xf0]  ;;  %v6754_v21 = vld [vmem:[%s7592_s13 + $0x34] sm:$0xf]  ;;  %v6255_v10 = vld [vmem:[%s7592_s13 + $0x38] sm:$0xf0]  ;;  %v3580_v58 = vpop.f32.mrf.mxu1 }
 0x77e   : > { %v4278_v43 = vmul.f32 %v4262_v61, %v3510_v3  ;;  %v4247_v49 = vadd.f32 1.0, %v9320_v50  ;;  %v4069_v57 = vadd.f32 -0.28449672, %v4053_v30  ;;  %v4243_v55 = vadd.f32 1.0, %v9306_v34  ;;  %4752 = vmatpush.bf16.msrb.mxu0 %v6274_v20  ;;  %4732 = vmatpush.bf16.msra.mxu3 %v6470_v45  ;;  %v6453_v4 = vld [vmem:[%s7592_s13 + $0x1c0] sm:$0xf]  ;;  %v3561_v3 = vpop.f32.mrf.mxu0 }
 0x77f   : > { %v4041_v54 = vadd.f32 1.4214138, %v4025_v51  ;;  %v6266_v18 = vor.u32 %v6756_v26, %v6263_v44  ;;  %v6462_v53 = vor.u32 %v6807_v17, %v6461_v33  ;;  %v9912_v32 = vsub.f32 1.0, %v9348_v28  ;;  %v6805_v34 = vld [vmem:[%s7592_s13 + $0x1c4] sm:$0xf0] }
 0x780   : > { %v4274_v13 = vmul.f32 %v4258_v52, %v3508_v19  ;;  %v3548_v50 = vadd.f32 %v9467_v14, %v9465_v36  ;;  %v4104_v31 = vadd.f32 0.2548296, %v4088_v11  ;;  %7039 = vpow2.f32 %v9410_v47  ;;  %4770 = vmatpush.bf16.msrb.mxu1 %v6346_v48  ;;  %4715 = vmatpush.bf16.msra.mxu2 %v6390_v7  ;;  %v6772_v28 = vld [vmem:[%s7592_s13 + $0xc4] sm:$0xf]  ;;  %v6373_v47 = vld [vmem:[%s7592_s13 + $0x120] sm:$0xf] }
 0x781   : > { %v4224_v39 = vmul.f32 %v9912_v32, %v9289_v63  ;;  %v4057_v35 = vmul.f32 %v4041_v54, %v9507_v2  ;;  %v6338_v40 = vor.u32 %v6774_v22, %v6335_v59  ;;  %v6382_v29 = vor.u32 %v6787_v23, %v6381_v25  ;;  %v6327_v63 = vld [vmem:[%s7592_s13 + $0xc8] sm:$0xf0]  ;;  %v6785_v20 = vld [vmem:[%s7592_s13 + $0x124] sm:$0xf0]  ;;  %v6445_v48 = vld [vmem:[%s7592_s13 + $0x1b0] sm:$0xf] }
 0x782   : > { %v3546_v36 = vadd.f32 %v9416_v56, %v9414_v9  ;;  %v4263_v14 = vmul.f32 %v4247_v49, %v9051_v37  ;;  %v9580_v41 = vpack.c.bf16 %v4278_v43, %v4274_v13  ;;  %v9584_v26 = vpop.eup %7037  ;;  %v4100_v51 = vadd.f32 0.2548296, %v9517_v38  ;;  %4753 = vmatpush.bf16.msrb.mxu0 %v6266_v18  ;;  %4733 = vmatpush.bf16.msra.mxu3 %v6462_v53  ;;  %v6752_v37 = vld [vmem:[%s7592_s13 + $0x24] sm:$0xf]  ;;  %v9913_v44 = vld [vmem:[#allocation30_spill] sm:$0xff]  ;;  %v9915_v49 = vld [vmem:[#allocation36_spill] sm:$0xff] }
 0x783   : > { %v4073_v30 = vadd.f32 -0.28449672, %v4057_v35  ;;  %v4184_v19 = vmul.f32 1.442695, %v9534_v8  ;;  %v6258_v61 = vor.u32 %v6754_v21, %v6255_v10  ;;  %v6454_v9 = vor.u32 %v6805_v34, %v6453_v4  ;;  %v6247_v11 = vld [vmem:[%s7592_s13 + $0x28] sm:$0xf0]  ;;  %v3599_v13 = vpop.f32.mrf.mxu2 }
 0x784   : > { %v4085_v56 = vmul.f32 %v4069_v57, %v9383_v5  ;;  %v4259_v33 = vmul.f32 %v4243_v55, %v9913_v44  ;;  %v4279_v17 = vmul.f32 %v4263_v14, %v3548_v50  ;;  %v6803_v38 = vld [vmem:[%s7592_s13 + $0x1b4] sm:$0xf0]  ;;  %v4176_v8 = vmul.f32 1.442695, %v9522_v12  ;;  %4771 = vmatpush.bf16.msrb.mxu1 %v6338_v40  ;;  %4716 = vmatpush.bf16.msra.mxu2 %v6382_v29  ;;  %v6770_v25 = vld [vmem:[%s7592_s13 + $0xb4] sm:$0xf]  ;;  %v3618_v50 = vpop.f32.mrf.mxu3 }
 0x785   : > { %v4089_v45 = vmul.f32 %v4073_v30, %v9507_v2  ;;  %v4120_v7 = vmul.f32 %v4104_v31, %v9420_v24  ;;  %v6330_v22 = vor.u32 %v6772_v28, %v6327_v63  ;;  %v6374_v59 = vor.u32 %v6785_v20, %v6373_v47  ;;  %v6319_v54 = vld [vmem:[%s7592_s13 + $0xb8] sm:$0xf0]  ;;  %v9914_v52 = vld [vmem:[#allocation42_spill] sm:$0xff]  ;;  %4687 = vmatmul.bf16.gmra.mxu0 %v9580_v41  ;;  %v6365_v57 = vld [vmem:[%s7592_s13 + $0x110] sm:$0xf] }
 0x786   : > { %v4225_v43 = vmul.f32 %v4209_v46, %v9914_v52  ;;  %vm3668_vm10 = vcmp.ge.f32.partialorder %v9915_v49, 0.0  ;;  %v9916_v23 = vld [vmem:[#allocation40_spill] sm:$0xff]  ;;  %v4275_v12 = vmul.f32 %v4259_v33, %v3546_v36  ;;  %v4240_v24 = vadd.f32 1.0, %v4224_v39  ;;  %v7040_v18 = vpop.eup %7039  ;;  %4754 = vmatpush.bf16.msrb.mxu0 %v6258_v61  ;;  %4734 = vmatpush.bf16.msra.mxu3 %v6454_v9  ;;  %v6750_v21 = vld [vmem:[%s7592_s13 + $0x14] sm:$0xf]  ;;  %v9917_v36 = vld [vmem:[#allocation34_spill] sm:$0xff]  ;;  %v9634_v44 = vpop.f32.mrf.mxu0 }
 0x787   : > { %vm3672_vm11 = vcmp.ge.f32.partialorder %v9916_v23, 0.0  ;;  %v6783_v55 = vld [vmem:[%s7592_s13 + $0x114] sm:$0xf0]  ;;  %v4116_v53 = vmul.f32 %v4100_v51, %v9275_v0  ;;  %7041 = vpow2.f32 %v4184_v19  ;;  %v6250_v60 = vor.u32 %v6752_v37, %v6247_v11  ;;  %v6239_v32 = vld [vmem:[%s7592_s13 + $0x18] sm:$0xf0]  ;;  %v9918_v14 = vld [vmem:[#allocation45_spill] sm:$0xff]  ;;  %v9636_v33 = vpop.f32.mrf.mxu1 }
 0x788   : > { %v6446_v46 = vor.u32 %v6803_v38, %v6445_v48  ;;  %v6437_v35 = vld [vmem:[%s7592_s13 + $0x1a0] sm:$0xf]  ;;  %v4105_v10 = vadd.f32 0.2548296, %v4089_v45  ;;  %v4236_v39 = vadd.f32 1.0, %v9491_v16  ;;  %v9612_v4 = vpack.c.bf16 %v4279_v17, %v4275_v12  ;;  %4772 = vmatpush.bf16.msrb.mxu1 %v6330_v22  ;;  %4717 = vmatpush.bf16.msra.mxu2 %v6374_v59  ;;  %v9921_v11 = vld [vmem:[#allocation32_spill] sm:$0xff] }
 0x789   : > { %v3581_v0 = vadd.f32 %v3580_v58, %v3561_v3  ;;  %v6801_v34 = vld [vmem:[%s7592_s13 + $0x1a4] sm:$0xf0]  ;;  %v4101_v31 = vadd.f32 0.2548296, %v4085_v56  ;;  %v9615_v40 = vmul.f32 %v7040_v18, %v4120_v7  ;;  %v6322_v29 = vor.u32 %v6770_v25, %v6319_v54  ;;  %v6768_v63 = vld [vmem:[%s7592_s13 + $0xa4] sm:$0xf] }
 0x78a   : > { %v6366_v28 = vor.u32 %v6783_v55, %v6365_v57  ;;  %v6311_v30 = vld [vmem:[%s7592_s13 + $0xa8] sm:$0xf0]  ;;  %v9919_v16 = vsub.f32 1.0, %v9918_v14  ;;  %7043 = vpow2.f32 %v4176_v8  ;;  %v3579_v3 = vadd.f32 %v9513_v62, %v9511_v6  ;;  %v9920_v58 = vld [vmem:[#allocation35_spill] sm:$0xff]  ;;  %v6357_v51 = vld [vmem:[%s7592_s13 + $0x100] sm:$0xf]  ;;  %4755 = vmatpush.bf16.msrb.mxu0 %v6250_v60  ;;  %4735 = vmatpush.bf16.msra.mxu3 %v6446_v46 }
 0x78b   : > { %v4256_v20 = vmul.f32 %v4240_v24, %v9920_v58  ;;  %v6781_v19 = vld [vmem:[%s7592_s13 + $0x104] sm:$0xf0]  ;;  %v9628_v61 = vld [vmem:[%s7592_s13 + $0x4] sm:$0xf]  ;;  %v9631_v9 = vmul.f32 %v9584_v26, %v4116_v53  ;;  %v6242_v37 = vor.u32 %v6750_v21, %v6239_v32  ;;  %v6438_v56 = vor.u32 %v6801_v34, %v6437_v35  ;;  %v6231_v45 = vld [vmem:[%s7592_s13 + $0x8] sm:$0xf0]  ;;  %4706 = vmatmul.bf16.gmra.mxu1 %v9612_v4 }
 0x78c   : > { %v4221_v47 = vmul.f32 %v9919_v16, %v9917_v36  ;;  %v6794_v6 = vld [vmem:[%s7592_s13 + $0x174] sm:$0xf]  ;;  %v6415_v62 = vld [vmem:[%s7592_s13 + $0x178] sm:$0xf0]  ;;  %v4121_v17 = vmul.f32 %v4105_v10, %v9507_v2  ;;  %v4252_v48 = vmul.f32 %v4236_v39, %v9921_v11  ;;  %v4241_v38 = vadd.f32 1.0, %v4225_v43  ;;  %4773 = vmatpush.bf16.msrb.mxu1 %v6322_v29  ;;  %4718 = vmatpush.bf16.msra.mxu2 %v6366_v28  ;;  %v9923_v39 = vld [vmem:[#allocation41_spill] sm:$0xff] }
 0x78d   : > { %v4272_v26 = vmul.f32 %v4256_v20, %v3581_v0  ;;  %v6429_v8 = vld [vmem:[%s7592_s13 + $0x190] sm:$0xf]  ;;  %v6799_v7 = vld [vmem:[%s7592_s13 + $0x194] sm:$0xf0]  ;;  %v7042_v22 = vpop.eup %7041  ;;  %v4117_v59 = vmul.f32 %v4101_v31, %v9383_v5  ;;  %v4216_v25 = vsub.f32 1.0, %v9615_v40  ;;  %v6314_v2 = vor.u32 %v6768_v63, %v6311_v30  ;;  %v9669_v30 = vpop.f32.mrf.mxu3  ;;  %v9925_v23 = vld [vmem:[#allocation38_spill] sm:$0xff] }
 0x78e   : > { %v6358_v54 = vor.u32 %v6781_v19, %v6357_v51  ;;  %v4268_v52 = vmul.f32 %v4252_v48, %v3579_v3  ;;  %v4237_v12 = vadd.f32 1.0, %v4221_v47  ;;  %v3619_v24 = vadd.f32 %v3618_v50, %v3599_v13  ;;  %v6766_v57 = vld [vmem:[%s7592_s13 + $0x94] sm:$0xf]  ;;  %v6303_v55 = vld [vmem:[%s7592_s13 + $0x98] sm:$0xf0]  ;;  %4756 = vmatpush.bf16.msrb.mxu0 %v6242_v37  ;;  %4736 = vmatpush.bf16.msra.mxu3 %v6438_v56  ;;  %v3566_v11 = vpop.f32.mrf.mxu0 }
 0x78f   : > { %v6418_v43 = vor.u32 %v6794_v6, %v6415_v62  ;;  %v9922_v18 = vld [vmem:[#allocation31_spill] sm:$0xff]  ;;  %v4212_v5 = vsub.f32 1.0, %v9631_v9  ;;  %v6234_v60 = vor.u32 %v9628_v61, %v6231_v45  ;;  %v6430_v46 = vor.u32 %v6799_v7, %v6429_v8  ;;  %v6792_v21 = vld [vmem:[%s7592_s13 + $0x164] sm:$0xf]  ;;  %v6407_v32 = vld [vmem:[%s7592_s13 + $0x168] sm:$0xf0]  ;;  %v3585_v48 = vpop.f32.mrf.mxu1 }
 0x790   : > { %v3629_v53 = vmul.f32 0.5, %v9922_v18  ;;  %v7044_v35 = vpop.eup %7043  ;;  %v4201_v13 = vmul.f32 %v7042_v22, %v4121_v17  ;;  %v3617_v50 = vadd.f32 %v9558_v1, %v9556_v42  ;;  %v9656_v10 = vpack.c.bf16 %v4272_v26, %v4268_v52  ;;  %v6421_v34 = vld [vmem:[%s7592_s13 + $0x180] sm:$0xf]  ;;  %v6797_v31 = vld [vmem:[%s7592_s13 + $0x184] sm:$0xf0]  ;;  %4774 = vmatpush.bf16.msrb.mxu1 %v6314_v2  ;;  %4719 = vmatpush.bf16.msra.mxu2 %v6358_v54  ;;  %v9667_v1 = vpop.f32.mrf.mxu2  ;;  %v9926_v51 = vld [vmem:[#allocation44_spill] sm:$0xff] }
 0x791   : > { %v4257_v0 = vmul.f32 %v4241_v38, %v9923_v39  ;;  %v9924_v40 = vmov -1.0   ;;  %v4197_v28 = vmul.f32 %v7044_v35, %v4117_v59  ;;  %v6306_v42 = vor.u32 %v6766_v57, %v6303_v55  ;;  %v6810_v36 = vld [vmem:[%s7592_s13 + $0x1f4] sm:$0xf]  ;;  %v6479_v14 = vld [vmem:[%s7592_s13 + $0x1f8] sm:$0xf0] }
 0x792   : > { %v3684_v29 = vsel %vm3668_vm10, 1.0, %v9924_v40  ;;  %v3688_v63 = vsel %vm3672_vm11, 1.0, %v9924_v40  ;;  %v4253_v49 = vmul.f32 %v4237_v12, %v3629_v53  ;;  %v6764_v3 = vld [vmem:[%s7592_s13 + $0x84] sm:$0xf]  ;;  %v6295_v58 = vld [vmem:[%s7592_s13 + $0x88] sm:$0xf0]  ;;  %v6410_v20 = vor.u32 %v6792_v21, %v6407_v32  ;;  %4757 = vmatpush.bf16.msrb.mxu0 %v6234_v60  ;;  %4737 = vmatpush.bf16.msra.mxu3 %v6430_v46 }
 0x793   : > { %v4232_v16 = vmul.f32 %v4216_v25, %v3688_v63  ;;  %v4273_v47 = vmul.f32 %v4257_v0, %v3619_v24  ;;  %vm3669_vm12 = vcmp.ge.f32.partialorder %v9925_v23, 0.0  ;;  %vm3673_vm13 = vcmp.ge.f32.partialorder %v9926_v51, 0.0  ;;  %v6790_v61 = vld [vmem:[%s7592_s13 + $0x154] sm:$0xf]  ;;  %v6399_v9 = vld [vmem:[%s7592_s13 + $0x158] sm:$0xf0]  ;;  %4720 = vmatmul.bf16.vlgmr.msra.gmra.mxu2 %v9656_v10 }
 0x794   : > { %4788 = vmatpush.bf16.msrb.mxu2 %v6418_v43  ;;  %v6422_v19 = vor.u32 %v6797_v31, %v6421_v34  ;;  %v4228_v37 = vmul.f32 %v4212_v5, %v3684_v29  ;;  %v4217_v56 = vsub.f32 1.0, %v4201_v13  ;;  %v4269_v45 = vmul.f32 %v4253_v49, %v3617_v50  ;;  %4775 = vmatpush.bf16.msrb.mxu1 %v6306_v42  ;;  %v6808_v26 = vld [vmem:[%s7592_s13 + $0x1e4] sm:$0xf]  ;;  %v6471_v38 = vld [vmem:[%s7592_s13 + $0x1e8] sm:$0xf0]  ;;  %v9927_v8 = vld [vmem:[#allocation39_spill] sm:$0xff] }
 0x795   : > { %v6482_v6 = vor.u32 %v6810_v36, %v6479_v14  ;;  %v4213_v62 = vsub.f32 1.0, %v4197_v28  ;;  %v6298_v17 = vor.u32 %v6764_v3, %v6295_v58  ;;  %v3640_v7 = vmul.f32 0.5, %v9927_v8  ;;  %4758 = vmatmul.bf16.vlgmr.msrb.gmra.mxu0 %v9460_v15  ;;  %v6788_v52 = vld [vmem:[%s7592_s13 + $0x144] sm:$0xf]  ;;  %v6391_v12 = vld [vmem:[%s7592_s13 + $0x148] sm:$0xf0]  ;;  %v3623_v13 = vpop.f32.mrf.mxu3 }
 0x796   : > { %v9683_v22 = vpack.c.bf16 %v4273_v47, %v4269_v45  ;;  %v4248_v59 = vadd.f32 1.0, %v4232_v16  ;;  %v6402_v25 = vor.u32 %v6790_v61, %v6399_v9  ;;  %v3685_v2 = vsel %vm3669_vm12, 1.0, %v9924_v40  ;;  %4738 = vmatpush.bf16.msra.mxu3 %v6422_v19  ;;  %v6806_v18 = vld [vmem:[%s7592_s13 + $0x1d4] sm:$0xf]  ;;  %v6463_v53 = vld [vmem:[%s7592_s13 + $0x1d8] sm:$0xf0] }
 0x797   : > { %v3689_v54 = vsel %vm3673_vm13, 1.0, %v9924_v40  ;;  %v4244_v57 = vadd.f32 1.0, %v4228_v37  ;;  %v3586_v15 = vadd.f32 %v3585_v48, %v3566_v11  ;;  %v6474_v55 = vor.u32 %v6808_v26, %v6471_v38  ;;  %v9928_v5 = vld [vmem:[#allocation33_spill] sm:$0xff]  ;;  %v6786_v50 = vld [vmem:[%s7592_s13 + $0x134] sm:$0xf] }
 0x798   : > { %4789 = vmatpush.bf16.msrb.mxu2 %v6410_v20  ;;  %v4233_v24 = vmul.f32 %v4217_v56, %v3689_v54  ;;  %v4229_v43 = vmul.f32 %v4213_v62, %v3685_v2  ;;  %4776 = vmatpush.bf16.msrb.mxu1 %v6298_v17  ;;  %v3636_v60 = vmul.f32 0.5, %v9928_v5  ;;  %v3584_v46 = vadd.f32 %v9636_v33, %v9634_v44  ;;  %v3604_v35 = vpop.f32.mrf.mxu2  ;;  %v6383_v39 = vld [vmem:[%s7592_s13 + $0x138] sm:$0xf0]  ;;  %v9929_v33 = vld [vmem:[#allocation43_spill] sm:$0xff]  ;;  %v6804_v29 = vld [vmem:[%s7592_s13 + $0x1c4] sm:$0xf] }
 0x799   : > { %4739 = vmatmul.bf16.vlgmr.msra.gmra.mxu3 %v9683_v22  ;;  %v4264_v21 = vmul.f32 %v4248_v59, %v3640_v7  ;;  %v6394_v32 = vor.u32 %v6788_v52, %v6391_v12  ;;  %v6466_v44 = vor.u32 %v6806_v18, %v6463_v53  ;;  %v3641_v40 = vmul.f32 0.5, %v9929_v33  ;;  %v6455_v28 = vld [vmem:[%s7592_s13 + $0x1c8] sm:$0xf0]  ;;  %v9930_v16 = vld [vmem:[#allocation37_spill] sm:$0xff]  ;;  %v6802_v51 = vld [vmem:[%s7592_s13 + $0x1b4] sm:$0xf] }
 0x79a   : > { %4807 = vmatpush.bf16.msrb.mxu3 %v6482_v6  ;;  %v4260_v0 = vmul.f32 %v4244_v57, %v3636_v60  ;;  %v4249_v31 = vadd.f32 1.0, %v4233_v24  ;;  %v4245_v42 = vadd.f32 1.0, %v4229_v43  ;;  %v3624_v36 = vadd.f32 %v3623_v13, %v3604_v35  ;;  %v6375_v47 = vld [vmem:[%s7592_s13 + $0x128] sm:$0xf0]  ;;  %v6447_v19 = vld [vmem:[%s7592_s13 + $0x1b8] sm:$0xf0] }
 0x79b   : > { %4777 = vmatmul.bf16.vlgmr.msrb.gmra.mxu1 %v9525_v27  ;;  %v4280_v34 = vmul.f32 %v4264_v21, %v3586_v15  ;;  %v6386_v14 = vor.u32 %v6786_v50, %v6383_v39  ;;  %v3637_v49 = vmul.f32 0.5, %v9930_v16  ;;  %v6784_v27 = vld [vmem:[%s7592_s13 + $0x124] sm:$0xf]  ;;  %v3622_v3 = vadd.f32 %v9669_v30, %v9667_v1  ;;  %v6782_v56 = vld [vmem:[%s7592_s13 + $0x114] sm:$0xf]  ;;  %v9932_v39 = vld [vmem:[#allocation24_spill] sm:$0xff] }
 0x79c   : > { %4790 = vmatpush.bf16.msrb.mxu2 %v6402_v25  ;;  %v4276_v63 = vmul.f32 %v4260_v0, %v3584_v46  ;;  %v4265_v58 = vmul.f32 %v4249_v31, %v3641_v40  ;;  %v6458_v23 = vor.u32 %v6804_v29, %v6455_v28  ;;  %v6378_v37 = vor.u32 %v6784_v27, %v6375_v47  ;;  %v6367_v45 = vld [vmem:[%s7592_s13 + $0x118] sm:$0xf0]  ;;  %v6800_v30 = vld [vmem:[%s7592_s13 + $0x1a4] sm:$0xf]  ;;  %v6439_v62 = vld [vmem:[%s7592_s13 + $0x1a8] sm:$0xf0] }
 0x79d   : > { %v4261_v61 = vmul.f32 %v4245_v42, %v3637_v49  ;;  %v6450_v1 = vor.u32 %v6802_v51, %v6447_v19  ;;  %v6370_v11 = vor.u32 %v6782_v56, %v6367_v45  ;;  %v6780_v48 = vld [vmem:[%s7592_s13 + $0x104] sm:$0xf]  ;;  %v6359_v26 = vld [vmem:[%s7592_s13 + $0x108] sm:$0xf0]  ;;  %v6442_v38 = vor.u32 %v6800_v30, %v6439_v62  ;;  %v6798_v8 = vld [vmem:[%s7592_s13 + $0x194] sm:$0xf] }
 0x79e   : > { %4808 = vmatpush.bf16.msrb.mxu3 %v6474_v55  ;;  %v4288_v20 = vpack.c.bf16 %v4280_v34, %v4276_v63  ;;  %v4281_v9 = vmul.f32 %v4265_v58, %v3624_v36  ;;  %v6431_v7 = vld [vmem:[%s7592_s13 + $0x198] sm:$0xf0]  ;;  %v6362_v59 = vor.u32 %v6780_v48, %v6359_v26  ;;  %v6796_v2 = vld [vmem:[%s7592_s13 + $0x184] sm:$0xf]  ;;  %v9931_v46 = vld [vmem:[#allocation22_spill] sm:$0xff] }
 0x79f   : > { %v4277_v6 = vmul.f32 %v4261_v61, %v3622_v3  ;;  %v6434_v25 = vor.u32 %v6798_v8, %v6431_v7  ;;  %v9933_v28 = vld [vmem:[#allocation26_spill] sm:$0xff]  ;;  %v9934_v3 = vld [vmem:[#allocation28_spill] sm:$0xff]  ;;  %v9935_v56 = vld [vmem:[#allocation23_spill] sm:$0xff] }
 0x7a0   : > { %4791 = vmatpush.bf16.msrb.mxu2 %v6394_v32  ;;  %v9936_v26 = vld [vmem:[#allocation25_spill] sm:$0xff] }
 0x7a1   : > { %v4289_v17 = vpack.c.bf16 %v4281_v9, %v4277_v6 }
 0x7a2   : > { %4809 = vmatpush.bf16.msrb.mxu3 %v6466_v44 }
 0x7a3   : > { %4725 = vmatmul.bf16.gmra.mxu2 %v4288_v20 }
 0x7a4   : > { %4792 = vmatpush.bf16.msrb.mxu2 %v6386_v14 }
 0x7a5   : > { %4763 = vmatmul.bf16.gmra.mxu0 %v9580_v41  ;;  %v6423_v41 = vld [vmem:[%s7592_s13 + $0x188] sm:$0xf0] }
 0x7a6   : > { %4810 = vmatpush.bf16.msrb.mxu3 %v6458_v23  ;;  %v6426_v54 = vor.u32 %v6796_v2, %v6423_v41  ;;  %v9937_v41 = vld [vmem:[#allocation27_spill] sm:$0xff] }
 0x7a8   : > { %4793 = vmatpush.bf16.msrb.mxu2 %v6378_v37 }
 0x7a9   : > { %4744 = vmatmul.bf16.gmra.mxu3 %v4289_v17 }
 0x7aa   : > { %4811 = vmatpush.bf16.msrb.mxu3 %v6450_v1 }
 0x7ab   : > { %4782 = vmatmul.bf16.gmra.mxu1 %v9612_v4 }
 0x7ac   : > { %4794 = vmatpush.bf16.msrb.mxu2 %v6370_v11 }
 0x7ae   : > { %4812 = vmatpush.bf16.msrb.mxu3 %v6442_v38 }
 0x7b0   : > { %4795 = vmatpush.bf16.msrb.mxu2 %v6362_v59 }
 0x7b2   : > { %4813 = vmatpush.bf16.msrb.mxu3 %v6434_v25 }
 0x7b3   : > { %4796 = vmatmul.bf16.vlgmr.msrb.gmra.mxu2 %v9656_v10 }
 0x7b6   : > { %4814 = vmatpush.bf16.msrb.mxu3 %v6426_v54 }
 0x7b9   : > { %4815 = vmatmul.bf16.vlgmr.msrb.gmra.mxu3 %v9683_v22 }
 0x7c3   : > { %4801 = vmatmul.bf16.gmra.mxu2 %v4288_v20 }
 0x7c9   : > { %4820 = vmatmul.bf16.gmra.mxu3 %v4289_v17 }
 0x7f2   : > { %v4683_v12 = vpop.f32.mrf.mxu0 }
 0x7f8   : > { %v4702_v52 = vpop.f32.mrf.mxu1 }
 0x7f9   : > { %v4703_v4 = vadd.f32 %v4702_v52, %v4683_v12 }
 0x7fa   : > { %v4685_v57 = vpop.f32.mrf.mxu0 }
 0x800   : > { %v4704_v24 = vpop.f32.mrf.mxu1 }
 0x801   : > { %v4705_v10 = vadd.f32 %v4704_v24, %v4685_v57 }
 0x802   : > { %v4688_v5 = vpop.f32.mrf.mxu0 }
 0x808   : > { %v4707_v43 = vpop.f32.mrf.mxu1 }
 0x809   : > { %v4708_v31 = vadd.f32 %v4707_v43, %v4688_v5 }
 0x80a   : > { %v4690_v34 = vpop.f32.mrf.mxu0 }
 0x810   : > { %v4709_v13 = vpop.f32.mrf.mxu1 }
 0x811   : > { %v4710_v36 = vadd.f32 %v4709_v13, %v4690_v34 }
 0x812   : > { %v4759_v14 = vpop.f32.mrf.mxu0 }
 0x816   : > { %v4721_v15 = vpop.f32.mrf.mxu2 }
 0x817   : > { %v4722_v55 = vadd.f32 %v4721_v15, %v4703_v4 }
 0x818   : > { %v4778_v42 = vpop.f32.mrf.mxu1 }
 0x819   : > { %v4779_v20 = vadd.f32 %v4778_v42, %v4759_v14 }
 0x81a   : > { %v4761_v19 = vpop.f32.mrf.mxu0 }
 0x81c   : > { %v4740_v18 = vpop.f32.mrf.mxu3 }
 0x81d   : > { %v4741_v53 = vadd.f32 %v4740_v18, %v4722_v55  ;;  %v9938_v55 = vld [vmem:[#allocation29_spill] sm:$0xff] }
 0x81e   : > { %v4723_v60 = vpop.f32.mrf.mxu2 }
 0x81f   : > { %v4826_v21 = vadd.f32 %v4741_v53, %v9931_v46  ;;  %v4724_v32 = vadd.f32 %v4723_v60, %v4705_v10 }
 0x820   : > { %v4780_v23 = vpop.f32.mrf.mxu1 }
 0x821   : > { %4834 = vst [vmem:[#allocation2 + $0x30] sm:$0xff] %v4826_v21  ;;  %v4781_v6 = vadd.f32 %v4780_v23, %v4761_v19 }
 0x822   : > { %v4764_v11 = vpop.f32.mrf.mxu0 }
 0x824   : > { %v4742_v22 = vpop.f32.mrf.mxu3 }
 0x825   : > { %v4743_v35 = vadd.f32 %v4742_v22, %v4724_v32 }
 0x826   : > { %v4726_v50 = vpop.f32.mrf.mxu2 }
 0x827   : > { %v4828_v0 = vadd.f32 %v4743_v35, %v9932_v39  ;;  %v4727_v44 = vadd.f32 %v4726_v50, %v4708_v31 }
 0x828   : > { %v4783_v30 = vpop.f32.mrf.mxu1 }
 0x829   : > { %4836 = vst [vmem:[#allocation2 + $0x18] sm:$0xff] %v4828_v0  ;;  %v4784_v8 = vadd.f32 %v4783_v30, %v4764_v11 }
 0x82a   : > { %v4766_v52 = vpop.f32.mrf.mxu0 }
 0x82c   : > { %v4745_v33 = vpop.f32.mrf.mxu3 }
 0x82d   : > { %v4746_v40 = vadd.f32 %v4745_v33, %v4727_v44 }
 0x82e   : > { %v4728_v29 = vpop.f32.mrf.mxu2 }
 0x82f   : > { %v4830_v63 = vadd.f32 %v4746_v40, %v9933_v28  ;;  %v4729_v16 = vadd.f32 %v4728_v29, %v4710_v36 }
 0x830   : > { %v4785_v2 = vpop.f32.mrf.mxu1 }
 0x831   : > { %4838 = vst [vmem:[#allocation2 + $0x8] sm:$0xff] %v4830_v63  ;;  %v4786_v24 = vadd.f32 %v4785_v2, %v4766_v52 }
 0x834   : > { %v4747_v49 = vpop.f32.mrf.mxu3 }
 0x835   : > { %v4748_v27 = vadd.f32 %v4747_v49, %v4729_v16 }
 0x836   : > { %v4797_v47 = vpop.f32.mrf.mxu2 }
 0x837   : > { %v4832_v58 = vadd.f32 %v4748_v27, %v9934_v3  ;;  %v4798_v51 = vadd.f32 %v4797_v47, %v4779_v20 }
 0x839   : > { %4840 = vst [vmem:[#allocation2 + $0x28] sm:$0xff] %v4832_v58 }
 0x83c   : > { %v4816_v61 = vpop.f32.mrf.mxu3 }
 0x83d   : > { %v4817_v9 = vadd.f32 %v4816_v61, %v4798_v51 }
 0x83e   : > { %v4799_v37 = vpop.f32.mrf.mxu2 }
 0x83f   : > { %v4827_v45 = vadd.f32 %v4817_v9, %v9935_v56  ;;  %v4800_v1 = vadd.f32 %v4799_v37, %v4781_v6 }
 0x841   : > { %4835 = vst [vmem:[#allocation2] sm:$0xff] %v4827_v45 }
 0x844   : > { %v4818_v62 = vpop.f32.mrf.mxu3 }
 0x845   : > { %v4819_v17 = vadd.f32 %v4818_v62, %v4800_v1 }
 0x846   : > { %v4802_v48 = vpop.f32.mrf.mxu2 }
 0x847   : > { %v4829_v38 = vadd.f32 %v4819_v17, %v9936_v26  ;;  %v4803_v7 = vadd.f32 %v4802_v48, %v4784_v8 }
 0x849   : > { %4837 = vst [vmem:[#allocation2 + $0x10] sm:$0xff] %v4829_v38 }
 0x84c   : > { %v4821_v59 = vpop.f32.mrf.mxu3 }
 0x84d   : > { %v4822_v25 = vadd.f32 %v4821_v59, %v4803_v7 }
 0x84e   : > { %v4804_v12 = vpop.f32.mrf.mxu2 }
 0x84f   : > { %v4831_v54 = vadd.f32 %v4822_v25, %v9937_v41  ;;  %v4805_v57 = vadd.f32 %v4804_v12, %v4786_v24 }
 0x851   : > { %4839 = vst [vmem:[#allocation2 + $0x20] sm:$0xff] %v4831_v54 }
 0x854   : > { %v4823_v15 = vpop.f32.mrf.mxu3 }
 0x855   : > { %v4824_v4 = vadd.f32 %v4823_v15, %v4805_v57  ;;  %4845 = sbr.rel (%p6483_p2) target bundleno = 2421 (0x975), region = 88 }
 0x857   : > { %v4833_v43 = vadd.f32 %v4824_v4, %v9938_v55 }
 0x859   : > { %4841 = vst [vmem:[#allocation2 + $0x38] sm:$0xff] %v4833_v43 }
 0x85a   : > { %v4851_v18 = vld [vmem:[#allocation2 + $0x8] sm:$0xff]  ;;  %v4852_v53 = vld [vmem:[#allocation2 + $0x20] sm:$0xff]  ;;  %v4847_v5 = vld [vmem:[#allocation2 + $0x30] sm:$0xff] }
 0x85b   : > { %v4861_v60 = vadd.f32 %v4852_v53, %v4851_v18  ;;  %v4848_v46 = vld [vmem:[#allocation2] sm:$0xff]  ;;  %v4853_v10 = vld [vmem:[#allocation2 + $0x28] sm:$0xff]  ;;  %v4849_v22 = vld [vmem:[#allocation2 + $0x18] sm:$0xff] }
 0x85c   : > { %v4855_v21 = vadd.f32 %v4848_v46, %v4847_v5  ;;  %v4850_v35 = vld [vmem:[#allocation2 + $0x10] sm:$0xff]  ;;  %v4846_v41 = vld [vmem:[%s9816_s7] sm:$0xf] }
 0x85d   : > { %4862 = vadd.xlane.f32.xlu1 %v4861_v60  ;;  %v4858_v50 = vadd.f32 %v4850_v35, %v4849_v22  ;;  %v9939_v0 = vld [vmem:[#allocation21_spill] sm:$0xff]  ;;  %v4956_v15 = vperm.slane %v4846_v41, 0  ;;  %v4957_v43 = vperm.slane %v4846_v41, 2 }
 0x85e   : > { %4856 = vadd.xlane.f32.xlu0 %v4855_v21 }
 0x860   : > { %v4854_v32 = vld [vmem:[#allocation2 + $0x38] sm:$0xff] }
 0x861   : > { %v4864_v13 = vadd.f32 %v4854_v32, %v4853_v10 }
 0x865   : > { %4865 = vadd.xlane.f32.xlu1 %v4864_v13  ;;  %v4961_v13 = vperm.slane %v4957_v43, 0 }
 0x866   : > { %4859 = vadd.xlane.f32.xlu0 %v4858_v50 }
 0x8d0   : > { %v4863_v39 = vpop.xlane.xlu1 %4862 }
 0x8d1   : > { %v4869_v34 = vmul.f32 %v4863_v39, %v9939_v0  ;;  %v4857_v31 = vpop.xlane.xlu0 %4856 }
 0x8d2   : > { %v4867_v44 = vmul.f32 %v4857_v31, %v9939_v0 }
 0x8d3   : > { %v9738_v33 = vsub.f32 %v4851_v18, %v4869_v34  ;;  %v9740_v40 = vsub.f32 %v4852_v53, %v4869_v34  ;;  %v4970_v18 = vperm.slane %v4846_v41, 1 }
 0x8d4   : > { %v9742_v29 = vsub.f32 %v4847_v5, %v4867_v44  ;;  %v9744_v28 = vsub.f32 %v4848_v46, %v4867_v44  ;;  %v4960_v46 = vperm.slane %v4956_v15, 0 }
 0x8d5   : > { %v4883_v63 = vmul.f32 %v9738_v33, %v9738_v33  ;;  %v4884_v42 = vmul.f32 %v9740_v40, %v9740_v40  ;;  %v4974_v39 = vperm.slane %v4970_v18, 1 }
 0x8d6   : > { %v4879_v36 = vmul.f32 %v9742_v29, %v9742_v29  ;;  %v4880_v14 = vmul.f32 %v9744_v28, %v9744_v28 }
 0x8d7   : > { %v4893_v16 = vadd.f32 %v4884_v42, %v4883_v63 }
 0x8d8   : > { %v4866_v49 = vpop.xlane.xlu1 %4865  ;;  %v4887_v27 = vadd.f32 %v4880_v14, %v4879_v36 }
 0x8d9   : > { %v4870_v47 = vmul.f32 %v4866_v49, %v9939_v0  ;;  %v4860_v3 = vpop.xlane.xlu0 %4859  ;;  %4894 = vadd.xlane.f32.xlu0 %v4893_v16 }
 0x8da   : > { %v4868_v58 = vmul.f32 %v4860_v3, %v9939_v0  ;;  %4888 = vadd.xlane.f32.xlu2 %v4887_v27 }
 0x8db   : > { %v9756_v20 = vsub.f32 %v4853_v10, %v4870_v47  ;;  %v9758_v23 = vsub.f32 %v4854_v32, %v4870_v47  ;;  %v4971_v10 = vperm.slane %v4846_v41, 3 }
 0x8dc   : > { %v9760_v51 = vsub.f32 %v4849_v22, %v4868_v58  ;;  %v9762_v19 = vsub.f32 %v4850_v35, %v4868_v58 }
 0x8dd   : > { %v4885_v61 = vmul.f32 %v9756_v20, %v9756_v20  ;;  %v4886_v9 = vmul.f32 %v9758_v23, %v9758_v23  ;;  %v4975_v16 = vperm.slane %v4971_v10, 1 }
 0x8de   : > { %v4881_v37 = vmul.f32 %v9760_v51, %v9760_v51  ;;  %v4882_v56 = vmul.f32 %v9762_v19, %v9762_v19 }
 0x8df   : > { %v4896_v45 = vadd.f32 %v4886_v9, %v4885_v61 }
 0x8e0   : > { %v4890_v6 = vadd.f32 %v4882_v56, %v4881_v37 }
 0x8e1   : > { %4897 = vadd.xlane.f32.xlu1 %v4896_v45 }
 0x8e2   : > { %4891 = vadd.xlane.f32.xlu2 %v4890_v6 }
 0x94c   : > { %v4895_v1 = vpop.xlane.xlu0 %4894 }
 0x94d   : > { %v4889_v30 = vpop.xlane.xlu2 %4888  ;;  %v4901_v62 = vmul.f32 %v4895_v1, %v9939_v0 }
 0x94e   : > { %v4899_v17 = vmul.f32 %v4889_v30, %v9939_v0 }
 0x94f   : > { %v4905_v11 = vadd.f32 1e-05, %v4901_v62 }
 0x950   : > { %v4903_v48 = vadd.f32 1e-05, %v4899_v17 }
 0x951   : > { %7054 = vrsqrt.f32 %v4905_v11  ;;  %vm4933_vm1 = vweird.f32 %v4905_v11 }
 0x952   : > { %7056 = vrsqrt.f32 %v4903_v48  ;;  %vm4913_vm2 = vweird.f32 %v4903_v48 }
 0x954   : > { %v4898_v26 = vpop.xlane.xlu1 %4897 }
 0x955   : > { %v4902_v38 = vmul.f32 %v4898_v26, %v9939_v0  ;;  %v4892_v8 = vpop.xlane.xlu2 %4891 }
 0x956   : > { %v4900_v7 = vmul.f32 %v4892_v8, %v9939_v0 }
 0x957   : > { %v7055_v59 = vpop.eup %7054  ;;  %v4906_v25 = vadd.f32 1e-05, %v4902_v38 }
 0x958   : > { %v7057_v2 = vpop.eup %7056  ;;  %v4928_v54 = vmul.f32 %v7055_v59, %v4905_v11  ;;  %v4904_v52 = vadd.f32 1e-05, %v4900_v7  ;;  %vm4934_vm14 = vweird.f32 %v7055_v59 }
 0x959   : > { %v4908_v12 = vmul.f32 %v7057_v2, %v4903_v48  ;;  %7058 = vrsqrt.f32 %v4906_v25  ;;  %vm4914_vm0 = vweird.f32 %v7057_v2  ;;  %vm4935_vm15 = vmor %vm4933_vm1, %vm4934_vm14  ;;  %vm4943_vm5 = vweird.f32 %v4906_v25 }
 0x95a   : > { %v4929_v24 = vmul.f32 %v7055_v59, %v4928_v54  ;;  %7060 = vrsqrt.f32 %v4904_v52  ;;  %vm4915_vm3 = vmor %vm4913_vm2, %vm4914_vm0  ;;  %vm4923_vm8 = vweird.f32 %v4904_v52 }
 0x95b   : > { %v4909_v57 = vmul.f32 %v7057_v2, %v4908_v12 }
 0x95c   : > { %v4930_v4 = vmul.f32 0.5, %v4929_v24 }
 0x95d   : > { %v4910_v55 = vmul.f32 0.5, %v4909_v57 }
 0x95e   : > { %v4931_v53 = vsub.f32 1.5, %v4930_v4 }
 0x95f   : > { %v7059_v5 = vpop.eup %7058  ;;  %v4911_v60 = vsub.f32 1.5, %v4910_v55 }
 0x960   : > { %v7061_v21 = vpop.eup %7060  ;;  %v4932_v32 = vmul.f32 %v7055_v59, %v4931_v53  ;;  %v4938_v22 = vmul.f32 %v7059_v5, %v4906_v25  ;;  %vm4944_vm4 = vweird.f32 %v7059_v5 }
 0x961   : > { %v4912_v35 = vmul.f32 %v7057_v2, %v4911_v60  ;;  %v4918_v50 = vmul.f32 %v7061_v21, %v4904_v52  ;;  %vm4924_vm6 = vweird.f32 %v7061_v21  ;;  %vm4945_vm7 = vmor %vm4943_vm5, %vm4944_vm4 }
 0x962   : > { %v4936_v0 = vsel %vm4935_vm15, %v7055_v59, %v4932_v32  ;;  %v4939_v34 = vmul.f32 %v7059_v5, %v4938_v22  ;;  %vm4925_vm9 = vmor %vm4923_vm8, %vm4924_vm6 }
 0x963   : > { %v4916_v31 = vsel %vm4915_vm3, %v7057_v2, %v4912_v35  ;;  %v4951_v44 = vmul.f32 %v4936_v0, %v9738_v33  ;;  %v4952_v63 = vmul.f32 %v4936_v0, %v9740_v40  ;;  %v4919_v42 = vmul.f32 %v7061_v21, %v4918_v50 }
 0x964   : > { %v4947_v36 = vmul.f32 %v4916_v31, %v9742_v29  ;;  %v4948_v14 = vmul.f32 %v4916_v31, %v9744_v28  ;;  %v4940_v49 = vmul.f32 0.5, %v4939_v34 }
 0x965   : > { %v4966_v27 = vmul.f32 %v4960_v46, %v4951_v44  ;;  %v4967_v47 = vmul.f32 %v4961_v13, %v4952_v63  ;;  %v4920_v3 = vmul.f32 0.5, %v4919_v42 }
 0x966   : > { %v4962_v58 = vmul.f32 %v4960_v46, %v4947_v36  ;;  %v4963_v61 = vmul.f32 %v4961_v13, %v4948_v14  ;;  %v4941_v9 = vsub.f32 1.5, %v4940_v49 }
 0x967   : > { %v4980_v37 = vadd.f32 %v4974_v39, %v4966_v27  ;;  %v4921_v56 = vsub.f32 1.5, %v4920_v3  ;;  %v4981_v45 = vadd.f32 %v4975_v16, %v4967_v47 }
 0x968   : > { %v4976_v33 = vadd.f32 %v4974_v39, %v4962_v58  ;;  %v4977_v40 = vadd.f32 %v4975_v16, %v4963_v61  ;;  %v4942_v6 = vmul.f32 %v7059_v5, %v4941_v9 }
 0x969   : > { %4988 = vst [vmem:[#allocation13 + $0x20] sm:$0xff] %v4980_v37  ;;  %v4922_v29 = vmul.f32 %v7061_v21, %v4921_v56 }
 0x96a   : > { %4984 = vst [vmem:[#allocation13] sm:$0xff] %v4976_v33  ;;  %v4946_v28 = vsel %vm4945_vm7, %v7059_v5, %v4942_v6 }
 0x96b   : > { %4985 = vst [vmem:[#allocation13 + $0x8] sm:$0xff] %v4977_v40  ;;  %v4953_v1 = vmul.f32 %v4946_v28, %v9756_v20  ;;  %v4954_v30 = vmul.f32 %v4946_v28, %v9758_v23  ;;  %v4926_v62 = vsel %vm4925_vm9, %v7061_v21, %v4922_v29 }
 0x96c   : > { %4989 = vst [vmem:[#allocation13 + $0x28] sm:$0xff] %v4981_v45  ;;  %v4949_v17 = vmul.f32 %v4926_v62, %v9760_v51  ;;  %v4950_v11 = vmul.f32 %v4926_v62, %v9762_v19 }
 0x96d   : > { %v4968_v48 = vmul.f32 %v4960_v46, %v4953_v1  ;;  %v4969_v26 = vmul.f32 %v4961_v13, %v4954_v30 }
 0x96e   : > { %v4964_v38 = vmul.f32 %v4960_v46, %v4949_v17  ;;  %v4965_v8 = vmul.f32 %v4961_v13, %v4950_v11 }
 0x96f   : > { %v4982_v7 = vadd.f32 %v4974_v39, %v4968_v48  ;;  %v4983_v59 = vadd.f32 %v4975_v16, %v4969_v26 }
 0x970   : > { %v4978_v25 = vadd.f32 %v4974_v39, %v4964_v38  ;;  %v4979_v2 = vadd.f32 %v4975_v16, %v4965_v8 }
 0x971   : > { %4990 = vst [vmem:[#allocation13 + $0x30] sm:$0xff] %v4982_v7 }
 0x972   : > { %4991 = vst [vmem:[#allocation13 + $0x38] sm:$0xff] %v4983_v59 }
 0x973   : > { %4986 = vst [vmem:[#allocation13 + $0x10] sm:$0xff] %v4978_v25 }
 0x974   : > { %4987 = vst [vmem:[#allocation13 + $0x18] sm:$0xff] %v4979_v2 }
 0x975 PF: > { %p6865_p3 = scmp.eq.s32.totalorder %s7454_s11, 1  ;;  %s9940_s23 = sld [smem:[#allocation51_spill]] }
 0x976   : > { %s7377_s2 = smov [#allocation13]   ;;  %s7378_s21 = smov 256  }
 0x977   : > { %s5001_s29 = sshll.u32 %s7377_s2, 4  ;;  %s7379_s0 = smov 16   ;;  %s5002_s29 = int_to_ptr.vmem [resolvable:$true] %s5001_s29 }
 0x97b   : > { %s5003_s20 = sshll.u32 %s9940_s23, 4  ;;  %s5004_s20 = int_to_ptr.hbm [resolvable:$true] %s5003_s20 }
 0x97c   : > { %6834 = dma.vmem_to_hbm [thread:$0]  (%p6865_p3), %s5002_s29, 1024, %s5004_s20, [#allocation5], %s7378_s21, %s7378_s21, %s7379_s0  }
 0x97d   : > { %7337 = dma.done.wait (%p6865_p3), [#allocation5], 1024  }
 0x97e   : > { %7339 = vsyncadd (%p6865_p3), [#allocation5], 4294966272 }
 0x97f PF: > { %s21_s10 = sadd.s32 1, %s7362_s10   ;;  %s9941_s4 = sld [smem:[#allocation18_spill]] }
 0x980   : > { %p18_p4 = scmp.ge.s32.totalorder %s21_s10, 4   ;;  %s9942_s29 = sld [smem:[#allocation20_spill]] }
 0x981   : > { %s9943_s11 = sld [smem:[#allocation19_spill]]  ;;  %s9944_s27 = smov %s7346_s28 }
 0x982   : > { %s9946_s30 = smov %s7358_s9 }
 0x983   :  { %20 = sbr.rel (!%p18_p4) target bundleno = 12 (0xc), region = 151 }
 0x985   : > { %s9945_s28 = smov %s9941_s4 }
 0x987   : > { %s9947_s9 = smov %s9943_s11 }
 0x988   :  { %5020 = vsyncpa [#allocation4], 1 }
 0x989   :  { %5022 = vsyncpa [#allocation4 + $0x1], 1 }
 0x98a   :  { %5023 = vsyncpa [#allocation7], 1 }
 0x98b   :  { %5024 = vsyncpa [#allocation5], 1 }
 0x98c   :  { %5026 = vsyncpa [#allocation5 + $0x1], 1 }

</bundles_post_ra>
